<compile_context>
chip_gen: v7x
topology: tpu7x:2x2x1
jax: 0.10.0
libtpu: 0.0.40
codegen_flags: <defaults>
</compile_context>

<pallas_src>
import jax
import jax.numpy as jnp
from jax.experimental import pallas as pl
from jax.experimental.pallas import tpu as pltpu


# ----------------------------- Pallas kernel --------------------------------
def target_kernel(x_ref, wb_ref, bb_ref,
                  w1_ref, gb_ref,
                  w2_ref, b2_ref,
                  out_ref,
                  rep_ref, acc_ref):
    # One grid step handles a TN-wide slice of the 4096-wide hidden layer.
    #   x_ref:   (B, C*H*W)   f32, resident across the grid
    #   wb_ref:  (C*H*W, 512) bf16, resident
    #   bb_ref:  (1, 512)     f32
    #   w1_ref:  (512, TN)    bf16 tile of projection.net[0].weight
    #   gb_ref:  (2, TN)      f32 tile: row 0 = gamma, row 1 = beta (BN params)
    #   w2_ref:  (TN, 256)    bf16 tile of projection.net[3].weight
    #   b2_ref:  (1, 256)     f32
    #   out_ref: (B, 256)     f32
    #   rep_ref: (B, 512)     bf16 scratch (backbone output, persists)
    #   acc_ref: (B, 256)     f32 scratch (output accumulator)
    j = pl.program_id(0)
    last = pl.num_programs(0) - 1

    # ---- prologue (j == 0): backbone stand-in + accumulator init ----------
    @pl.when(j == 0)
    def _():
        xb = x_ref[...].astype(wb_ref.dtype)          # bf16 for the MXU
        rep_f32 = (jnp.dot(xb, wb_ref[...],
                           preferred_element_type=jnp.float32)
                   + bb_ref[...])
        rep_ref[...] = rep_f32.astype(rep_ref.dtype)  # store once as bf16
        acc_ref[...] = jnp.zeros_like(acc_ref)

    # ---- projection.net[0]: Linear(512 -> TN slice of 4096) ---------------
    # b1 omitted: it is exactly cancelled by the BatchNorm mean subtraction
    # below and leaves the variance unchanged.
    h = jnp.dot(rep_ref[...], w1_ref[...], preferred_element_type=jnp.float32)

    # ---- projection.net[1]: BatchNorm1d (training-mode batch stats) -------
    # One-pass variance + fused affine (single FMA), all in f32.
    mean = jnp.mean(h, axis=0, keepdims=True)
    var = jnp.mean(h * h, axis=0, keepdims=True) - mean * mean
    gamma = gb_ref[0:1, :]
    beta = gb_ref[1:2, :]
    scale = jax.lax.rsqrt(var + 1e-5) * gamma
    shift = beta - mean * scale

    # ---- projection.net[2]: ReLU (fused with the BN affine) ---------------
    h = jnp.maximum(h * scale + shift, 0.0)

    # ---- projection.net[3]: partial Linear(TN -> 256), accumulate over j --
    acc_ref[...] += jnp.dot(h.astype(w2_ref.dtype), w2_ref[...],
                            preferred_element_type=jnp.float32)

    # ---- epilogue (last tile): add b2 exactly once, write back ------------
    @pl.when(j == last)
    def _():
        out_ref[...] = (acc_ref[...] + b2_ref[...]).astype(out_ref.dtype)


# ------------------------------ wrapper --------------------------------------
@jax.jit
def target_forward(x, params):
    wb, bb, w1, b1, gamma, beta, w2, b2 = params
    del b1  # per-feature bias before BatchNorm: exactly cancelled, not streamed
    B = x.shape[0]
    flat, dim = wb.shape
    hidden = w1.shape[1]
    proj = w2.shape[1]

    x_flat = x.reshape(B, flat)      # NCHW flatten == PyTorch reshape order

    # Pack gamma/beta into one (2, HIDDEN) f32 array -> one per-step DMA.
    gb = jnp.concatenate([gamma, beta], axis=0)

    tn = 2048                        # hidden-dim tile; 2 grid steps, bf16 streams
    assert hidden % tn == 0
    grid = (hidden // tn,)

    grid_spec = pltpu.PrefetchScalarGridSpec(
        num_scalar_prefetch=0,
        grid=grid,
        in_specs=[
            pl.BlockSpec((B, flat), lambda j: (0, 0)),     # x (resident)
            pl.BlockSpec((flat, dim), lambda j: (0, 0)),   # wb (resident)
            pl.BlockSpec((1, dim), lambda j: (0, 0)),      # bb
            pl.BlockSpec((dim, tn), lambda j: (0, j)),     # w1 tile
            pl.BlockSpec((2, tn), lambda j: (0, j)),       # gamma/beta tile
            pl.BlockSpec((tn, proj), lambda j: (j, 0)),    # w2 tile
            pl.BlockSpec((1, proj), lambda j: (0, 0)),     # b2
        ],
        out_specs=pl.BlockSpec((B, proj), lambda j: (0, 0)),
        scratch_shapes=[
            pltpu.VMEM((B, dim), jnp.bfloat16),   # representation (bf16, persists)
            pltpu.VMEM((B, proj), jnp.float32),   # output accumulator
        ],
    )

    # Advisory cost model: HBM-bandwidth-bound on weight traffic.
    flops = 2 * B * (flat * dim + dim * hidden + hidden * proj)
    bytes_accessed = (x_flat.size * 4 + wb.size * 2 + bb.size * 4
                      + w1.size * 2 + gb.size * 4 + w2.size * 2
                      + b2.size * 4 + B * proj * 4)
    cost = pl.CostEstimate(flops=flops,
                           transcendentals=hidden,        # rsqrt per feature
                           bytes_accessed=bytes_accessed)

    return pl.pallas_call(
        target_kernel,
        out_shape=jax.ShapeDtypeStruct((B, proj), jnp.float32),
        grid_spec=grid_spec,
        compiler_params=pltpu.CompilerParams(
            dimension_semantics=("arbitrary",),   # reduction into accumulator
            vmem_limit_bytes=32 * 1024 * 1024),   # headroom for TN=2048 on v5e
        cost_estimate=cost,
    )(x_flat, wb, bb, w1, gb, w2, b2)


# ------------------------ pure-JAX reference ---------------------------------
def target_reference(x, params):
    # Mirrors the kernel's mixed-precision numerics: bf16 matmul inputs with
    # f32 accumulation, BatchNorm in f32.
    wb, bb, w1, b1, gamma, beta, w2, b2 = params
    B = x.shape[0]
    xf = x.reshape(B, -1).astype(wb.dtype)
    rep = jnp.dot(xf, wb, preferred_element_type=jnp.float32) + bb
    h = jnp.dot(rep.astype(w1.dtype), w1,
                preferred_element_type=jnp.float32) + b1
    mean = jnp.mean(h, axis=0, keepdims=True)
    var = jnp.mean((h - mean) ** 2, axis=0, keepdims=True)
    h = (h - mean) / jnp.sqrt(var + 1e-5) * gamma + beta
    h = jnp.maximum(h, 0.0)
    return jnp.dot(h.astype(w2.dtype), w2,
                   preferred_element_type=jnp.float32) + b2


# ------------------------------ main ------------------------------------------
if __name__ == "__main__":
    # small, TPU-friendly shapes consistent with the module
    B, C, H, W = 8, 4, 16, 16          # input image (NCHW)
    DIM = 512                          # representation size (MLP dim)
    HIDDEN = 4096                      # projection_hidden_size
    PROJ = 256                         # projection_size
    FLAT = C * H * W

    key = jax.random.PRNGKey(0)
    kx, kwb, kw1, kw2 = jax.random.split(key, 4)

    x = jax.random.normal(kx, (B, C, H, W), dtype=jnp.float32)

    # deterministic parameter init; large weights stored in bf16 (streamed)
    wb = (jax.random.normal(kwb, (FLAT, DIM), dtype=jnp.float32)
          * (1.0 / FLAT ** 0.5)).astype(jnp.bfloat16)
    bb = jnp.zeros((1, DIM), dtype=jnp.float32)
    w1 = (jax.random.normal(kw1, (DIM, HIDDEN), dtype=jnp.float32)
          * (1.0 / DIM ** 0.5)).astype(jnp.bfloat16)
    b1 = jnp.zeros((1, HIDDEN), dtype=jnp.float32)
    gamma = jnp.ones((1, HIDDEN), dtype=jnp.float32)
    beta = jnp.zeros((1, HIDDEN), dtype=jnp.float32)
    w2 = (jax.random.normal(kw2, (HIDDEN, PROJ), dtype=jnp.float32)
          * (1.0 / HIDDEN ** 0.5)).astype(jnp.bfloat16)
    b2 = jnp.zeros((1, PROJ), dtype=jnp.float32)

    params = (wb, bb, w1, b1, gamma, beta, w2, b2)

    out = target_forward(x, params)
    out = jax.block_until_ready(out)

    ref = target_reference(x, params)
    assert out.shape == (B, PROJ), out.shape
    assert jnp.allclose(out, ref, atol=2e-3, rtol=2e-3), "mismatch vs reference"

    print("KERNEL_OK")
</pallas_src>

<mosaic_0001>
module attributes {stable_mosaic.version = 11 : i64} {
  func.func @target_kernel(%arg0: i32, %arg1: memref<8x1024xf32, #tpu.memory_space<vmem>>, %arg2: memref<1024x512xbf16, #tpu.memory_space<vmem>>, %arg3: memref<1x512xf32, #tpu.memory_space<vmem>>, %arg4: memref<512x2048xbf16, #tpu.memory_space<vmem>>, %arg5: memref<2x2048xf32, #tpu.memory_space<vmem>>, %arg6: memref<2048x256xbf16, #tpu.memory_space<vmem>>, %arg7: memref<1x256xf32, #tpu.memory_space<vmem>>, %arg8: memref<8x256xf32, #tpu.memory_space<vmem>>, %arg9: memref<8x512xbf16, #tpu.memory_space<vmem>>, %arg10: memref<8x256xf32, #tpu.memory_space<vmem>>) attributes {dimension_semantics = [#tpu.dimension_semantics<arbitrary>], iteration_bounds = array<i64: 2>, scalar_prefetch = 0 : i64, scratch_operands = 2 : i64, tpu.core_type = #tpu.core_type<tc>, window_params = [{pipeline_mode = #tpu.pipeline_mode<synchronous>, transform_indices = @transform_0, window_bounds = array<i64: 8, 1024>}, {pipeline_mode = #tpu.pipeline_mode<synchronous>, transform_indices = @transform_1, window_bounds = array<i64: 1024, 512>}, {pipeline_mode = #tpu.pipeline_mode<synchronous>, transform_indices = @transform_2, window_bounds = array<i64: 1, 512>}, {transform_indices = @transform_3, window_bounds = array<i64: 512, 2048>}, {transform_indices = @transform_4, window_bounds = array<i64: 2, 2048>}, {transform_indices = @transform_5, window_bounds = array<i64: 2048, 256>}, {pipeline_mode = #tpu.pipeline_mode<synchronous>, transform_indices = @transform_6, window_bounds = array<i64: 1, 256>}, {pipeline_mode = #tpu.pipeline_mode<synchronous>, transform_indices = @transform_7, window_bounds = array<i64: 8, 256>}]} {
    %c0_i32 = arith.constant 0 : i32
    %0 = arith.cmpi eq, %arg0, %c0_i32 : i32
    %1 = arith.extui %0 : i1 to i32
    %c0_i32_0 = arith.constant 0 : i32
    %2 = arith.cmpi ne, %1, %c0_i32_0 : i32
    scf.if %2 {
      %c0_21 = arith.constant 0 : index
      %c0_22 = arith.constant 0 : index
      %40 = vector.load %arg1[%c0_21, %c0_22] : memref<8x1024xf32, #tpu.memory_space<vmem>>, vector<8x1024xf32>
      %41 = arith.truncf %40 : vector<8x1024xf32> to vector<8x1024xbf16>
      %c0_23 = arith.constant 0 : index
      %c0_24 = arith.constant 0 : index
      %42 = vector.load %arg2[%c0_23, %c0_24] : memref<1024x512xbf16, #tpu.memory_space<vmem>>, vector<1024x512xbf16>
      %cst_25 = arith.constant dense<0.000000e+00> : vector<8x512xf32>
      %43 = tpu.matmul %41, %42, %cst_25 {dimension_numbers = #tpu.dot_dimension_numbers<[1], [0], [0], [1], [0, 0, 1, 1], [], []>} : vector<8x1024xbf16>, vector<1024x512xbf16>, vector<8x512xf32> -> vector<8x512xf32>
      %c0_26 = arith.constant 0 : index
      %c0_27 = arith.constant 0 : index
      %44 = vector.load %arg3[%c0_26, %c0_27] : memref<1x512xf32, #tpu.memory_space<vmem>>, vector<1x512xf32>
      %45 = vector.broadcast %44 : vector<1x512xf32> to vector<8x512xf32>
      %46 = arith.addf %43, %45 : vector<8x512xf32>
      %47 = arith.truncf %46 : vector<8x512xf32> to vector<8x512xbf16>
      %c0_28 = arith.constant 0 : index
      %c0_29 = arith.constant 0 : index
      %48 = vector.load %arg9[%c0_28, %c0_29] : memref<8x512xbf16, #tpu.memory_space<vmem>>, vector<8x512xbf16>
      tpu.vector_store %arg9[%c0_28, %c0_29], %47 {strides = array<i32>} : memref<8x512xbf16, #tpu.memory_space<vmem>>, vector<8x512xbf16>,
      %cst_30 = arith.constant 0.000000e+00 : f32
      %49 = vector.broadcast %cst_30 : f32 to vector<8x256xf32>
      %c0_31 = arith.constant 0 : index
      %c0_32 = arith.constant 0 : index
      %50 = vector.load %arg10[%c0_31, %c0_32] : memref<8x256xf32, #tpu.memory_space<vmem>>, vector<8x256xf32>
      tpu.vector_store %arg10[%c0_31, %c0_32], %49 {strides = array<i32>} : memref<8x256xf32, #tpu.memory_space<vmem>>, vector<8x256xf32>,
    } else {
    }
    %c0 = arith.constant 0 : index
    %c0_1 = arith.constant 0 : index
    %3 = vector.load %arg9[%c0, %c0_1] : memref<8x512xbf16, #tpu.memory_space<vmem>>, vector<8x512xbf16>
    %c0_2 = arith.constant 0 : index
    %c0_3 = arith.constant 0 : index
    %4 = vector.load %arg4[%c0_2, %c0_3] : memref<512x2048xbf16, #tpu.memory_space<vmem>>, vector<512x2048xbf16>
    %cst = arith.constant dense<0.000000e+00> : vector<8x2048xf32>
    %5 = tpu.matmul %3, %4, %cst {dimension_numbers = #tpu.dot_dimension_numbers<[1], [0], [0], [1], [0, 0, 1, 1], [], []>} : vector<8x512xbf16>, vector<512x2048xbf16>, vector<8x2048xf32> -> vector<8x2048xf32>
    %cst_4 = arith.constant dense<0.000000e+00> : vector<2048xf32>
    %6 = vector.multi_reduction <add>, %5, %cst_4 [0] : vector<8x2048xf32> to vector<2048xf32>
    %7 = vector.shape_cast %6 : vector<2048xf32> to vector<1x2048xf32>
    %cst_5 = arith.constant 8.000000e+00 : f32
    %8 = vector.broadcast %cst_5 : f32 to vector<1x2048xf32>
    %9 = arith.divf %7, %8 : vector<1x2048xf32>
    %10 = arith.mulf %5, %5 : vector<8x2048xf32>
    %cst_6 = arith.constant dense<0.000000e+00> : vector<2048xf32>
    %11 = vector.multi_reduction <add>, %10, %cst_6 [0] : vector<8x2048xf32> to vector<2048xf32>
    %12 = vector.shape_cast %11 : vector<2048xf32> to vector<1x2048xf32>
    %cst_7 = arith.constant 8.000000e+00 : f32
    %13 = vector.broadcast %cst_7 : f32 to vector<1x2048xf32>
    %14 = arith.divf %12, %13 : vector<1x2048xf32>
    %15 = arith.mulf %9, %9 : vector<1x2048xf32>
    %16 = arith.subf %14, %15 : vector<1x2048xf32>
    %c0_8 = arith.constant 0 : index
    %c0_9 = arith.constant 0 : index
    %17 = vector.load %arg5[%c0_8, %c0_9] : memref<2x2048xf32, #tpu.memory_space<vmem>>, vector<1x2048xf32>
    %c1 = arith.constant 1 : index
    %c0_10 = arith.constant 0 : index
    %18 = vector.load %arg5[%c1, %c0_10] : memref<2x2048xf32, #tpu.memory_space<vmem>>, vector<1x2048xf32>
    %cst_11 = arith.constant 9.99999974E-6 : f32
    %19 = vector.broadcast %cst_11 : f32 to vector<1x2048xf32>
    %20 = arith.addf %16, %19 : vector<1x2048xf32>
    %21 = math.rsqrt %20 : vector<1x2048xf32>
    %22 = arith.mulf %21, %17 : vector<1x2048xf32>
    %23 = arith.mulf %9, %22 : vector<1x2048xf32>
    %24 = arith.subf %18, %23 : vector<1x2048xf32>
    %25 = vector.broadcast %22 : vector<1x2048xf32> to vector<8x2048xf32>
    %26 = arith.mulf %5, %25 : vector<8x2048xf32>
    %27 = vector.broadcast %24 : vector<1x2048xf32> to vector<8x2048xf32>
    %28 = arith.addf %26, %27 : vector<8x2048xf32>
    %cst_12 = arith.constant 0.000000e+00 : f32
    %29 = vector.broadcast %cst_12 : f32 to vector<8x2048xf32>
    %30 = arith.maximumf %28, %29 : vector<8x2048xf32>
    %c0_13 = arith.constant 0 : index
    %c0_14 = arith.constant 0 : index
    %31 = vector.load %arg10[%c0_13, %c0_14] : memref<8x256xf32, #tpu.memory_space<vmem>>, vector<8x256xf32>
    %32 = arith.truncf %30 : vector<8x2048xf32> to vector<8x2048xbf16>
    %c0_15 = arith.constant 0 : index
    %c0_16 = arith.constant 0 : index
    %33 = vector.load %arg6[%c0_15, %c0_16] : memref<2048x256xbf16, #tpu.memory_space<vmem>>, vector<2048x256xbf16>
    %cst_17 = arith.constant dense<0.000000e+00> : vector<8x256xf32>
    %34 = tpu.matmul %32, %33, %cst_17 {dimension_numbers = #tpu.dot_dimension_numbers<[1], [0], [0], [1], [0, 0, 1, 1], [], []>} : vector<8x2048xbf16>, vector<2048x256xbf16>, vector<8x256xf32> -> vector<8x256xf32>
    %35 = arith.addf %31, %34 : vector<8x256xf32>
    %c0_18 = arith.constant 0 : index
    %c0_19 = arith.constant 0 : index
    %36 = vector.load %arg10[%c0_18, %c0_19] : memref<8x256xf32, #tpu.memory_space<vmem>>, vector<8x256xf32>
    tpu.vector_store %arg10[%c0_18, %c0_19], %35 {strides = array<i32>} : memref<8x256xf32, #tpu.memory_space<vmem>>, vector<8x256xf32>,
    %c1_i32 = arith.constant 1 : i32
    %37 = arith.cmpi eq, %arg0, %c1_i32 : i32
    %38 = arith.extui %37 : i1 to i32
    %c0_i32_20 = arith.constant 0 : i32
    %39 = arith.cmpi ne, %38, %c0_i32_20 : i32
    scf.if %39 {
      %c0_21 = arith.constant 0 : index
      %c0_22 = arith.constant 0 : index
      %40 = vector.load %arg10[%c0_21, %c0_22] : memref<8x256xf32, #tpu.memory_space<vmem>>, vector<8x256xf32>
      %c0_23 = arith.constant 0 : index
      %c0_24 = arith.constant 0 : index
      %41 = vector.load %arg7[%c0_23, %c0_24] : memref<1x256xf32, #tpu.memory_space<vmem>>, vector<1x256xf32>
      %42 = vector.broadcast %41 : vector<1x256xf32> to vector<8x256xf32>
      %43 = arith.addf %40, %42 : vector<8x256xf32>
      %c0_25 = arith.constant 0 : index
      %c0_26 = arith.constant 0 : index
      %44 = vector.load %arg8[%c0_25, %c0_26] : memref<8x256xf32, #tpu.memory_space<vmem>>, vector<8x256xf32>
      tpu.vector_store %arg8[%c0_25, %c0_26], %43 {strides = array<i32>} : memref<8x256xf32, #tpu.memory_space<vmem>>, vector<8x256xf32>,
    } else {
    }
    return
  }
  func.func @transform_0(%arg0: i32) -> (i32, i32) {
    %c0_i32 = arith.constant 0 : i32
    %c0_i32_0 = arith.constant 0 : i32
    %c0_i32_1 = arith.constant 0 : i32
    return %c0_i32, %c0_i32_0 : i32, i32
  }
  func.func @transform_1(%arg0: i32) -> (i32, i32) {
    %c0_i32 = arith.constant 0 : i32
    %c0_i32_0 = arith.constant 0 : i32
    %c0_i32_1 = arith.constant 0 : i32
    return %c0_i32, %c0_i32_0 : i32, i32
  }
  func.func @transform_2(%arg0: i32) -> (i32, i32) {
    %c0_i32 = arith.constant 0 : i32
    %c0_i32_0 = arith.constant 0 : i32
    %c0_i32_1 = arith.constant 0 : i32
    return %c0_i32, %c0_i32_0 : i32, i32
  }
  func.func @transform_3(%arg0: i32) -> (i32, i32) {
    %c0_i32 = arith.constant 0 : i32
    %c0_i32_0 = arith.constant 0 : i32
    return %c0_i32, %arg0 : i32, i32
  }
  func.func @transform_4(%arg0: i32) -> (i32, i32) {
    %c0_i32 = arith.constant 0 : i32
    %c0_i32_0 = arith.constant 0 : i32
    return %c0_i32, %arg0 : i32, i32
  }
  func.func @transform_5(%arg0: i32) -> (i32, i32) {
    %c0_i32 = arith.constant 0 : i32
    %c0_i32_0 = arith.constant 0 : i32
    return %arg0, %c0_i32 : i32, i32
  }
  func.func @transform_6(%arg0: i32) -> (i32, i32) {
    %c0_i32 = arith.constant 0 : i32
    %c0_i32_0 = arith.constant 0 : i32
    %c0_i32_1 = arith.constant 0 : i32
    return %c0_i32, %c0_i32_0 : i32, i32
  }
  func.func @transform_7(%arg0: i32) -> (i32, i32) {
    %c0_i32 = arith.constant 0 : i32
    %c0_i32_0 = arith.constant 0 : i32
    %c0_i32_1 = arith.constant 0 : i32
    return %c0_i32, %c0_i32_0 : i32, i32
  }
}

</mosaic_0001>

<bundles_post_ra>
// kernel: target_forward.1
= control target key start
LH: loop header
LB: loop body
LE: loop exit
PB: predicated region body
PF: predicated region fallthrough
CT: control target
= control target key end

     0   :  { %s12877_s0 = inlined_call_operand.vmem [shape: f32[8,1024], index: 0, kind: input, shape index: {}]   ;;  %s12878_s1 = inlined_call_operand.hbm [shape: bf16[1024,512], index: 1, kind: input, shape index: {}]   ;;  %s12879_s2 = inlined_call_operand.hbm [shape: f32[1,512], index: 2, kind: input, shape index: {}]   ;;  %s12880_s3 = inlined_call_operand.hbm [shape: bf16[512,4096], index: 3, kind: input, shape index: {}]   ;;  %s12881_s4 = inlined_call_operand.vmem [shape: f32[2,4096], index: 4, kind: input, shape index: {}]   ;;  %s12882_s5 = inlined_call_operand.hbm [shape: bf16[4096,256], index: 5, kind: input, shape index: {}]   ;;  %s12883_s6 = inlined_call_operand.hbm [shape: f32[1,256], index: 6, kind: input, shape index: {}]   ;;  %s12884_s7 = inlined_call_operand.hbm [shape: f32[8,256], index: 7, kind: output, shape index: {}]  }
   0x1   :  { %12900 = sst [smem:[#allocation24_spill]] %s12878_s1 }
   0x2   :  { %12901 = sst [smem:[#allocation25_spill]] %s12879_s2 }
   0x3   :  { %12902 = sst [smem:[#allocation26_spill]] %s12880_s3 }
   0x4   :  { %12903 = sst [smem:[#allocation27_spill]] %s12884_s7 }
   0x5   :  { %12 = vsyncpa [#allocation5], 0 }
   0x6   :  { %13 = vsyncpa [#allocation8], 0 }
   0x7   :  { %14 = vsyncpa [#allocation6], 0  ;;  %s11115_s24 = smov 0   ;;  %s11117_s25 = smov 0  }
   0x8   :  { %s11119_s26 = smov 0   ;;  %s11121_s27 = smov 0  }
   0x9 LB: > { %s11134_s28 = sadd.s32 4294967295, %s11058_s27   ;;  %s11137_s29 = sadd.s32 1, %s11058_s27   ;;  %s11058_s27 = sphi %s11121_s27, %s12961_s27   ;;  %s11054_s26 = sphi %s11119_s26, %s12965_s26   ;;  %s11050_s25 = sphi %s11117_s25, %s12964_s25   ;;  %s11046_s24 = sphi %s11115_s24, %s12963_s24  }
   0xa   : > { %12904 = sst [smem:[#allocation18_spill]] %s11137_s29  ;;  %s87_s30 = ssub.s32 %s11058_s27, %s11137_s29 }
   0xb   : > { %s90_s8 = sadd.s32 1, %s11054_s26  ;;  %p88_p0 = scmp.eq.s32.totalorder %s87_s30, 0 }
   0xc   : > { %p97_p1 = scmp.ne.s32.totalorder %s11054_s26, %s11050_s25  ;;  %p98_p2 = scmp.eq.s32.totalorder %s11058_s27, 0 }
   0xd   : > { %p103_p3 = scmp.ne.s32.totalorder %s11050_s25, %s11046_s24  ;;  %p12885_p5 = scmp.eq.s32.totalorder %s11134_s28, 0 }
   0xe   : > { %s11147_s9 = scalar_select %p88_p0, %s11054_s26, %s90_s8  }
   0xf   : > { %p11149_p4 = por %p98_p2, %p97_p1  ;;  %p8818_p6 = scmp.ge.s32.totalorder %s11058_s27, 1 }
  0x10   : > { %12905 = sst [smem:[#allocation19_spill]] %s11147_s9  ;;  %p208_p7 = scmp.lt.s32.totalorder %s11058_s27, 3 }
  0x11   : > { %p11158_p8 = por %p12885_p5, %p103_p3  ;;  %s11060_s13 = smov [#allocation4]  }
  0x12   : > { %p11163_p10 = pnand %p8818_p6, %p208_p7  ;;  %s223_s14 = sshll.u32 %s11060_s13, 4  ;;  %s224_s14 = int_to_ptr.vmem [resolvable:$true] %s223_s14 }
  0x13   : > { %s12907_s11 = scalar_select %p11158_p8, 1, 0 }
  0x14   : > { %s12908_s12 = scalar_select %p11163_p10, 1, 0 }
  0x15   : > { %p9962_p11 = pneg %p11163_p10  ;;  %p9982_p13 = scmp.lt.s32.totalorder %s11058_s27, 2 }
  0x16   : > { %s12911_s1 = sld [smem:[#allocation24_spill]] }
  0x17   : > { %p11171_p12 = pnand %p9962_p11, %p12885_p5  ;;  %p11179_p0 = pnand %p9982_p13, %p11149_p4 }
  0x19   : > { %s12909_s15 = scalar_select %p11171_p12, 1, 0 }
  0x1a   : > { %s12910_s17 = scalar_select %p11179_p0, 1, 0 }
  0x1b   : > { %p11191_p2 = pneg %p11171_p12 }
  0x1c   : > { %s10838_s20 = scalar_lea.hbm %s12911_s1, 32768 }
  0x1d   : > { %p10839_p1 = scmp.ne.s32.totalorder %s12911_s1, %s10838_s20  ;;  %p10845_p6 = scmp.lt.u32.totalorder %s10838_s20, %s12911_s1 }
  0x1f   : > { %p10841_p3 = pnand %p11191_p2, %p10839_p1 }
  0x21   : > { %p10842_p4 = pneg %p10841_p3 }
  0x23   : > { %p10847_p7 = pnand %p10845_p6, %p10842_p4 }
  0x25   : > { %10850 = shalt.err (!%p10847_p7)
}
  0x26   : > { %s10851_s8 = scalar_lea.vmem %s224_s14, 32768  ;;  %p10859_p5 = scmp.lt.s32.totalorder %s224_s14, %s224_s14 }
  0x27   : > { %p10852_p11 = scmp.ne.s32.totalorder %s224_s14, %s10851_s8  ;;  %p10860_p8 = scmp.lt.s32.totalorder %s10851_s8, %s10851_s8 }
  0x29   : > { %p10854_p13 = pnand %p10852_p11, %p11191_p2  ;;  %p10861_p10 = por %p10860_p8, %p10859_p5 }
  0x2b   : > { %p10855_p9 = pneg %p10854_p13 }
  0x2d   : > { %p10862_p0 = pnand %p10861_p10, %p10855_p9 }
  0x2f   : > { %10865 = shalt.err (!%p10862_p0)
}
  0x30   : > { %s11061_s10 = smov 256   ;;  %s11062_s13 = smov 16  }
  0x31   : > { %9965 = dma.hbm_to_vmem [thread:$0]  (!%p11171_p12), %s12911_s1, 32768, %s224_s14, [#allocation5], %s11061_s10, %s11061_s10, %s11062_s13  }
  0x32   : > { %s11063_s20 = smov [#allocation7]   ;;  %s12913_s2 = sld [smem:[#allocation25_spill]] }
  0x33   : > { %s237_s21 = sshll.u32 %s11063_s20, 4  ;;  %s238_s21 = int_to_ptr.vmem [resolvable:$true] %s237_s21 }
  0x38   : > { %s10866_s30 = scalar_lea.hbm %s12913_s2, 64 }
  0x39   : > { %p10867_p5 = scmp.ne.s32.totalorder %s12913_s2, %s10866_s30  ;;  %p10873_p10 = scmp.lt.u32.totalorder %s10866_s30, %s12913_s2 }
  0x3b   : > { %p10869_p8 = pnand %p10867_p5, %p11191_p2 }
  0x3d   : > { %p10870_p9 = pneg %p10869_p8 }
  0x3f   : > { %p10875_p0 = pnand %p10873_p10, %p10870_p9 }
  0x41   : > { %10878 = shalt.err (!%p10875_p0)
}
  0x42   : > { %s10879_s14 = scalar_lea.vmem %s238_s21, 64  ;;  %p10887_p6 = scmp.lt.s32.totalorder %s238_s21, %s238_s21 }
  0x43   : > { %p10880_p1 = scmp.ne.s32.totalorder %s238_s21, %s10879_s14  ;;  %p10888_p7 = scmp.lt.s32.totalorder %s10879_s14, %s10879_s14 }
  0x45   : > { %p10882_p3 = pnand %p10880_p1, %p11191_p2  ;;  %p10889_p11 = por %p10888_p7, %p10887_p6 }
  0x47   : > { %p10883_p4 = pneg %p10882_p3 }
  0x49   : > { %p10890_p13 = pnand %p10889_p11, %p10883_p4 }
  0x4b   : > { %10893 = shalt.err (!%p10890_p13)
}
  0x4c   : > { %9968 = dma.hbm_to_vmem [thread:$0]  (!%p11171_p12), %s12913_s2, 64, %s238_s21, [#allocation8]  }
  0x4d   : > { %s261_s29 = sand.u32 1, %s11054_s26   ;;  %s9877_s9 = sshll.u32 %s11058_s27, 10 }
  0x4e   : > { %s8823_s13 = sshll.u32 %s261_s29, 12  ;;  %s12914_s3 = sld [smem:[#allocation26_spill]] }
  0x4f   : > { %s263_s22 = scalar_lea.vmem [#allocation9], %s8823_s13  ;;  %s12915_s30 = sand.u32 1, %s11058_s27  }
  0x50   : > { %s270_s24 = sshll.u32 %s263_s22, 4  ;;  %s11238_s8 = scalar_lea.sflag [#allocation5], %s12915_s30  ;;  %s11234_s24 = int_to_ptr.vmem [resolvable:$true] %s270_s24 }
  0x51   : > { %p12916_p8 = scmp.ne.s32.totalorder %s12910_s17, 0 }
  0x53   : > { %p12893_p9 = pneg %p12916_p8 }
  0x54   : > { %s11232_s20 = scalar_lea.hbm %s12914_s3, %s9877_s9  ;;  %s10899_s10 = scalar_lea.hbm %s12914_s3, 131072 }
  0x55   : > { %s10894_s21 = scalar_lea.hbm %s11232_s20, 65536  ;;  %p10900_p1 = scmp.lt.u32.totalorder %s11232_s20, %s12914_s3 }
  0x56   : > { %p10895_p5 = scmp.ne.s32.totalorder %s11232_s20, %s10894_s21  ;;  %p10901_p3 = scmp.lt.u32.totalorder %s10899_s10, %s10894_s21 }
  0x57   : > { %p10903_p6 = scmp.lt.u32.totalorder %s10894_s21, %s11232_s20 }
  0x58   : > { %p10897_p10 = pnand %p12893_p9, %p10895_p5  ;;  %p10902_p4 = por %p10901_p3, %p10900_p1 }
  0x5a   : > { %p10898_p0 = pneg %p10897_p10  ;;  %p10904_p7 = por %p10903_p6, %p10902_p4 }
  0x5c   : > { %p10905_p11 = pnand %p10904_p7, %p10898_p0 }
  0x5e   : > { %10908 = shalt.err (!%p10905_p11)
}
  0x5f   : > { %s10909_s18 = scalar_lea.vmem %s11234_s24, 65536  ;;  %s11064_s19 = smov [#allocation9]  }
  0x60   : > { %p10910_p13 = scmp.ne.s32.totalorder %s11234_s24, %s10909_s18  ;;  %s10914_s22 = sshll.u32 %s11064_s19, 4  ;;  %s10915_s22 = int_to_ptr.vmem [resolvable:$false] %s10914_s22 }
  0x61   : > { %s10916_s30 = scalar_lea.vmem %s10915_s22, 131072  ;;  %p10917_p12 = scmp.lt.s32.totalorder %s11234_s24, %s10915_s22 }
  0x62   : > { %p10912_p5 = pnand %p10910_p13, %p12893_p9  ;;  %p10918_p1 = scmp.lt.s32.totalorder %s10916_s30, %s10909_s18 }
  0x64   : > { %p10913_p10 = pneg %p10912_p5  ;;  %p10919_p3 = por %p10918_p1, %p10917_p12 }
  0x66   : > { %p10920_p4 = pnand %p10919_p3, %p10913_p10 }
  0x68   : > { %10923 = shalt.err (!%p10920_p4)
}
  0x69   : > { %s11065_s21 = smov 2048   ;;  %s11066_s14 = smov 1024  }
  0x6a   : > { %s11067_s16 = smov 64   ;;  %s8826_s10 = sshll.u32 %s261_s29, 11 }
  0x6b   : > { %9975 = dma.hbm_to_vmem [thread:$0]  (!%p12916_p8), %s11232_s20, 65536, %s11234_s24, %s11238_s8, %s11065_s21, %s11066_s14, %s11067_s16  }
  0x6c   : > { %s11068_s9 = smov [#allocation11]   ;;  %s9879_s18 = sshll.u32 %s11058_s27, 15 }
  0x6d   : > { %s248_s13 = sshll.u32 %s11068_s9, 4  ;;  %s10924_s30 = scalar_lea.hbm %s12883_s6, 32  ;;  %s249_s13 = int_to_ptr.vmem [resolvable:$true] %s248_s13 }
  0x6e   : > { %p10925_p12 = scmp.ne.s32.totalorder %s12883_s6, %s10924_s30  ;;  %p10931_p7 = scmp.lt.u32.totalorder %s10924_s30, %s12883_s6 }
  0x70   : > { %p10927_p0 = pnand %p10925_p12, %p11191_p2 }
  0x72   : > { %p10928_p6 = pneg %p10927_p0 }
  0x74   : > { %p10933_p11 = pnand %p10931_p7, %p10928_p6 }
  0x76   : > { %10936 = shalt.err (!%p10933_p11)
}
  0x77   : > { %s10937_s29 = scalar_lea.vmem %s249_s13, 32  ;;  %p10945_p1 = scmp.lt.s32.totalorder %s249_s13, %s249_s13 }
  0x78   : > { %p10938_p13 = scmp.ne.s32.totalorder %s249_s13, %s10937_s29  ;;  %p10946_p3 = scmp.lt.s32.totalorder %s10937_s29, %s10937_s29 }
  0x7a   : > { %p10940_p5 = pnand %p10938_p13, %p11191_p2  ;;  %p10947_p4 = por %p10946_p3, %p10945_p1 }
  0x7c   : > { %p10941_p10 = pneg %p10940_p5 }
  0x7e   : > { %p10948_p9 = pnand %p10947_p4, %p10941_p10 }
  0x80   : > { %10951 = shalt.err (!%p10948_p9)
}
  0x81   : > { %p12917_p12 = scmp.ne.s32.totalorder %s12909_s15, 0  ;;  %s11290_s27 = scalar_lea.hbm %s12882_s5, %s9879_s18 }
  0x82   : > { %s293_s23 = scalar_lea.vmem [#allocation10], %s8826_s10  ;;  %s10952_s24 = scalar_lea.hbm %s11290_s27, 32768 }
  0x83   : > { %9971 = dma.hbm_to_vmem [thread:$0]  (!%p12917_p12), %s12883_s6, 32, %s249_s13, [#allocation8]  }
  0x84   : > { %s301_s20 = sshll.u32 %s293_s23, 4  ;;  %p10953_p2 = scmp.ne.s32.totalorder %s11290_s27, %s10952_s24  ;;  %s11292_s20 = int_to_ptr.vmem [resolvable:$true] %s301_s20 }
  0x85   : > { %p12918_p9 = pneg %p12916_p8  ;;  %s10957_s14 = scalar_lea.hbm %s12882_s5, 65536 }
  0x86   : > { %p10958_p7 = scmp.lt.u32.totalorder %s11290_s27, %s12882_s5  ;;  %p10959_p11 = scmp.lt.u32.totalorder %s10957_s14, %s10952_s24 }
  0x87   : > { %p10955_p0 = pnand %p10953_p2, %p12918_p9  ;;  %p10961_p5 = scmp.lt.u32.totalorder %s10952_s24, %s11290_s27 }
  0x88   : > { %p10960_p13 = por %p10959_p11, %p10958_p7 }
  0x89   : > { %p10956_p6 = pneg %p10955_p0 }
  0x8a   : > { %p10962_p10 = por %p10961_p5, %p10960_p13 }
  0x8c   : > { %p10963_p1 = pnand %p10962_p10, %p10956_p6 }
  0x8e   : > { %10966 = shalt.err (!%p10963_p1)
}
  0x8f   : > { %s10967_s10 = scalar_lea.vmem %s11292_s20, 32768  ;;  %p12919_p4 = pmov %p12918_p9 }
  0x90   : > { %p10968_p3 = scmp.ne.s32.totalorder %s11292_s20, %s10967_s10  ;;  %s11069_s13 = smov [#allocation10]  }
  0x91   : > { %s10972_s18 = sshll.u32 %s11069_s13, 4  ;;  %s10973_s18 = int_to_ptr.vmem [resolvable:$false] %s10972_s18 }
  0x92   : > { %p10970_p12 = pnand %p10968_p3, %p12919_p4  ;;  %s10974_s19 = scalar_lea.vmem %s10973_s18, 65536 }
  0x93   : > { %p10975_p9 = scmp.lt.s32.totalorder %s11292_s20, %s10973_s18  ;;  %p10976_p0 = scmp.lt.s32.totalorder %s10974_s19, %s10967_s10 }
  0x94   : > { %p10971_p2 = pneg %p10970_p12 }
  0x95   : > { %p10977_p7 = por %p10976_p0, %p10975_p9 }
  0x97   : > { %p10978_p11 = pnand %p10977_p7, %p10971_p2 }
  0x99   : > { %10981 = shalt.err (!%p10978_p11)
}
  0x9a   : > { %s11070_s22 = smov 128   ;;  %s11071_s30 = smov 8  }
  0x9b   : > { %9978 = dma.hbm_to_vmem [thread:$0]  (!%p12916_p8), %s11290_s27, 32768, %s11292_s20, %s11238_s8, %s11070_s22, %s11070_s22, %s11071_s30  }
  0x9c   : > { %p12920_p6 = scmp.ne.s32.totalorder %s12908_s12, 0 }
  0x9e   : > { %313 = sbr.rel (%p12920_p6) target bundleno = 1773 (0x6ed), region = 48 }
  0xa5   : > { %p12921_p13 = scmp.eq.s32.totalorder %s11134_s28, 0 }
  0xa7   : > { %11025 = dma.done.wait (%p12921_p13), [#allocation5], 32768   ;;  %p12922_p5 = pmov %p12921_p13 }
  0xa9   : > { %11027 = vsyncadd (%p12922_p5), [#allocation5], 4294934528  ;;  %p12923_p10 = pmov %p12922_p5 }
  0xaa   : > { %p12924_p1 = pmov %p12922_p5 }
  0xab   : > { %11029 = dma.done.wait (%p12923_p10), [#allocation8], 64  }
  0xac   : > { %11031 = vsyncadd (%p12924_p1), [#allocation8], 4294967232  ;;  %s323_s17 = sand.u32 1, %s11134_s28   ;;  %s325_s8 = sand.u32 1, %s11050_s25  }
  0xad   : > { %s8833_s29 = sshll.u32 %s325_s8, 12  ;;  %s324_s12 = scalar_lea.sflag [#allocation5], %s323_s17 }
  0xae   : > { %s11330_s1 = scalar_lea.vmem [#allocation9], %s8833_s29  ;;  %p12925_p8 = scmp.ne.s32.totalorder %s12907_s11, 0 }
  0xb0   : > { %11033 = dma.done.wait (%p12925_p8), %s324_s12, 98304  }
  0xb1   : > { %11035 = vsyncadd (%p12925_p8), %s324_s12, 4294868992  ;;  %s8834_s2 = sshll.u32 %s325_s8, 11  ;;  %p12926_p3 = pmov %p12924_p1 }
  0xb2   : > { %s11336_s3 = scalar_lea.vmem [#allocation10], %s8834_s2 }
  0xb3   : > { %11037 = dma.done.wait (%p12926_p3), [#allocation8], 32   ;;  %p12927_p4 = pmov %p12924_p1 }
  0xb4   : > { %s8836_s7 = sshll.u32 %s11134_s28, 4  ;;  %p12928_p2 = scmp.ne.s32.totalorder %s11134_s28, 0 }
  0xb5   : > { %11039 = vsyncadd (%p12927_p4), [#allocation8], 4294967264  ;;  %p378_p12 = scmp.lt.s32.totalorder %s8836_s7, 31  ;;  %v10033_v0 = vld [vmem:[#allocation4 + $0x4] ss:$16 sps:$4 sm:$0xff] (!%p12928_p2)   ;;  %v389_v46 = vld [vmem:[%s12877_s0 + $0x8] sm:$0xff] (!%p12928_p2) }
  0xb6   : > { %387 = sbr.rel (%p12928_p2) target bundleno = 657 (0x291), region = 72  ;;  %v10035_v1 = vld [vmem:[#allocation4 + $0xc] ss:$16 sps:$4 sm:$0xff] (!%p12928_p2)   ;;  %1962 = vmatprep.subr.bf16.mxu0 (!%p12928_p2), %v10033_v0  ;;  %v10037_v2 = vld [vmem:[#allocation4] ss:$16 sps:$4 sm:$0xff] (!%p12928_p2)   ;;  %v397_v48 = vpack.c.bf16 (!%p12928_p2), %v389_v46, %v389_v46 }
  0xb7   : > { %s12967_s7 = smov (!%p378_p12, %s8836_s7), 31  ;;  %v10038_v3 = vld [vmem:[#allocation4 + $0x8] ss:$16 sps:$4 sm:$0xff] (!%p12928_p2)   ;;  %2126 = vmatprep.subr.bf16.mxu1 (!%p12928_p2), %v10035_v1  ;;  %v10039_v4 = vld [vmem:[#allocation4 + $0x24] ss:$16 sps:$4 sm:$0xff] (!%p12928_p2)   ;;  %1963 = vmatpush1.bf16.msra.mxu0 (!%p12928_p2), %v10037_v2 }
  0xb8   : > { %s8837_s27 = sshll.u32 %s12967_s7, 1  ;;  %2127 = vmatpush1.bf16.msra.mxu1 (!%p12928_p2), %v10038_v3  ;;  %v10041_v5 = vld [vmem:[#allocation4 + $0x2c] ss:$16 sps:$4 sm:$0xff] (!%p12928_p2)   ;;  %v10043_v6 = vld [vmem:[#allocation4 + $0x20] ss:$16 sps:$4 sm:$0xff] (!%p12928_p2)   ;;  %1964 = vmatprep.subr.bf16.mxu0 (!%p12928_p2), %v10039_v4 }
  0xb9   : > { %s11346_s24 = scalar_lea.vmem %s12881_s4, %s8837_s27  ;;  %v10044_v7 = vld [vmem:[#allocation4 + $0x28] ss:$16 sps:$4 sm:$0xff] (!%p12928_p2)   ;;  %2128 = vmatprep.subr.bf16.mxu1 (!%p12928_p2), %v10041_v5  ;;  %v10045_v8 = vld [vmem:[#allocation4 + $0x44] ss:$16 sps:$4 sm:$0xff] (!%p12928_p2)   ;;  %v10047_v9 = vld [vmem:[#allocation4 + $0x4c] ss:$16 sps:$4 sm:$0xff] (!%p12928_p2)   ;;  %1994 = vmatprep.mubr.bf16.mxu0 (!%p12928_p2), %v397_v48 }
  0xba   : > { %v10049_v10 = vld [vmem:[#allocation4 + $0x40] ss:$16 sps:$4 sm:$0xff] (!%p12928_p2)   ;;  %v10050_v11 = vld [vmem:[#allocation4 + $0x48] ss:$16 sps:$4 sm:$0xff] (!%p12928_p2)   ;;  %v10051_v12 = vld [vmem:[#allocation4 + $0x64] ss:$16 sps:$4 sm:$0xff] (!%p12928_p2)   ;;  %2158 = vmatprep.mubr.bf16.mxu1 (!%p12928_p2), %v397_v48 }
  0xbb   : > { %1965 = vmatpush1.bf16.msra.mxu0 (!%p12928_p2), %v10043_v6  ;;  %v10053_v13 = vld [vmem:[#allocation4 + $0x6c] ss:$16 sps:$4 sm:$0xff] (!%p12928_p2)   ;;  %v10055_v14 = vld [vmem:[#allocation4 + $0x60] ss:$16 sps:$4 sm:$0xff] (!%p12928_p2)   ;;  %v10056_v15 = vld [vmem:[#allocation4 + $0x68] ss:$16 sps:$4 sm:$0xff] (!%p12928_p2)  }
  0xbc   : > { %2129 = vmatpush1.bf16.msra.mxu1 (!%p12928_p2), %v10044_v7  ;;  %1966 = vmatprep.subr.bf16.mxu0 (!%p12928_p2), %v10045_v8  ;;  %v10057_v16 = vld [vmem:[#allocation4 + $0x84] ss:$16 sps:$4 sm:$0xff] (!%p12928_p2)   ;;  %v10059_v17 = vld [vmem:[#allocation4 + $0x8c] ss:$16 sps:$4 sm:$0xff] (!%p12928_p2)   ;;  %v10061_v18 = vld [vmem:[#allocation4 + $0x80] ss:$16 sps:$4 sm:$0xff] (!%p12928_p2)  }
  0xbd   : > { %2130 = vmatprep.subr.bf16.mxu1 %v10047_v9  ;;  %v10062_v19 = vld [vmem:[#allocation4 + $0x88] ss:$16 sps:$4 sm:$0xff]   ;;  %v10063_v20 = vld [vmem:[#allocation4 + $0xa4] ss:$16 sps:$4 sm:$0xff]   ;;  %v10065_v21 = vld [vmem:[#allocation4 + $0xac] ss:$16 sps:$4 sm:$0xff]  }
  0xbe   : > { %v10067_v22 = vld [vmem:[#allocation4 + $0xa0] ss:$16 sps:$4 sm:$0xff]   ;;  %v10068_v23 = vld [vmem:[#allocation4 + $0xa8] ss:$16 sps:$4 sm:$0xff]   ;;  %v10069_v24 = vld [vmem:[#allocation4 + $0xc4] ss:$16 sps:$4 sm:$0xff]  }
  0xbf   : > { %1967 = vmatpush1.bf16.msra.mxu0 %v10049_v10  ;;  %v10071_v25 = vld [vmem:[#allocation4 + $0xcc] ss:$16 sps:$4 sm:$0xff]   ;;  %v10073_v26 = vld [vmem:[#allocation4 + $0xc0] ss:$16 sps:$4 sm:$0xff]   ;;  %v10074_v27 = vld [vmem:[#allocation4 + $0xc8] ss:$16 sps:$4 sm:$0xff]  }
  0xc0   : > { %2131 = vmatpush1.bf16.msra.mxu1 %v10050_v11  ;;  %1968 = vmatprep.subr.bf16.mxu0 %v10051_v12  ;;  %v10075_v28 = vld [vmem:[#allocation4 + $0xe4] ss:$16 sps:$4 sm:$0xff]   ;;  %v10077_v29 = vld [vmem:[#allocation4 + $0xec] ss:$16 sps:$4 sm:$0xff]   ;;  %v10079_v30 = vld [vmem:[#allocation4 + $0xe0] ss:$16 sps:$4 sm:$0xff]  }
  0xc1   : > { %2132 = vmatprep.subr.bf16.mxu1 %v10053_v13  ;;  %v10080_v31 = vld [vmem:[#allocation4 + $0xe8] ss:$16 sps:$4 sm:$0xff]   ;;  %v10081_v32 = vld [vmem:[#allocation4 + $0x104] ss:$16 sps:$4 sm:$0xff]   ;;  %v10083_v33 = vld [vmem:[#allocation4 + $0x10c] ss:$16 sps:$4 sm:$0xff]  }
  0xc2   : > { %v10085_v34 = vld [vmem:[#allocation4 + $0x100] ss:$16 sps:$4 sm:$0xff]   ;;  %v10086_v35 = vld [vmem:[#allocation4 + $0x108] ss:$16 sps:$4 sm:$0xff]   ;;  %v10087_v36 = vld [vmem:[#allocation4 + $0x124] ss:$16 sps:$4 sm:$0xff]  }
  0xc3   : > { %1969 = vmatpush1.bf16.msra.mxu0 %v10055_v14  ;;  %v10089_v37 = vld [vmem:[#allocation4 + $0x12c] ss:$16 sps:$4 sm:$0xff]   ;;  %v10091_v38 = vld [vmem:[#allocation4 + $0x120] ss:$16 sps:$4 sm:$0xff]   ;;  %v10092_v39 = vld [vmem:[#allocation4 + $0x128] ss:$16 sps:$4 sm:$0xff]  }
  0xc4   : > { %2133 = vmatpush1.bf16.msra.mxu1 %v10056_v15  ;;  %1970 = vmatprep.subr.bf16.mxu0 %v10057_v16  ;;  %v10093_v40 = vld [vmem:[#allocation4 + $0x144] ss:$16 sps:$4 sm:$0xff]   ;;  %v10095_v41 = vld [vmem:[#allocation4 + $0x14c] ss:$16 sps:$4 sm:$0xff]   ;;  %v10097_v42 = vld [vmem:[#allocation4 + $0x140] ss:$16 sps:$4 sm:$0xff]  }
  0xc5   : > { %2134 = vmatprep.subr.bf16.mxu1 %v10059_v17  ;;  %v10098_v43 = vld [vmem:[#allocation4 + $0x148] ss:$16 sps:$4 sm:$0xff]   ;;  %v10099_v44 = vld [vmem:[#allocation4 + $0x164] ss:$16 sps:$4 sm:$0xff]   ;;  %v10101_v45 = vld [vmem:[#allocation4 + $0x16c] ss:$16 sps:$4 sm:$0xff]  }
  0xc6   : > { %v10103_v47 = vld [vmem:[#allocation4 + $0x160] ss:$16 sps:$4 sm:$0xff]   ;;  %v10104_v49 = vld [vmem:[#allocation4 + $0x168] ss:$16 sps:$4 sm:$0xff]   ;;  %v10105_v50 = vld [vmem:[#allocation4 + $0x184] ss:$16 sps:$4 sm:$0xff]  }
  0xc7   : > { %1971 = vmatpush1.bf16.msra.mxu0 %v10061_v18  ;;  %v10107_v51 = vld [vmem:[#allocation4 + $0x18c] ss:$16 sps:$4 sm:$0xff]   ;;  %v10109_v52 = vld [vmem:[#allocation4 + $0x180] ss:$16 sps:$4 sm:$0xff]   ;;  %v10110_v53 = vld [vmem:[#allocation4 + $0x188] ss:$16 sps:$4 sm:$0xff]  }
  0xc8   : > { %2135 = vmatpush1.bf16.msra.mxu1 %v10062_v19  ;;  %1972 = vmatprep.subr.bf16.mxu0 %v10063_v20  ;;  %v10111_v54 = vld [vmem:[#allocation4 + $0x1a4] ss:$16 sps:$4 sm:$0xff]   ;;  %v10113_v55 = vld [vmem:[#allocation4 + $0x1ac] ss:$16 sps:$4 sm:$0xff]   ;;  %v10115_v56 = vld [vmem:[#allocation4 + $0x1a0] ss:$16 sps:$4 sm:$0xff]  }
  0xc9   : > { %2136 = vmatprep.subr.bf16.mxu1 %v10065_v21  ;;  %v10116_v57 = vld [vmem:[#allocation4 + $0x1a8] ss:$16 sps:$4 sm:$0xff]   ;;  %v10117_v58 = vld [vmem:[#allocation4 + $0x1c4] ss:$16 sps:$4 sm:$0xff]   ;;  %v10119_v59 = vld [vmem:[#allocation4 + $0x1cc] ss:$16 sps:$4 sm:$0xff]  }
  0xca   : > { %v10121_v60 = vld [vmem:[#allocation4 + $0x1c0] ss:$16 sps:$4 sm:$0xff]   ;;  %v10122_v61 = vld [vmem:[#allocation4 + $0x1c8] ss:$16 sps:$4 sm:$0xff]   ;;  %v10123_v62 = vld [vmem:[#allocation4 + $0x1e4] ss:$16 sps:$4 sm:$0xff]  }
  0xcb   : > { %1973 = vmatpush1.bf16.msra.mxu0 %v10067_v22  ;;  %v10125_v63 = vld [vmem:[#allocation4 + $0x1ec] ss:$16 sps:$4 sm:$0xff]   ;;  %v10127_v0 = vld [vmem:[#allocation4 + $0x1e0] ss:$16 sps:$4 sm:$0xff]   ;;  %v10128_v1 = vld [vmem:[#allocation4 + $0x1e8] ss:$16 sps:$4 sm:$0xff]  }
  0xcc   : > { %2137 = vmatpush1.bf16.msra.mxu1 %v10068_v23  ;;  %1974 = vmatprep.subr.bf16.mxu0 %v10069_v24  ;;  %v388_v2 = vld [vmem:[%s12877_s0] sm:$0xff]  ;;  %v10134_v4 = vld [vmem:[#allocation4 + $0x20c] ss:$16 sps:$4 sm:$0xff]   ;;  %v10132_v7 = vld [vmem:[#allocation4 + $0x208] ss:$16 sps:$4 sm:$0xff]  }
  0xcd   : > { %2138 = vmatprep.subr.bf16.mxu1 %v10071_v25  ;;  %v10131_v3 = vld [vmem:[#allocation4 + $0x204] ss:$16 sps:$4 sm:$0xff]   ;;  %v396_v5 = vpack.c.bf16 %v388_v2, %v388_v2  ;;  %v10129_v6 = vld [vmem:[#allocation4 + $0x200] ss:$16 sps:$4 sm:$0xff]   ;;  %v10140_v9 = vld [vmem:[#allocation4 + $0x22c] ss:$16 sps:$4 sm:$0xff]  }
  0xce   : > { %v10137_v8 = vld [vmem:[#allocation4 + $0x224] ss:$16 sps:$4 sm:$0xff]   ;;  %v10135_v10 = vld [vmem:[#allocation4 + $0x220] ss:$16 sps:$4 sm:$0xff]   ;;  %v10138_v11 = vld [vmem:[#allocation4 + $0x228] ss:$16 sps:$4 sm:$0xff]  }
  0xcf   : > { %1975 = vmatpush1.bf16.msra.mxu0 %v10073_v26  ;;  %v10143_v12 = vld [vmem:[#allocation4 + $0x244] ss:$16 sps:$4 sm:$0xff]   ;;  %v10146_v13 = vld [vmem:[#allocation4 + $0x24c] ss:$16 sps:$4 sm:$0xff]   ;;  %v10141_v14 = vld [vmem:[#allocation4 + $0x240] ss:$16 sps:$4 sm:$0xff]  }
  0xd0   : > { %2139 = vmatpush1.bf16.msra.mxu1 %v10074_v27  ;;  %1976 = vmatprep.subr.bf16.mxu0 %v10075_v28  ;;  %v10144_v15 = vld [vmem:[#allocation4 + $0x248] ss:$16 sps:$4 sm:$0xff]   ;;  %v10149_v16 = vld [vmem:[#allocation4 + $0x264] ss:$16 sps:$4 sm:$0xff]   ;;  %v10152_v17 = vld [vmem:[#allocation4 + $0x26c] ss:$16 sps:$4 sm:$0xff]  }
  0xd1   : > { %2140 = vmatprep.subr.bf16.mxu1 %v10077_v29  ;;  %v10147_v18 = vld [vmem:[#allocation4 + $0x260] ss:$16 sps:$4 sm:$0xff]   ;;  %v10150_v19 = vld [vmem:[#allocation4 + $0x268] ss:$16 sps:$4 sm:$0xff]   ;;  %v10155_v20 = vld [vmem:[#allocation4 + $0x284] ss:$16 sps:$4 sm:$0xff]  }
  0xd2   : > { %v10158_v21 = vld [vmem:[#allocation4 + $0x28c] ss:$16 sps:$4 sm:$0xff]   ;;  %v10153_v22 = vld [vmem:[#allocation4 + $0x280] ss:$16 sps:$4 sm:$0xff]   ;;  %v10156_v23 = vld [vmem:[#allocation4 + $0x288] ss:$16 sps:$4 sm:$0xff]  }
  0xd3   : > { %1977 = vmatpush1.bf16.msra.mxu0 %v10079_v30  ;;  %v10161_v24 = vld [vmem:[#allocation4 + $0x2a4] ss:$16 sps:$4 sm:$0xff]   ;;  %v10164_v25 = vld [vmem:[#allocation4 + $0x2ac] ss:$16 sps:$4 sm:$0xff]   ;;  %v10159_v26 = vld [vmem:[#allocation4 + $0x2a0] ss:$16 sps:$4 sm:$0xff]  }
  0xd4   : > { %2141 = vmatpush1.bf16.msra.mxu1 %v10080_v31  ;;  %1978 = vmatprep.subr.bf16.mxu0 %v10081_v32  ;;  %v10162_v27 = vld [vmem:[#allocation4 + $0x2a8] ss:$16 sps:$4 sm:$0xff]   ;;  %v10167_v28 = vld [vmem:[#allocation4 + $0x2c4] ss:$16 sps:$4 sm:$0xff]   ;;  %v10170_v29 = vld [vmem:[#allocation4 + $0x2cc] ss:$16 sps:$4 sm:$0xff]  }
  0xd5   : > { %2142 = vmatprep.subr.bf16.mxu1 %v10083_v33  ;;  %v391_v30 = vld [vmem:[%s12877_s0 + $0x18] sm:$0xff]  ;;  %v10165_v31 = vld [vmem:[#allocation4 + $0x2c0] ss:$16 sps:$4 sm:$0xff]   ;;  %v10191_v46 = vld [vmem:[#allocation4 + $0x344] ss:$16 sps:$4 sm:$0xff]  }
  0xd6   : > { %v399_v32 = vpack.c.bf16 %v391_v30, %v391_v30  ;;  %v10168_v33 = vld [vmem:[#allocation4 + $0x2c8] ss:$16 sps:$4 sm:$0xff]   ;;  %v10189_v48 = vld [vmem:[#allocation4 + $0x340] ss:$16 sps:$4 sm:$0xff]   ;;  %v10221_v2 = vld [vmem:[#allocation4 + $0x3e4] ss:$16 sps:$4 sm:$0xff]  }
  0xd7   : > { %1979 = vmatpush1.bf16.msra.mxu0 %v10085_v34  ;;  %v10173_v34 = vld [vmem:[#allocation4 + $0x2e4] ss:$16 sps:$4 sm:$0xff]  }
  0xd8   : > { %2143 = vmatpush1.bf16.msra.mxu1 %v10086_v35  ;;  %1980 = vmatprep.subr.bf16.mxu0 %v10087_v36  ;;  %v10176_v35 = vld [vmem:[#allocation4 + $0x2ec] ss:$16 sps:$4 sm:$0xff]   ;;  %v10171_v36 = vld [vmem:[#allocation4 + $0x2e0] ss:$16 sps:$4 sm:$0xff]   ;;  %v10257_v30 = vld [vmem:[#allocation4 + $0x4a4] ss:$16 sps:$4 sm:$0xff]  }
  0xd9   : > { %2144 = vmatprep.subr.bf16.mxu1 %v10089_v37  ;;  %v10174_v37 = vld [vmem:[#allocation4 + $0x2e8] ss:$16 sps:$4 sm:$0xff]  }
  0xdb   : > { %1981 = vmatpush1.bf16.msra.mxu0 %v10091_v38  ;;  %v10179_v38 = vld [vmem:[#allocation4 + $0x304] ss:$16 sps:$4 sm:$0xff]  }
  0xdc   : > { %2145 = vmatpush1.bf16.msra.mxu1 %v10092_v39  ;;  %1982 = vmatprep.subr.bf16.mxu0 %v10093_v40  ;;  %v10182_v39 = vld [vmem:[#allocation4 + $0x30c] ss:$16 sps:$4 sm:$0xff]   ;;  %v10177_v40 = vld [vmem:[#allocation4 + $0x300] ss:$16 sps:$4 sm:$0xff]  }
  0xdd   : > { %2146 = vmatprep.subr.bf16.mxu1 %v10095_v41  ;;  %v10180_v41 = vld [vmem:[#allocation4 + $0x308] ss:$16 sps:$4 sm:$0xff]  }
  0xdf   : > { %1983 = vmatpush1.bf16.msra.mxu0 %v10097_v42  ;;  %v10185_v42 = vld [vmem:[#allocation4 + $0x324] ss:$16 sps:$4 sm:$0xff]  }
  0xe0   : > { %2147 = vmatpush1.bf16.msra.mxu1 %v10098_v43  ;;  %1984 = vmatprep.subr.bf16.mxu0 %v10099_v44  ;;  %v10188_v43 = vld [vmem:[#allocation4 + $0x32c] ss:$16 sps:$4 sm:$0xff]   ;;  %v10183_v44 = vld [vmem:[#allocation4 + $0x320] ss:$16 sps:$4 sm:$0xff]  }
  0xe1   : > { %2148 = vmatprep.subr.bf16.mxu1 %v10101_v45  ;;  %v10186_v45 = vld [vmem:[#allocation4 + $0x328] ss:$16 sps:$4 sm:$0xff]  }
  0xe3   : > { %1985 = vmatpush1.bf16.msra.mxu0 %v10103_v47  ;;  %v10194_v47 = vld [vmem:[#allocation4 + $0x34c] ss:$16 sps:$4 sm:$0xff]  }
  0xe4   : > { %2149 = vmatpush1.bf16.msra.mxu1 %v10104_v49  ;;  %1986 = vmatprep.subr.bf16.mxu0 %v10105_v50  ;;  %v10192_v49 = vld [vmem:[#allocation4 + $0x348] ss:$16 sps:$4 sm:$0xff]   ;;  %v10197_v50 = vld [vmem:[#allocation4 + $0x364] ss:$16 sps:$4 sm:$0xff]  }
  0xe5   : > { %2150 = vmatprep.subr.bf16.mxu1 %v10107_v51  ;;  %v10200_v51 = vld [vmem:[#allocation4 + $0x36c] ss:$16 sps:$4 sm:$0xff]  }
  0xe7   : > { %1987 = vmatpush1.bf16.msra.mxu0 %v10109_v52  ;;  %v10195_v52 = vld [vmem:[#allocation4 + $0x360] ss:$16 sps:$4 sm:$0xff]  }
  0xe8   : > { %2151 = vmatpush1.bf16.msra.mxu1 %v10110_v53  ;;  %1988 = vmatprep.subr.bf16.mxu0 %v10111_v54  ;;  %v10198_v53 = vld [vmem:[#allocation4 + $0x368] ss:$16 sps:$4 sm:$0xff]   ;;  %v10203_v54 = vld [vmem:[#allocation4 + $0x384] ss:$16 sps:$4 sm:$0xff]  }
  0xe9   : > { %2152 = vmatprep.subr.bf16.mxu1 %v10113_v55  ;;  %v10206_v55 = vld [vmem:[#allocation4 + $0x38c] ss:$16 sps:$4 sm:$0xff]  }
  0xeb   : > { %1989 = vmatpush1.bf16.msra.mxu0 %v10115_v56  ;;  %v10201_v56 = vld [vmem:[#allocation4 + $0x380] ss:$16 sps:$4 sm:$0xff]  }
  0xec   : > { %2153 = vmatpush1.bf16.msra.mxu1 %v10116_v57  ;;  %1990 = vmatprep.subr.bf16.mxu0 %v10117_v58  ;;  %v10204_v57 = vld [vmem:[#allocation4 + $0x388] ss:$16 sps:$4 sm:$0xff]   ;;  %v10209_v58 = vld [vmem:[#allocation4 + $0x3a4] ss:$16 sps:$4 sm:$0xff]  }
  0xed   : > { %2154 = vmatprep.subr.bf16.mxu1 %v10119_v59  ;;  %v10212_v59 = vld [vmem:[#allocation4 + $0x3ac] ss:$16 sps:$4 sm:$0xff]  }
  0xef   : > { %1991 = vmatpush1.bf16.msra.mxu0 %v10121_v60  ;;  %v10207_v60 = vld [vmem:[#allocation4 + $0x3a0] ss:$16 sps:$4 sm:$0xff]  }
  0xf0   : > { %2155 = vmatpush1.bf16.msra.mxu1 %v10122_v61  ;;  %1992 = vmatprep.subr.bf16.mxu0 %v10123_v62  ;;  %v10210_v61 = vld [vmem:[#allocation4 + $0x3a8] ss:$16 sps:$4 sm:$0xff]   ;;  %v10215_v62 = vld [vmem:[#allocation4 + $0x3c4] ss:$16 sps:$4 sm:$0xff]  }
  0xf1   : > { %2156 = vmatprep.subr.bf16.mxu1 %v10125_v63  ;;  %v10218_v63 = vld [vmem:[#allocation4 + $0x3cc] ss:$16 sps:$4 sm:$0xff]  }
  0xf3   : > { %1993 = vmatpush1.bf16.msra.mxu0 %v10127_v0  ;;  %v10213_v0 = vld [vmem:[#allocation4 + $0x3c0] ss:$16 sps:$4 sm:$0xff]  }
  0xf4   : > { %2157 = vmatpush1.bf16.msra.mxu1 %v10128_v1  ;;  %2003 = vmatprep.subr.bf16.mxu0 %v10131_v3  ;;  %v10216_v1 = vld [vmem:[#allocation4 + $0x3c8] ss:$16 sps:$4 sm:$0xff]   ;;  %v10224_v3 = vld [vmem:[#allocation4 + $0x3ec] ss:$16 sps:$4 sm:$0xff]  }
  0xf5   : > { %2167 = vmatprep.subr.bf16.mxu1 %v10134_v4  ;;  %v10219_v4 = vld [vmem:[#allocation4 + $0x3e0] ss:$16 sps:$4 sm:$0xff]  }
  0xf6   : > { %1995 = vmatmul.mubr.bf16.vlgmr.msra.gmra.mrb[0].mxu0 %v396_v5 }
  0xf7   : > { %2159 = vmatmul.mubr.bf16.vlgmr.msra.gmra.mrb[0].mxu1 %v396_v5  ;;  %2004 = vmatpush1.bf16.msra.mxu0 %v10129_v6  ;;  %v10222_v5 = vld [vmem:[#allocation4 + $0x3e8] ss:$16 sps:$4 sm:$0xff]   ;;  %v10227_v6 = vld [vmem:[#allocation4 + $0x404] ss:$16 sps:$4 sm:$0xff]  }
  0xf8   : > { %2168 = vmatpush1.bf16.msra.mxu1 %v10132_v7  ;;  %2005 = vmatprep.subr.bf16.mxu0 %v10137_v8  ;;  %v390_v7 = vld [vmem:[%s12877_s0 + $0x10] sm:$0xff]  ;;  %v10230_v8 = vld [vmem:[#allocation4 + $0x40c] ss:$16 sps:$4 sm:$0xff]  }
  0xf9   : > { %2169 = vmatprep.subr.bf16.mxu1 %v10140_v9  ;;  %2035 = vmatprep.mubr.bf16.mxu0 %v399_v32  ;;  %v10225_v9 = vld [vmem:[#allocation4 + $0x400] ss:$16 sps:$4 sm:$0xff]  }
  0xfa   : > { %2199 = vmatprep.mubr.bf16.mxu1 %v399_v32  ;;  %v10255_v32 = vld [vmem:[#allocation4 + $0x4a0] ss:$16 sps:$4 sm:$0xff]  }
  0xfb   : > { %2006 = vmatpush1.bf16.msra.mxu0 %v10135_v10  ;;  %v10228_v10 = vld [vmem:[#allocation4 + $0x408] ss:$16 sps:$4 sm:$0xff]  }
  0xfc   : > { %2170 = vmatpush1.bf16.msra.mxu1 %v10138_v11  ;;  %2007 = vmatprep.subr.bf16.mxu0 %v10143_v12  ;;  %v398_v11 = vpack.c.bf16 %v390_v7, %v390_v7  ;;  %v10233_v12 = vld [vmem:[#allocation4 + $0x424] ss:$16 sps:$4 sm:$0xff]   ;;  %v10320_v7 = vld [vmem:[#allocation4 + $0x5ec] ss:$16 sps:$4 sm:$0xff]  }
  0xfd   : > { %2171 = vmatprep.subr.bf16.mxu1 %v10146_v13  ;;  %v10236_v13 = vld [vmem:[#allocation4 + $0x42c] ss:$16 sps:$4 sm:$0xff]  }
  0xff   : > { %2008 = vmatpush1.bf16.msra.mxu0 %v10141_v14  ;;  %v393_v14 = vld [vmem:[%s12877_s0 + $0x28] sm:$0xff] }
 0x100   : > { %2172 = vmatpush1.bf16.msra.mxu1 %v10144_v15  ;;  %2009 = vmatprep.subr.bf16.mxu0 %v10149_v16  ;;  %v401_v15 = vpack.c.bf16 %v393_v14, %v393_v14  ;;  %v10231_v16 = vld [vmem:[#allocation4 + $0x420] ss:$16 sps:$4 sm:$0xff]   ;;  %v395_v14 = vld [vmem:[%s12877_s0 + $0x38] sm:$0xff] }
 0x101   : > { %2173 = vmatprep.subr.bf16.mxu1 %v10152_v17  ;;  %v10234_v17 = vld [vmem:[#allocation4 + $0x428] ss:$16 sps:$4 sm:$0xff]  }
 0x103   : > { %2010 = vmatpush1.bf16.msra.mxu0 %v10147_v18  ;;  %v10239_v18 = vld [vmem:[#allocation4 + $0x444] ss:$16 sps:$4 sm:$0xff]  }
 0x104   : > { %2174 = vmatpush1.bf16.msra.mxu1 %v10150_v19  ;;  %2011 = vmatprep.subr.bf16.mxu0 %v10155_v20  ;;  %v10242_v19 = vld [vmem:[#allocation4 + $0x44c] ss:$16 sps:$4 sm:$0xff]   ;;  %v10237_v20 = vld [vmem:[#allocation4 + $0x440] ss:$16 sps:$4 sm:$0xff]  }
 0x105   : > { %2175 = vmatprep.subr.bf16.mxu1 %v10158_v21  ;;  %v10240_v21 = vld [vmem:[#allocation4 + $0x448] ss:$16 sps:$4 sm:$0xff]  }
 0x107   : > { %2012 = vmatpush1.bf16.msra.mxu0 %v10153_v22  ;;  %v10245_v22 = vld [vmem:[#allocation4 + $0x464] ss:$16 sps:$4 sm:$0xff]  }
 0x108   : > { %2176 = vmatpush1.bf16.msra.mxu1 %v10156_v23  ;;  %2013 = vmatprep.subr.bf16.mxu0 %v10161_v24  ;;  %v10248_v23 = vld [vmem:[#allocation4 + $0x46c] ss:$16 sps:$4 sm:$0xff]   ;;  %v10243_v24 = vld [vmem:[#allocation4 + $0x460] ss:$16 sps:$4 sm:$0xff]  }
 0x109   : > { %2177 = vmatprep.subr.bf16.mxu1 %v10164_v25  ;;  %v10246_v25 = vld [vmem:[#allocation4 + $0x468] ss:$16 sps:$4 sm:$0xff]  }
 0x10b   : > { %2014 = vmatpush1.bf16.msra.mxu0 %v10159_v26  ;;  %v10251_v26 = vld [vmem:[#allocation4 + $0x484] ss:$16 sps:$4 sm:$0xff]  }
 0x10c   : > { %2178 = vmatpush1.bf16.msra.mxu1 %v10162_v27  ;;  %2015 = vmatprep.subr.bf16.mxu0 %v10167_v28  ;;  %v10254_v27 = vld [vmem:[#allocation4 + $0x48c] ss:$16 sps:$4 sm:$0xff]   ;;  %v10249_v28 = vld [vmem:[#allocation4 + $0x480] ss:$16 sps:$4 sm:$0xff]  }
 0x10d   : > { %2179 = vmatprep.subr.bf16.mxu1 %v10170_v29  ;;  %v10252_v29 = vld [vmem:[#allocation4 + $0x488] ss:$16 sps:$4 sm:$0xff]  }
 0x10f   : > { %2016 = vmatpush1.bf16.msra.mxu0 %v10165_v31  ;;  %v10260_v31 = vld [vmem:[#allocation4 + $0x4ac] ss:$16 sps:$4 sm:$0xff]  }
 0x110   : > { %2180 = vmatpush1.bf16.msra.mxu1 %v10168_v33  ;;  %2017 = vmatprep.subr.bf16.mxu0 %v10173_v34  ;;  %v10258_v33 = vld [vmem:[#allocation4 + $0x4a8] ss:$16 sps:$4 sm:$0xff]   ;;  %v10263_v34 = vld [vmem:[#allocation4 + $0x4c4] ss:$16 sps:$4 sm:$0xff]  }
 0x111   : > { %2181 = vmatprep.subr.bf16.mxu1 %v10176_v35  ;;  %v10266_v35 = vld [vmem:[#allocation4 + $0x4cc] ss:$16 sps:$4 sm:$0xff]  }
 0x113   : > { %2018 = vmatpush1.bf16.msra.mxu0 %v10171_v36  ;;  %v10261_v36 = vld [vmem:[#allocation4 + $0x4c0] ss:$16 sps:$4 sm:$0xff]  }
 0x114   : > { %2182 = vmatpush1.bf16.msra.mxu1 %v10174_v37  ;;  %2019 = vmatprep.subr.bf16.mxu0 %v10179_v38  ;;  %v10264_v37 = vld [vmem:[#allocation4 + $0x4c8] ss:$16 sps:$4 sm:$0xff]   ;;  %v10269_v38 = vld [vmem:[#allocation4 + $0x4e4] ss:$16 sps:$4 sm:$0xff]  }
 0x115   : > { %2183 = vmatprep.subr.bf16.mxu1 %v10182_v39  ;;  %v10272_v39 = vld [vmem:[#allocation4 + $0x4ec] ss:$16 sps:$4 sm:$0xff]  }
 0x117   : > { %2020 = vmatpush1.bf16.msra.mxu0 %v10177_v40  ;;  %v10267_v40 = vld [vmem:[#allocation4 + $0x4e0] ss:$16 sps:$4 sm:$0xff]  }
 0x118   : > { %2184 = vmatpush1.bf16.msra.mxu1 %v10180_v41  ;;  %2021 = vmatprep.subr.bf16.mxu0 %v10185_v42  ;;  %v10270_v41 = vld [vmem:[#allocation4 + $0x4e8] ss:$16 sps:$4 sm:$0xff]   ;;  %v10275_v42 = vld [vmem:[#allocation4 + $0x504] ss:$16 sps:$4 sm:$0xff]  }
 0x119   : > { %2185 = vmatprep.subr.bf16.mxu1 %v10188_v43  ;;  %v10278_v43 = vld [vmem:[#allocation4 + $0x50c] ss:$16 sps:$4 sm:$0xff]  }
 0x11b   : > { %2022 = vmatpush1.bf16.msra.mxu0 %v10183_v44  ;;  %v10273_v44 = vld [vmem:[#allocation4 + $0x500] ss:$16 sps:$4 sm:$0xff]  }
 0x11c   : > { %2186 = vmatpush1.bf16.msra.mxu1 %v10186_v45  ;;  %2023 = vmatprep.subr.bf16.mxu0 %v10191_v46  ;;  %v10276_v45 = vld [vmem:[#allocation4 + $0x508] ss:$16 sps:$4 sm:$0xff]   ;;  %v10281_v46 = vld [vmem:[#allocation4 + $0x524] ss:$16 sps:$4 sm:$0xff]  }
 0x11d   : > { %2187 = vmatprep.subr.bf16.mxu1 %v10194_v47  ;;  %v10284_v47 = vld [vmem:[#allocation4 + $0x52c] ss:$16 sps:$4 sm:$0xff]  }
 0x11f   : > { %2024 = vmatpush1.bf16.msra.mxu0 %v10189_v48  ;;  %v10279_v48 = vld [vmem:[#allocation4 + $0x520] ss:$16 sps:$4 sm:$0xff]  }
 0x120   : > { %2188 = vmatpush1.bf16.msra.mxu1 %v10192_v49  ;;  %2025 = vmatprep.subr.bf16.mxu0 %v10197_v50  ;;  %v10282_v49 = vld [vmem:[#allocation4 + $0x528] ss:$16 sps:$4 sm:$0xff]   ;;  %v10287_v50 = vld [vmem:[#allocation4 + $0x544] ss:$16 sps:$4 sm:$0xff]  }
 0x121   : > { %2189 = vmatprep.subr.bf16.mxu1 %v10200_v51  ;;  %v10290_v51 = vld [vmem:[#allocation4 + $0x54c] ss:$16 sps:$4 sm:$0xff]  }
 0x123   : > { %2026 = vmatpush1.bf16.msra.mxu0 %v10195_v52  ;;  %v10285_v52 = vld [vmem:[#allocation4 + $0x540] ss:$16 sps:$4 sm:$0xff]  }
 0x124   : > { %2190 = vmatpush1.bf16.msra.mxu1 %v10198_v53  ;;  %2027 = vmatprep.subr.bf16.mxu0 %v10203_v54  ;;  %v10288_v53 = vld [vmem:[#allocation4 + $0x548] ss:$16 sps:$4 sm:$0xff]   ;;  %v10293_v54 = vld [vmem:[#allocation4 + $0x564] ss:$16 sps:$4 sm:$0xff]  }
 0x125   : > { %2191 = vmatprep.subr.bf16.mxu1 %v10206_v55  ;;  %v10296_v55 = vld [vmem:[#allocation4 + $0x56c] ss:$16 sps:$4 sm:$0xff]  }
 0x127   : > { %2028 = vmatpush1.bf16.msra.mxu0 %v10201_v56  ;;  %v10291_v56 = vld [vmem:[#allocation4 + $0x560] ss:$16 sps:$4 sm:$0xff]  }
 0x128   : > { %2192 = vmatpush1.bf16.msra.mxu1 %v10204_v57  ;;  %2029 = vmatprep.subr.bf16.mxu0 %v10209_v58  ;;  %v10294_v57 = vld [vmem:[#allocation4 + $0x568] ss:$16 sps:$4 sm:$0xff]   ;;  %v10299_v58 = vld [vmem:[#allocation4 + $0x584] ss:$16 sps:$4 sm:$0xff]  }
 0x129   : > { %2193 = vmatprep.subr.bf16.mxu1 %v10212_v59  ;;  %v10302_v59 = vld [vmem:[#allocation4 + $0x58c] ss:$16 sps:$4 sm:$0xff]  }
 0x12b   : > { %2030 = vmatpush1.bf16.msra.mxu0 %v10207_v60  ;;  %v10297_v60 = vld [vmem:[#allocation4 + $0x580] ss:$16 sps:$4 sm:$0xff]  }
 0x12c   : > { %2194 = vmatpush1.bf16.msra.mxu1 %v10210_v61  ;;  %2031 = vmatprep.subr.bf16.mxu0 %v10215_v62  ;;  %v10300_v61 = vld [vmem:[#allocation4 + $0x588] ss:$16 sps:$4 sm:$0xff]   ;;  %v10305_v62 = vld [vmem:[#allocation4 + $0x5a4] ss:$16 sps:$4 sm:$0xff]  }
 0x12d   : > { %2195 = vmatprep.subr.bf16.mxu1 %v10218_v63  ;;  %v10308_v63 = vld [vmem:[#allocation4 + $0x5ac] ss:$16 sps:$4 sm:$0xff]  }
 0x12f   : > { %2032 = vmatpush1.bf16.msra.mxu0 %v10213_v0  ;;  %v10303_v0 = vld [vmem:[#allocation4 + $0x5a0] ss:$16 sps:$4 sm:$0xff]  }
 0x130   : > { %2196 = vmatpush1.bf16.msra.mxu1 %v10216_v1  ;;  %2033 = vmatprep.subr.bf16.mxu0 %v10221_v2  ;;  %v10306_v1 = vld [vmem:[#allocation4 + $0x5a8] ss:$16 sps:$4 sm:$0xff]   ;;  %v10311_v2 = vld [vmem:[#allocation4 + $0x5c4] ss:$16 sps:$4 sm:$0xff]  }
 0x131   : > { %2197 = vmatprep.subr.bf16.mxu1 %v10224_v3  ;;  %v10314_v3 = vld [vmem:[#allocation4 + $0x5cc] ss:$16 sps:$4 sm:$0xff]  }
 0x133   : > { %2034 = vmatpush1.bf16.msra.mxu0 %v10219_v4  ;;  %v10309_v4 = vld [vmem:[#allocation4 + $0x5c0] ss:$16 sps:$4 sm:$0xff]  }
 0x134   : > { %2198 = vmatpush1.bf16.msra.mxu1 %v10222_v5  ;;  %2044 = vmatprep.subr.bf16.mxu0 %v10227_v6  ;;  %v10312_v5 = vld [vmem:[#allocation4 + $0x5c8] ss:$16 sps:$4 sm:$0xff]   ;;  %v10317_v6 = vld [vmem:[#allocation4 + $0x5e4] ss:$16 sps:$4 sm:$0xff]  }
 0x135   : > { %2208 = vmatprep.subr.bf16.mxu1 %v10230_v8  ;;  %v10315_v8 = vld [vmem:[#allocation4 + $0x5e0] ss:$16 sps:$4 sm:$0xff]  }
 0x136   : > { %2036 = vmatmul.mubr.bf16.vlgmr.msra.gmra.mrb[0].mxu0 %v398_v11 }
 0x137   : > { %2200 = vmatmul.mubr.bf16.vlgmr.msra.gmra.mrb[0].mxu1 %v398_v11  ;;  %2045 = vmatpush1.bf16.msra.mxu0 %v10225_v9  ;;  %v10318_v9 = vld [vmem:[#allocation4 + $0x5e8] ss:$16 sps:$4 sm:$0xff]   ;;  %v10323_v11 = vld [vmem:[#allocation4 + $0x604] ss:$16 sps:$4 sm:$0xff]  }
 0x138   : > { %2209 = vmatpush1.bf16.msra.mxu1 %v10228_v10  ;;  %2046 = vmatprep.subr.bf16.mxu0 %v10233_v12  ;;  %v392_v10 = vld [vmem:[%s12877_s0 + $0x20] sm:$0xff]  ;;  %v10326_v12 = vld [vmem:[#allocation4 + $0x60c] ss:$16 sps:$4 sm:$0xff]  }
 0x139   : > { %2210 = vmatprep.subr.bf16.mxu1 %v10236_v13  ;;  %2076 = vmatprep.mubr.bf16.mxu0 %v401_v15  ;;  %v400_v13 = vpack.c.bf16 %v392_v10, %v392_v10  ;;  %v10413_v10 = vld [vmem:[#allocation4 + $0x7e4] ss:$16 sps:$4 sm:$0xff]  }
 0x13a   : > { %2240 = vmatprep.mubr.bf16.mxu1 %v401_v15  ;;  %v10321_v15 = vld [vmem:[#allocation4 + $0x600] ss:$16 sps:$4 sm:$0xff]  }
 0x13b   : > { %2047 = vmatpush1.bf16.msra.mxu0 %v10231_v16  ;;  %v10324_v16 = vld [vmem:[#allocation4 + $0x608] ss:$16 sps:$4 sm:$0xff]  }
 0x13c   : > { %2211 = vmatpush1.bf16.msra.mxu1 %v10234_v17  ;;  %2048 = vmatprep.subr.bf16.mxu0 %v10239_v18  ;;  %v10329_v17 = vld [vmem:[#allocation4 + $0x624] ss:$16 sps:$4 sm:$0xff]   ;;  %v10332_v18 = vld [vmem:[#allocation4 + $0x62c] ss:$16 sps:$4 sm:$0xff]  }
 0x13d   : > { %2212 = vmatprep.subr.bf16.mxu1 %v10242_v19  ;;  %v403_v19 = vpack.c.bf16 %v395_v14, %v395_v14  ;;  %v394_v14 = vld [vmem:[%s12877_s0 + $0x30] sm:$0xff] }
 0x13f   : > { %2049 = vmatpush1.bf16.msra.mxu0 %v10237_v20  ;;  %v10327_v20 = vld [vmem:[#allocation4 + $0x620] ss:$16 sps:$4 sm:$0xff]  }
 0x140   : > { %2213 = vmatpush1.bf16.msra.mxu1 %v10240_v21  ;;  %2050 = vmatprep.subr.bf16.mxu0 %v10245_v22  ;;  %v10330_v21 = vld [vmem:[#allocation4 + $0x628] ss:$16 sps:$4 sm:$0xff]   ;;  %v10335_v22 = vld [vmem:[#allocation4 + $0x644] ss:$16 sps:$4 sm:$0xff]  }
 0x141   : > { %2214 = vmatprep.subr.bf16.mxu1 %v10248_v23  ;;  %v10338_v23 = vld [vmem:[#allocation4 + $0x64c] ss:$16 sps:$4 sm:$0xff]  }
 0x143   : > { %2051 = vmatpush1.bf16.msra.mxu0 %v10243_v24  ;;  %v10333_v24 = vld [vmem:[#allocation4 + $0x640] ss:$16 sps:$4 sm:$0xff]  }
 0x144   : > { %2215 = vmatpush1.bf16.msra.mxu1 %v10246_v25  ;;  %2052 = vmatprep.subr.bf16.mxu0 %v10251_v26  ;;  %v10336_v25 = vld [vmem:[#allocation4 + $0x648] ss:$16 sps:$4 sm:$0xff]   ;;  %v10341_v26 = vld [vmem:[#allocation4 + $0x664] ss:$16 sps:$4 sm:$0xff]  }
 0x145   : > { %2216 = vmatprep.subr.bf16.mxu1 %v10254_v27  ;;  %v10344_v27 = vld [vmem:[#allocation4 + $0x66c] ss:$16 sps:$4 sm:$0xff]  }
 0x147   : > { %2053 = vmatpush1.bf16.msra.mxu0 %v10249_v28  ;;  %v10339_v28 = vld [vmem:[#allocation4 + $0x660] ss:$16 sps:$4 sm:$0xff]  }
 0x148   : > { %2217 = vmatpush1.bf16.msra.mxu1 %v10252_v29  ;;  %2054 = vmatprep.subr.bf16.mxu0 %v10257_v30  ;;  %v10342_v29 = vld [vmem:[#allocation4 + $0x668] ss:$16 sps:$4 sm:$0xff]   ;;  %v10347_v30 = vld [vmem:[#allocation4 + $0x684] ss:$16 sps:$4 sm:$0xff]  }
 0x149   : > { %2218 = vmatprep.subr.bf16.mxu1 %v10260_v31  ;;  %v10350_v31 = vld [vmem:[#allocation4 + $0x68c] ss:$16 sps:$4 sm:$0xff]  }
 0x14b   : > { %2055 = vmatpush1.bf16.msra.mxu0 %v10255_v32  ;;  %v10345_v32 = vld [vmem:[#allocation4 + $0x680] ss:$16 sps:$4 sm:$0xff]  }
 0x14c   : > { %2219 = vmatpush1.bf16.msra.mxu1 %v10258_v33  ;;  %2056 = vmatprep.subr.bf16.mxu0 %v10263_v34  ;;  %v10348_v33 = vld [vmem:[#allocation4 + $0x688] ss:$16 sps:$4 sm:$0xff]   ;;  %v10353_v34 = vld [vmem:[#allocation4 + $0x6a4] ss:$16 sps:$4 sm:$0xff]  }
 0x14d   : > { %2220 = vmatprep.subr.bf16.mxu1 %v10266_v35  ;;  %v10356_v35 = vld [vmem:[#allocation4 + $0x6ac] ss:$16 sps:$4 sm:$0xff]  }
 0x14f   : > { %2057 = vmatpush1.bf16.msra.mxu0 %v10261_v36  ;;  %v10351_v36 = vld [vmem:[#allocation4 + $0x6a0] ss:$16 sps:$4 sm:$0xff]  }
 0x150   : > { %2221 = vmatpush1.bf16.msra.mxu1 %v10264_v37  ;;  %2058 = vmatprep.subr.bf16.mxu0 %v10269_v38  ;;  %v10354_v37 = vld [vmem:[#allocation4 + $0x6a8] ss:$16 sps:$4 sm:$0xff]   ;;  %v10359_v38 = vld [vmem:[#allocation4 + $0x6c4] ss:$16 sps:$4 sm:$0xff]  }
 0x151   : > { %2222 = vmatprep.subr.bf16.mxu1 %v10272_v39  ;;  %v10362_v39 = vld [vmem:[#allocation4 + $0x6cc] ss:$16 sps:$4 sm:$0xff]  }
 0x153   : > { %2059 = vmatpush1.bf16.msra.mxu0 %v10267_v40  ;;  %v10357_v40 = vld [vmem:[#allocation4 + $0x6c0] ss:$16 sps:$4 sm:$0xff]  }
 0x154   : > { %2223 = vmatpush1.bf16.msra.mxu1 %v10270_v41  ;;  %2060 = vmatprep.subr.bf16.mxu0 %v10275_v42  ;;  %v10360_v41 = vld [vmem:[#allocation4 + $0x6c8] ss:$16 sps:$4 sm:$0xff]   ;;  %v10365_v42 = vld [vmem:[#allocation4 + $0x6e4] ss:$16 sps:$4 sm:$0xff]  }
 0x155   : > { %2224 = vmatprep.subr.bf16.mxu1 %v10278_v43  ;;  %v10368_v43 = vld [vmem:[#allocation4 + $0x6ec] ss:$16 sps:$4 sm:$0xff]  }
 0x157   : > { %2061 = vmatpush1.bf16.msra.mxu0 %v10273_v44  ;;  %v10363_v44 = vld [vmem:[#allocation4 + $0x6e0] ss:$16 sps:$4 sm:$0xff]  }
 0x158   : > { %2225 = vmatpush1.bf16.msra.mxu1 %v10276_v45  ;;  %2062 = vmatprep.subr.bf16.mxu0 %v10281_v46  ;;  %v10366_v45 = vld [vmem:[#allocation4 + $0x6e8] ss:$16 sps:$4 sm:$0xff]   ;;  %v10371_v46 = vld [vmem:[#allocation4 + $0x704] ss:$16 sps:$4 sm:$0xff]  }
 0x159   : > { %2226 = vmatprep.subr.bf16.mxu1 %v10284_v47  ;;  %v10374_v47 = vld [vmem:[#allocation4 + $0x70c] ss:$16 sps:$4 sm:$0xff]  }
 0x15b   : > { %2063 = vmatpush1.bf16.msra.mxu0 %v10279_v48  ;;  %v10369_v48 = vld [vmem:[#allocation4 + $0x700] ss:$16 sps:$4 sm:$0xff]  }
 0x15c   : > { %2227 = vmatpush1.bf16.msra.mxu1 %v10282_v49  ;;  %2064 = vmatprep.subr.bf16.mxu0 %v10287_v50  ;;  %v10372_v49 = vld [vmem:[#allocation4 + $0x708] ss:$16 sps:$4 sm:$0xff]   ;;  %v10377_v50 = vld [vmem:[#allocation4 + $0x724] ss:$16 sps:$4 sm:$0xff]  }
 0x15d   : > { %2228 = vmatprep.subr.bf16.mxu1 %v10290_v51  ;;  %v10380_v51 = vld [vmem:[#allocation4 + $0x72c] ss:$16 sps:$4 sm:$0xff]  }
 0x15f   : > { %2065 = vmatpush1.bf16.msra.mxu0 %v10285_v52  ;;  %v10375_v52 = vld [vmem:[#allocation4 + $0x720] ss:$16 sps:$4 sm:$0xff]  }
 0x160   : > { %2229 = vmatpush1.bf16.msra.mxu1 %v10288_v53  ;;  %2066 = vmatprep.subr.bf16.mxu0 %v10293_v54  ;;  %v10378_v53 = vld [vmem:[#allocation4 + $0x728] ss:$16 sps:$4 sm:$0xff]   ;;  %v10383_v54 = vld [vmem:[#allocation4 + $0x744] ss:$16 sps:$4 sm:$0xff]  }
 0x161   : > { %2230 = vmatprep.subr.bf16.mxu1 %v10296_v55  ;;  %v10386_v55 = vld [vmem:[#allocation4 + $0x74c] ss:$16 sps:$4 sm:$0xff]  }
 0x163   : > { %2067 = vmatpush1.bf16.msra.mxu0 %v10291_v56  ;;  %v10381_v56 = vld [vmem:[#allocation4 + $0x740] ss:$16 sps:$4 sm:$0xff]  }
 0x164   : > { %2231 = vmatpush1.bf16.msra.mxu1 %v10294_v57  ;;  %2068 = vmatprep.subr.bf16.mxu0 %v10299_v58  ;;  %v10384_v57 = vld [vmem:[#allocation4 + $0x748] ss:$16 sps:$4 sm:$0xff]   ;;  %v10389_v58 = vld [vmem:[#allocation4 + $0x764] ss:$16 sps:$4 sm:$0xff]  }
 0x165   : > { %2232 = vmatprep.subr.bf16.mxu1 %v10302_v59  ;;  %v10392_v59 = vld [vmem:[#allocation4 + $0x76c] ss:$16 sps:$4 sm:$0xff]  }
 0x167   : > { %2069 = vmatpush1.bf16.msra.mxu0 %v10297_v60  ;;  %v10387_v60 = vld [vmem:[#allocation4 + $0x760] ss:$16 sps:$4 sm:$0xff]  }
 0x168   : > { %2233 = vmatpush1.bf16.msra.mxu1 %v10300_v61  ;;  %2070 = vmatprep.subr.bf16.mxu0 %v10305_v62  ;;  %v10390_v61 = vld [vmem:[#allocation4 + $0x768] ss:$16 sps:$4 sm:$0xff]   ;;  %v10395_v62 = vld [vmem:[#allocation4 + $0x784] ss:$16 sps:$4 sm:$0xff]  }
 0x169   : > { %2234 = vmatprep.subr.bf16.mxu1 %v10308_v63  ;;  %v10398_v63 = vld [vmem:[#allocation4 + $0x78c] ss:$16 sps:$4 sm:$0xff]  }
 0x16b   : > { %2071 = vmatpush1.bf16.msra.mxu0 %v10303_v0  ;;  %v10393_v0 = vld [vmem:[#allocation4 + $0x780] ss:$16 sps:$4 sm:$0xff]  }
 0x16c   : > { %2235 = vmatpush1.bf16.msra.mxu1 %v10306_v1  ;;  %2072 = vmatprep.subr.bf16.mxu0 %v10311_v2  ;;  %v10396_v1 = vld [vmem:[#allocation4 + $0x788] ss:$16 sps:$4 sm:$0xff]   ;;  %v10401_v2 = vld [vmem:[#allocation4 + $0x7a4] ss:$16 sps:$4 sm:$0xff]  }
 0x16d   : > { %2236 = vmatprep.subr.bf16.mxu1 %v10314_v3  ;;  %v10404_v3 = vld [vmem:[#allocation4 + $0x7ac] ss:$16 sps:$4 sm:$0xff]  }
 0x16f   : > { %2073 = vmatpush1.bf16.msra.mxu0 %v10309_v4  ;;  %v10399_v4 = vld [vmem:[#allocation4 + $0x7a0] ss:$16 sps:$4 sm:$0xff]  }
 0x170   : > { %2237 = vmatpush1.bf16.msra.mxu1 %v10312_v5  ;;  %2074 = vmatprep.subr.bf16.mxu0 %v10317_v6  ;;  %v10402_v5 = vld [vmem:[#allocation4 + $0x7a8] ss:$16 sps:$4 sm:$0xff]   ;;  %v10407_v6 = vld [vmem:[#allocation4 + $0x7c4] ss:$16 sps:$4 sm:$0xff]  }
 0x171   : > { %2238 = vmatprep.subr.bf16.mxu1 %v10320_v7  ;;  %v10410_v7 = vld [vmem:[#allocation4 + $0x7cc] ss:$16 sps:$4 sm:$0xff]  }
 0x173   : > { %2075 = vmatpush1.bf16.msra.mxu0 %v10315_v8  ;;  %v10405_v8 = vld [vmem:[#allocation4 + $0x7c0] ss:$16 sps:$4 sm:$0xff]  }
 0x174   : > { %2239 = vmatpush1.bf16.msra.mxu1 %v10318_v9  ;;  %2085 = vmatprep.subr.bf16.mxu0 %v10323_v11  ;;  %v10408_v9 = vld [vmem:[#allocation4 + $0x7c8] ss:$16 sps:$4 sm:$0xff]   ;;  %v10416_v11 = vld [vmem:[#allocation4 + $0x7ec] ss:$16 sps:$4 sm:$0xff]  }
 0x175   : > { %2249 = vmatprep.subr.bf16.mxu1 %v10326_v12  ;;  %v10411_v12 = vld [vmem:[#allocation4 + $0x7e0] ss:$16 sps:$4 sm:$0xff]  }
 0x176   : > { %2077 = vmatmul.mubr.bf16.vlgmr.msra.gmra.mrb[0].mxu0 %v400_v13 }
 0x177   : > { %2241 = vmatmul.mubr.bf16.vlgmr.msra.gmra.mrb[0].mxu1 %v400_v13  ;;  %2086 = vmatpush1.bf16.msra.mxu0 %v10321_v15  ;;  %v10414_v13 = vld [vmem:[#allocation4 + $0x7e8] ss:$16 sps:$4 sm:$0xff]   ;;  %v402_v15 = vpack.c.bf16 %v394_v14, %v394_v14 }
 0x178   : > { %2250 = vmatpush1.bf16.msra.mxu1 %v10324_v16  ;;  %2087 = vmatprep.subr.bf16.mxu0 %v10329_v17  ;;  %v11072_v16 = vmov 0.0   ;;  %v662_v17 = vlaneseq }
 0x179   : > { %2251 = vmatprep.subr.bf16.mxu1 %v10332_v18  ;;  %2117 = vmatprep.mubr.bf16.mxu0 %v403_v19  ;;  %2308 = vst [vmem:[#allocation3] sm:$0xff] %v11072_v16  ;;  %2309 = vst [vmem:[#allocation3 + $0x8] sm:$0xff] %v11072_v16 }
 0x17a   : > { %2281 = vmatprep.mubr.bf16.mxu1 %v403_v19  ;;  %v663_v18 = vshrl.u32 %v662_v17, 7 }
 0x17b   : > { %2088 = vmatpush1.bf16.msra.mxu0 %v10327_v20 }
 0x17c   : > { %2252 = vmatpush1.bf16.msra.mxu1 %v10330_v21  ;;  %2089 = vmatprep.subr.bf16.mxu0 %v10335_v22  ;;  %v664_v19 = vsub.s32 0, %v663_v18  ;;  %v672_v20 = vsub.s32 2, %v663_v18  ;;  %v660_v21 = vld [vmem:[#allocation7] sm:$0xf]  ;;  %v668_v22 = vsub.s32 1, %v663_v18 }
 0x17d   : > { %2253 = vmatprep.subr.bf16.mxu1 %v10338_v23  ;;  %v676_v23 = vsub.s32 3, %v663_v18 }
 0x17f   : > { %2090 = vmatpush1.bf16.msra.mxu0 %v10333_v24  ;;  %v665_v24 = vrot.slane %v660_v21, %v664_v19 }
 0x180   : > { %2254 = vmatpush1.bf16.msra.mxu1 %v10336_v25  ;;  %2091 = vmatprep.subr.bf16.mxu0 %v10341_v26  ;;  %v673_v25 = vrot.slane %v660_v21, %v672_v20  ;;  %v669_v26 = vrot.slane %v660_v21, %v668_v22 }
 0x181   : > { %2255 = vmatprep.subr.bf16.mxu1 %v10344_v27  ;;  %v677_v27 = vrot.slane %v660_v21, %v676_v23 }
 0x183   : > { %2092 = vmatpush1.bf16.msra.mxu0 %v10339_v28 }
 0x184   : > { %2256 = vmatpush1.bf16.msra.mxu1 %v10342_v29  ;;  %2093 = vmatprep.subr.bf16.mxu0 %v10347_v30 }
 0x185   : > { %2257 = vmatprep.subr.bf16.mxu1 %v10350_v31 }
 0x187   : > { %2094 = vmatpush1.bf16.msra.mxu0 %v10345_v32 }
 0x188   : > { %2258 = vmatpush1.bf16.msra.mxu1 %v10348_v33  ;;  %2095 = vmatprep.subr.bf16.mxu0 %v10353_v34 }
 0x189   : > { %2259 = vmatprep.subr.bf16.mxu1 %v10356_v35 }
 0x18b   : > { %2096 = vmatpush1.bf16.msra.mxu0 %v10351_v36 }
 0x18c   : > { %2260 = vmatpush1.bf16.msra.mxu1 %v10354_v37  ;;  %2097 = vmatprep.subr.bf16.mxu0 %v10359_v38 }
 0x18d   : > { %2261 = vmatprep.subr.bf16.mxu1 %v10362_v39 }
 0x18f   : > { %2098 = vmatpush1.bf16.msra.mxu0 %v10357_v40 }
 0x190   : > { %2262 = vmatpush1.bf16.msra.mxu1 %v10360_v41  ;;  %2099 = vmatprep.subr.bf16.mxu0 %v10365_v42 }
 0x191   : > { %2263 = vmatprep.subr.bf16.mxu1 %v10368_v43 }
 0x193   : > { %2100 = vmatpush1.bf16.msra.mxu0 %v10363_v44 }
 0x194   : > { %2264 = vmatpush1.bf16.msra.mxu1 %v10366_v45  ;;  %2101 = vmatprep.subr.bf16.mxu0 %v10371_v46 }
 0x195   : > { %2265 = vmatprep.subr.bf16.mxu1 %v10374_v47 }
 0x197   : > { %2102 = vmatpush1.bf16.msra.mxu0 %v10369_v48 }
 0x198   : > { %2266 = vmatpush1.bf16.msra.mxu1 %v10372_v49  ;;  %2103 = vmatprep.subr.bf16.mxu0 %v10377_v50 }
 0x199   : > { %2267 = vmatprep.subr.bf16.mxu1 %v10380_v51 }
 0x19b   : > { %2104 = vmatpush1.bf16.msra.mxu0 %v10375_v52 }
 0x19c   : > { %2268 = vmatpush1.bf16.msra.mxu1 %v10378_v53  ;;  %2105 = vmatprep.subr.bf16.mxu0 %v10383_v54 }
 0x19d   : > { %2269 = vmatprep.subr.bf16.mxu1 %v10386_v55 }
 0x19f   : > { %2106 = vmatpush1.bf16.msra.mxu0 %v10381_v56 }
 0x1a0   : > { %2270 = vmatpush1.bf16.msra.mxu1 %v10384_v57  ;;  %2107 = vmatprep.subr.bf16.mxu0 %v10389_v58 }
 0x1a1   : > { %2271 = vmatprep.subr.bf16.mxu1 %v10392_v59 }
 0x1a3   : > { %2108 = vmatpush1.bf16.msra.mxu0 %v10387_v60 }
 0x1a4   : > { %2272 = vmatpush1.bf16.msra.mxu1 %v10390_v61  ;;  %2109 = vmatprep.subr.bf16.mxu0 %v10395_v62 }
 0x1a5   : > { %2273 = vmatprep.subr.bf16.mxu1 %v10398_v63 }
 0x1a7   : > { %2110 = vmatpush1.bf16.msra.mxu0 %v10393_v0 }
 0x1a8   : > { %2274 = vmatpush1.bf16.msra.mxu1 %v10396_v1  ;;  %2111 = vmatprep.subr.bf16.mxu0 %v10401_v2 }
 0x1a9   : > { %2275 = vmatprep.subr.bf16.mxu1 %v10404_v3 }
 0x1ab   : > { %2112 = vmatpush1.bf16.msra.mxu0 %v10399_v4 }
 0x1ac   : > { %2276 = vmatpush1.bf16.msra.mxu1 %v10402_v5  ;;  %2113 = vmatprep.subr.bf16.mxu0 %v10407_v6 }
 0x1ad   : > { %2277 = vmatprep.subr.bf16.mxu1 %v10410_v7 }
 0x1af   : > { %2114 = vmatpush1.bf16.msra.mxu0 %v10405_v8 }
 0x1b0   : > { %2278 = vmatpush1.bf16.msra.mxu1 %v10408_v9  ;;  %2115 = vmatprep.subr.bf16.mxu0 %v10413_v10 }
 0x1b1   : > { %2279 = vmatprep.subr.bf16.mxu1 %v10416_v11 }
 0x1b3   : > { %2116 = vmatpush1.bf16.msra.mxu0 %v10411_v12 }
 0x1b4   : > { %2280 = vmatpush1.bf16.msra.mxu1 %v10414_v13 }
 0x1b6   : > { %2118 = vmatmul.mubr.bf16.vlgmr.msra.gmra.mrb[0].mxu0 %v402_v15 }
 0x1b7   : > { %2282 = vmatmul.mubr.bf16.vlgmr.msra.gmra.mrb[0].mxu1 %v402_v15 }
 0x289   : > { %v2119_v28 = vpop.f32.mrb[0].mxu0 }
 0x28a   : > { %v2283_v29 = vpop.f32.mrb[0].mxu1  ;;  %v9882_v30 = vadd.f32 %v2119_v28, %v665_v24  ;;  %v2121_v32 = vpop.f32.mrb[1].mxu0 }
 0x28b   : > { %v9884_v31 = vadd.f32 %v2283_v29, %v673_v25  ;;  %v2285_v33 = vpop.f32.mrb[1].mxu1  ;;  %v9883_v34 = vadd.f32 %v2121_v32, %v669_v26  ;;  %v2123_v36 = vpop.f32.mrb[2].mxu0 }
 0x28c   : > { %v9885_v35 = vadd.f32 %v2285_v33, %v677_v27  ;;  %v2287_v37 = vpop.f32.mrb[2].mxu1  ;;  %v2124_v38 = vpop.f32.mrb[3].mxu0 }
 0x28d   : > { %v2288_v39 = vpop.f32.mrb[3].mxu1  ;;  %v9880_v40 = vpack.c.bf16 %v9883_v34, %v9882_v30 }
 0x28e   : > { %v9881_v41 = vpack.c.bf16 %v9885_v35, %v9884_v31 }
 0x28f   : > { %2306 = vst [vmem:[#allocation2] sm:$0xff] %v9880_v40 }
 0x290   : > { %2307 = vst [vmem:[#allocation2 + $0x8] sm:$0xff] %v9881_v41 }
 0x291 PF: > { %v2312_v42 = vld [vmem:[%s11330_s1] sm:$0xff]  ;;  %v2313_v44 = vld [vmem:[%s11330_s1 + $0x8] sm:$0xff]  ;;  %p9872_p9 = scmp.ne.s32.totalorder %s11134_s28, 1 }
 0x292   : > { %v2320_v43 = vld [vmem:[%s11330_s1 + $0x40] sm:$0xff]  ;;  %v2321_v46 = vld [vmem:[%s11330_s1 + $0x48] sm:$0xff] }
 0x293   : > { %v9102_v45 = vcombine.high %v2312_v42, %v2320_v43  ;;  %v9101_v47 = vcombine.low %v2312_v42, %v2320_v43  ;;  %v2328_v48 = vld [vmem:[%s11330_s1 + $0x80] sm:$0xff]  ;;  %v9104_v50 = vcombine.high %v2313_v44, %v2321_v46  ;;  %v9103_v51 = vcombine.low %v2313_v44, %v2321_v46  ;;  %v2329_v53 = vld [vmem:[%s11330_s1 + $0x88] sm:$0xff] }
 0x294   : > { %v2336_v49 = vld [vmem:[%s11330_s1 + $0xc0] sm:$0xff]  ;;  %v2337_v54 = vld [vmem:[%s11330_s1 + $0xc8] sm:$0xff] }
 0x295   : > { %v9118_v52 = vcombine.high %v2328_v48, %v2336_v49  ;;  %v2344_v55 = vld [vmem:[%s11330_s1 + $0x100] sm:$0xff]  ;;  %5398 = vmatprep.subr.bf16.mxu0 %v9102_v45  ;;  %v9120_v56 = vcombine.high %v2329_v53, %v2337_v54  ;;  %v2345_v58 = vld [vmem:[%s11330_s1 + $0x108] sm:$0xff]  ;;  %5480 = vmatprep.subr.bf16.mxu1 %v9104_v50  ;;  %v9117_v60 = vcombine.low %v2328_v48, %v2336_v49 }
 0x296   : > { %v2352_v57 = vld [vmem:[%s11330_s1 + $0x140] sm:$0xff]  ;;  %v2353_v59 = vld [vmem:[%s11330_s1 + $0x148] sm:$0xff]  ;;  %5399 = vmatpush1.bf16.msra.mxu0 %v9101_v47  ;;  %5481 = vmatpush1.bf16.msra.mxu1 %v9103_v51  ;;  %v9119_v61 = vcombine.low %v2329_v53, %v2337_v54 }
 0x297   : > { %5400 = vmatprep.subr.bf16.mxu0 %v9118_v52  ;;  %v9134_v62 = vcombine.high %v2344_v55, %v2352_v57  ;;  %5482 = vmatprep.subr.bf16.mxu1 %v9120_v56  ;;  %v9136_v63 = vcombine.high %v2345_v58, %v2353_v59  ;;  %v2360_v0 = vld [vmem:[%s11330_s1 + $0x180] sm:$0xff]  ;;  %v2361_v2 = vld [vmem:[%s11330_s1 + $0x188] sm:$0xff]  ;;  %v9133_v4 = vcombine.low %v2344_v55, %v2352_v57 }
 0x298   : > { %v2368_v1 = vld [vmem:[%s11330_s1 + $0x1c0] sm:$0xff]  ;;  %v2369_v3 = vld [vmem:[%s11330_s1 + $0x1c8] sm:$0xff]  ;;  %v9135_v5 = vcombine.low %v2345_v58, %v2353_v59 }
 0x299   : > { %v9150_v6 = vcombine.high %v2360_v0, %v2368_v1  ;;  %v9152_v7 = vcombine.high %v2361_v2, %v2369_v3  ;;  %v2376_v8 = vld [vmem:[%s11330_s1 + $0x200] sm:$0xff]  ;;  %v2377_v10 = vld [vmem:[%s11330_s1 + $0x208] sm:$0xff]  ;;  %v9149_v12 = vcombine.low %v2360_v0, %v2368_v1  ;;  %v9151_v13 = vcombine.low %v2361_v2, %v2369_v3 }
 0x29a   : > { %5401 = vmatpush1.bf16.msra.mxu0 %v9117_v60  ;;  %5483 = vmatpush1.bf16.msra.mxu1 %v9119_v61  ;;  %v2384_v9 = vld [vmem:[%s11330_s1 + $0x240] sm:$0xff]  ;;  %v2385_v11 = vld [vmem:[%s11330_s1 + $0x248] sm:$0xff] }
 0x29b   : > { %5402 = vmatprep.subr.bf16.mxu0 %v9134_v62  ;;  %5484 = vmatprep.subr.bf16.mxu1 %v9136_v63  ;;  %v9166_v14 = vcombine.high %v2376_v8, %v2384_v9  ;;  %v9168_v15 = vcombine.high %v2377_v10, %v2385_v11  ;;  %v2392_v16 = vld [vmem:[%s11330_s1 + $0x280] sm:$0xff]  ;;  %v2393_v18 = vld [vmem:[%s11330_s1 + $0x288] sm:$0xff]  ;;  %v9165_v20 = vcombine.low %v2376_v8, %v2384_v9 }
 0x29c   : > { %v2400_v17 = vld [vmem:[%s11330_s1 + $0x2c0] sm:$0xff]  ;;  %v2401_v19 = vld [vmem:[%s11330_s1 + $0x2c8] sm:$0xff]  ;;  %v9167_v21 = vcombine.low %v2377_v10, %v2385_v11 }
 0x29d   : > { %v9182_v22 = vcombine.high %v2392_v16, %v2400_v17  ;;  %v9184_v23 = vcombine.high %v2393_v18, %v2401_v19  ;;  %v2408_v24 = vld [vmem:[%s11330_s1 + $0x300] sm:$0xff]  ;;  %v2409_v26 = vld [vmem:[%s11330_s1 + $0x308] sm:$0xff]  ;;  %v9181_v28 = vcombine.low %v2392_v16, %v2400_v17  ;;  %v9183_v29 = vcombine.low %v2393_v18, %v2401_v19 }
 0x29e   : > { %5403 = vmatpush1.bf16.msra.mxu0 %v9133_v4  ;;  %5485 = vmatpush1.bf16.msra.mxu1 %v9135_v5  ;;  %v2416_v25 = vld [vmem:[%s11330_s1 + $0x340] sm:$0xff]  ;;  %v2417_v27 = vld [vmem:[%s11330_s1 + $0x348] sm:$0xff] }
 0x29f   : > { %5404 = vmatprep.subr.bf16.mxu0 %v9150_v6  ;;  %5486 = vmatprep.subr.bf16.mxu1 %v9152_v7  ;;  %v9198_v30 = vcombine.high %v2408_v24, %v2416_v25  ;;  %v11402_v31 = vld [vmem:[#allocation2] sm:$0xff]  ;;  %v9200_v32 = vcombine.high %v2409_v26, %v2417_v27  ;;  %v2425_v36 = vld [vmem:[%s11330_s1 + $0x388] sm:$0xff]  ;;  %v9197_v38 = vcombine.low %v2408_v24, %v2416_v25 }
 0x2a0   : > { %v2424_v33 = vld [vmem:[%s11330_s1 + $0x380] sm:$0xff]  ;;  %v11408_v35 = vcombine.high %v11402_v31, %v11402_v31  ;;  %v2433_v37 = vld [vmem:[%s11330_s1 + $0x3c8] sm:$0xff]  ;;  %v9199_v39 = vcombine.low %v2409_v26, %v2417_v27 }
 0x2a1   : > { %v2432_v34 = vld [vmem:[%s11330_s1 + $0x3c0] sm:$0xff]  ;;  %v9216_v41 = vcombine.high %v2425_v36, %v2433_v37  ;;  %v2441_v44 = vld [vmem:[%s11330_s1 + $0x408] sm:$0xff]  ;;  %v9215_v47 = vcombine.low %v2425_v36, %v2433_v37 }
 0x2a2   : > { %5405 = vmatpush1.bf16.msra.mxu0 %v9149_v12  ;;  %5487 = vmatpush1.bf16.msra.mxu1 %v9151_v13  ;;  %v9214_v40 = vcombine.high %v2424_v33, %v2432_v34  ;;  %v2440_v42 = vld [vmem:[%s11330_s1 + $0x400] sm:$0xff]  ;;  %v2449_v45 = vld [vmem:[%s11330_s1 + $0x448] sm:$0xff]  ;;  %v9213_v46 = vcombine.low %v2424_v33, %v2432_v34 }
 0x2a3   : > { %5406 = vmatprep.subr.bf16.mxu0 %v9166_v14  ;;  %5488 = vmatprep.subr.bf16.mxu1 %v9168_v15  ;;  %v2448_v43 = vld [vmem:[%s11330_s1 + $0x440] sm:$0xff]  ;;  %v9232_v49 = vcombine.high %v2441_v44, %v2449_v45  ;;  %v2457_v52 = vld [vmem:[%s11330_s1 + $0x488] sm:$0xff]  ;;  %v9231_v55 = vcombine.low %v2441_v44, %v2449_v45 }
 0x2a4   : > { %5430 = vmatprep.mubr.bf16.mxu0 %v11408_v35  ;;  %5512 = vmatprep.mubr.bf16.mxu1 %v11408_v35  ;;  %v9230_v48 = vcombine.high %v2440_v42, %v2448_v43  ;;  %v2456_v50 = vld [vmem:[%s11330_s1 + $0x480] sm:$0xff]  ;;  %v2465_v53 = vld [vmem:[%s11330_s1 + $0x4c8] sm:$0xff]  ;;  %v9229_v54 = vcombine.low %v2440_v42, %v2448_v43 }
 0x2a5   : > { %v2464_v51 = vld [vmem:[%s11330_s1 + $0x4c0] sm:$0xff]  ;;  %v9248_v57 = vcombine.high %v2457_v52, %v2465_v53  ;;  %v2473_v60 = vld [vmem:[%s11330_s1 + $0x508] sm:$0xff]  ;;  %v9247_v63 = vcombine.low %v2457_v52, %v2465_v53 }
 0x2a6   : > { %5407 = vmatpush1.bf16.msra.mxu0 %v9165_v20  ;;  %5489 = vmatpush1.bf16.msra.mxu1 %v9167_v21  ;;  %v9246_v56 = vcombine.high %v2456_v50, %v2464_v51  ;;  %v2472_v58 = vld [vmem:[%s11330_s1 + $0x500] sm:$0xff]  ;;  %v2481_v61 = vld [vmem:[%s11330_s1 + $0x548] sm:$0xff]  ;;  %v9245_v62 = vcombine.low %v2456_v50, %v2464_v51 }
 0x2a7   : > { %5408 = vmatprep.subr.bf16.mxu0 %v9182_v22  ;;  %5490 = vmatprep.subr.bf16.mxu1 %v9184_v23  ;;  %v2480_v59 = vld [vmem:[%s11330_s1 + $0x540] sm:$0xff]  ;;  %v9264_v1 = vcombine.high %v2473_v60, %v2481_v61  ;;  %v2489_v4 = vld [vmem:[%s11330_s1 + $0x588] sm:$0xff]  ;;  %v9263_v7 = vcombine.low %v2473_v60, %v2481_v61 }
 0x2a8   : > { %v9262_v0 = vcombine.high %v2472_v58, %v2480_v59  ;;  %v2488_v2 = vld [vmem:[%s11330_s1 + $0x580] sm:$0xff]  ;;  %v2497_v5 = vld [vmem:[%s11330_s1 + $0x5c8] sm:$0xff]  ;;  %v9261_v6 = vcombine.low %v2472_v58, %v2480_v59 }
 0x2a9   : > { %v2496_v3 = vld [vmem:[%s11330_s1 + $0x5c0] sm:$0xff]  ;;  %v9280_v9 = vcombine.high %v2489_v4, %v2497_v5  ;;  %v2505_v12 = vld [vmem:[%s11330_s1 + $0x608] sm:$0xff]  ;;  %v9279_v15 = vcombine.low %v2489_v4, %v2497_v5 }
 0x2aa   : > { %5409 = vmatpush1.bf16.msra.mxu0 %v9181_v28  ;;  %5491 = vmatpush1.bf16.msra.mxu1 %v9183_v29  ;;  %v9278_v8 = vcombine.high %v2488_v2, %v2496_v3  ;;  %v2504_v10 = vld [vmem:[%s11330_s1 + $0x600] sm:$0xff]  ;;  %v2513_v13 = vld [vmem:[%s11330_s1 + $0x648] sm:$0xff]  ;;  %v9277_v14 = vcombine.low %v2488_v2, %v2496_v3 }
 0x2ab   : > { %5410 = vmatprep.subr.bf16.mxu0 %v9198_v30  ;;  %5492 = vmatprep.subr.bf16.mxu1 %v9200_v32  ;;  %v2512_v11 = vld [vmem:[%s11330_s1 + $0x640] sm:$0xff]  ;;  %v9296_v17 = vcombine.high %v2505_v12, %v2513_v13  ;;  %v2521_v20 = vld [vmem:[%s11330_s1 + $0x688] sm:$0xff]  ;;  %v9295_v23 = vcombine.low %v2505_v12, %v2513_v13 }
 0x2ac   : > { %v9294_v16 = vcombine.high %v2504_v10, %v2512_v11  ;;  %v2520_v18 = vld [vmem:[%s11330_s1 + $0x680] sm:$0xff]  ;;  %v2529_v21 = vld [vmem:[%s11330_s1 + $0x6c8] sm:$0xff]  ;;  %v9293_v22 = vcombine.low %v2504_v10, %v2512_v11 }
 0x2ad   : > { %v2528_v19 = vld [vmem:[%s11330_s1 + $0x6c0] sm:$0xff]  ;;  %v9312_v25 = vcombine.high %v2521_v20, %v2529_v21  ;;  %v2537_v28 = vld [vmem:[%s11330_s1 + $0x708] sm:$0xff]  ;;  %v9311_v32 = vcombine.low %v2521_v20, %v2529_v21 }
 0x2ae   : > { %5411 = vmatpush1.bf16.msra.mxu0 %v9197_v38  ;;  %5493 = vmatpush1.bf16.msra.mxu1 %v9199_v39  ;;  %v9310_v24 = vcombine.high %v2520_v18, %v2528_v19  ;;  %v2536_v26 = vld [vmem:[%s11330_s1 + $0x700] sm:$0xff]  ;;  %v2545_v29 = vld [vmem:[%s11330_s1 + $0x748] sm:$0xff]  ;;  %v9309_v30 = vcombine.low %v2520_v18, %v2528_v19 }
 0x2af   : > { %5412 = vmatprep.subr.bf16.mxu0 %v9214_v40  ;;  %5494 = vmatprep.subr.bf16.mxu1 %v9216_v41  ;;  %v2544_v27 = vld [vmem:[%s11330_s1 + $0x740] sm:$0xff]  ;;  %v9328_v34 = vcombine.high %v2537_v28, %v2545_v29  ;;  %v2553_v38 = vld [vmem:[%s11330_s1 + $0x788] sm:$0xff]  ;;  %v9327_v41 = vcombine.low %v2537_v28, %v2545_v29 }
 0x2b0   : > { %v9326_v33 = vcombine.high %v2536_v26, %v2544_v27  ;;  %v2552_v36 = vld [vmem:[%s11330_s1 + $0x780] sm:$0xff]  ;;  %v2561_v39 = vld [vmem:[%s11330_s1 + $0x7c8] sm:$0xff]  ;;  %v9325_v40 = vcombine.low %v2536_v26, %v2544_v27 }
 0x2b1   : > { %v2560_v37 = vld [vmem:[%s11330_s1 + $0x7c0] sm:$0xff]  ;;  %v9344_v43 = vcombine.high %v2553_v38, %v2561_v39 }
 0x2b2   : > { %5413 = vmatpush1.bf16.msra.mxu0 %v9213_v46  ;;  %5495 = vmatpush1.bf16.msra.mxu1 %v9215_v47  ;;  %v9342_v42 = vcombine.high %v2552_v36, %v2560_v37  ;;  %v2568_v44 = vld [vmem:[%s11330_s1 + $0x800] sm:$0xff]  ;;  %v2569_v46 = vld [vmem:[%s11330_s1 + $0x808] sm:$0xff] }
 0x2b3   : > { %5414 = vmatprep.subr.bf16.mxu0 %v9230_v48  ;;  %5496 = vmatprep.subr.bf16.mxu1 %v9232_v49  ;;  %v2576_v45 = vld [vmem:[%s11330_s1 + $0x840] sm:$0xff]  ;;  %v2577_v47 = vld [vmem:[%s11330_s1 + $0x848] sm:$0xff]  ;;  %v9341_v48 = vcombine.low %v2552_v36, %v2560_v37  ;;  %v9343_v49 = vcombine.low %v2553_v38, %v2561_v39 }
 0x2b4   : > { %v9358_v50 = vcombine.high %v2568_v44, %v2576_v45  ;;  %v9360_v51 = vcombine.high %v2569_v46, %v2577_v47  ;;  %v2584_v52 = vld [vmem:[%s11330_s1 + $0x880] sm:$0xff]  ;;  %v9357_v58 = vcombine.low %v2568_v44, %v2576_v45  ;;  %v9359_v59 = vcombine.low %v2569_v46, %v2577_v47 }
 0x2b5   : > { %v2592_v53 = vld [vmem:[%s11330_s1 + $0x8c0] sm:$0xff] }
 0x2b6   : > { %5415 = vmatpush1.bf16.msra.mxu0 %v9229_v54  ;;  %5497 = vmatpush1.bf16.msra.mxu1 %v9231_v55  ;;  %v11454_v54 = vcombine.low %v11402_v31, %v11402_v31  ;;  %v2585_v55 = vld [vmem:[%s11330_s1 + $0x888] sm:$0xff]  ;;  %v9374_v60 = vcombine.high %v2584_v52, %v2592_v53  ;;  %v2600_v61 = vld [vmem:[%s11330_s1 + $0x900] sm:$0xff]  ;;  %v9373_v2 = vcombine.low %v2584_v52, %v2592_v53 }
 0x2b7   : > { %5416 = vmatprep.subr.bf16.mxu0 %v9246_v56  ;;  %5498 = vmatprep.subr.bf16.mxu1 %v9248_v57  ;;  %v2593_v56 = vld [vmem:[%s11330_s1 + $0x8c8] sm:$0xff]  ;;  %v2616_v5 = vld [vmem:[%s11330_s1 + $0x980] sm:$0xff] }
 0x2b8   : > { %v11458_v57 = vld [vmem:[#allocation2 + $0x8] sm:$0xff]  ;;  %v9375_v3 = vcombine.low %v2585_v55, %v2593_v56 }
 0x2b9   : > { %v2609_v31 = vld [vmem:[%s11330_s1 + $0x948] sm:$0xff]  ;;  %v2632_v13 = vld [vmem:[%s11330_s1 + $0xa00] sm:$0xff] }
 0x2ba   : > { %5417 = vmatpush1.bf16.msra.mxu0 %v9245_v62  ;;  %5499 = vmatpush1.bf16.msra.mxu1 %v9247_v63  ;;  %v2608_v62 = vld [vmem:[%s11330_s1 + $0x940] sm:$0xff]  ;;  %v2601_v63 = vld [vmem:[%s11330_s1 + $0x908] sm:$0xff] }
 0x2bb   : > { %5418 = vmatprep.subr.bf16.mxu0 %v9262_v0  ;;  %5500 = vmatprep.subr.bf16.mxu1 %v9264_v1  ;;  %v9376_v0 = vcombine.high %v2585_v55, %v2593_v56  ;;  %v11466_v1 = vcombine.high %v11458_v57, %v11458_v57  ;;  %v9390_v4 = vcombine.high %v2600_v61, %v2608_v62  ;;  %v2648_v21 = vld [vmem:[%s11330_s1 + $0xa80] sm:$0xff] }
 0x2bc   : > { %v9389_v10 = vcombine.low %v2600_v61, %v2608_v62  ;;  %v9391_v11 = vcombine.low %v2601_v63, %v2609_v31  ;;  %v2664_v29 = vld [vmem:[%s11330_s1 + $0xb00] sm:$0xff]  ;;  %v2721_v61 = vld [vmem:[%s11330_s1 + $0xcc8] sm:$0xff] }
 0x2bd   : > { %v2680_v39 = vld [vmem:[%s11330_s1 + $0xb80] sm:$0xff] }
 0x2be   : > { %5419 = vmatpush1.bf16.msra.mxu0 %v9261_v6  ;;  %5501 = vmatpush1.bf16.msra.mxu1 %v9263_v7  ;;  %v2624_v6 = vld [vmem:[%s11330_s1 + $0x9c0] sm:$0xff]  ;;  %v2617_v7 = vld [vmem:[%s11330_s1 + $0x988] sm:$0xff] }
 0x2bf   : > { %5420 = vmatprep.subr.bf16.mxu0 %v9278_v8  ;;  %5502 = vmatprep.subr.bf16.mxu1 %v9280_v9  ;;  %v9392_v8 = vcombine.high %v2601_v63, %v2609_v31  ;;  %v2625_v9 = vld [vmem:[%s11330_s1 + $0x9c8] sm:$0xff]  ;;  %v9406_v12 = vcombine.high %v2616_v5, %v2624_v6  ;;  %v9405_v18 = vcombine.low %v2616_v5, %v2624_v6  ;;  %v2696_v47 = vld [vmem:[%s11330_s1 + $0xc00] sm:$0xff] }
 0x2c0   : > { %v9407_v19 = vcombine.low %v2617_v7, %v2625_v9  ;;  %v2712_v56 = vld [vmem:[%s11330_s1 + $0xc80] sm:$0xff]  ;;  %v2737_v5 = vld [vmem:[%s11330_s1 + $0xd48] sm:$0xff] }
 0x2c1   : > { %v2728_v31 = vld [vmem:[%s11330_s1 + $0xd00] sm:$0xff] }
 0x2c2   : > { %5421 = vmatpush1.bf16.msra.mxu0 %v9277_v14  ;;  %5503 = vmatpush1.bf16.msra.mxu1 %v9279_v15  ;;  %v2640_v14 = vld [vmem:[%s11330_s1 + $0xa40] sm:$0xff]  ;;  %v2633_v15 = vld [vmem:[%s11330_s1 + $0xa08] sm:$0xff] }
 0x2c3   : > { %5422 = vmatprep.subr.bf16.mxu0 %v9294_v16  ;;  %5504 = vmatprep.subr.bf16.mxu1 %v9296_v17  ;;  %v9408_v16 = vcombine.high %v2617_v7, %v2625_v9  ;;  %v2641_v17 = vld [vmem:[%s11330_s1 + $0xa48] sm:$0xff]  ;;  %v9422_v20 = vcombine.high %v2632_v13, %v2640_v14  ;;  %v9421_v26 = vcombine.low %v2632_v13, %v2640_v14  ;;  %v2744_v9 = vld [vmem:[%s11330_s1 + $0xd80] sm:$0xff] }
 0x2c4   : > { %v9423_v27 = vcombine.low %v2633_v15, %v2641_v17  ;;  %v2753_v13 = vld [vmem:[%s11330_s1 + $0xdc8] sm:$0xff] }
 0x2c6   : > { %5423 = vmatpush1.bf16.msra.mxu0 %v9293_v22  ;;  %5505 = vmatpush1.bf16.msra.mxu1 %v9295_v23  ;;  %v2656_v22 = vld [vmem:[%s11330_s1 + $0xac0] sm:$0xff]  ;;  %v2649_v23 = vld [vmem:[%s11330_s1 + $0xa88] sm:$0xff] }
 0x2c7   : > { %5424 = vmatprep.subr.bf16.mxu0 %v9310_v24  ;;  %5506 = vmatprep.subr.bf16.mxu1 %v9312_v25  ;;  %v9424_v24 = vcombine.high %v2633_v15, %v2641_v17  ;;  %v2657_v25 = vld [vmem:[%s11330_s1 + $0xac8] sm:$0xff]  ;;  %v9438_v28 = vcombine.high %v2648_v21, %v2656_v22  ;;  %v9437_v36 = vcombine.low %v2648_v21, %v2656_v22  ;;  %v2760_v17 = vld [vmem:[%s11330_s1 + $0xe00] sm:$0xff] }
 0x2c8   : > { %v9439_v37 = vcombine.low %v2649_v23, %v2657_v25  ;;  %v2769_v21 = vld [vmem:[%s11330_s1 + $0xe48] sm:$0xff] }
 0x2ca   : > { %5425 = vmatpush1.bf16.msra.mxu0 %v9309_v30  ;;  %5507 = vmatpush1.bf16.msra.mxu1 %v9311_v32  ;;  %v2672_v30 = vld [vmem:[%s11330_s1 + $0xb40] sm:$0xff]  ;;  %v2665_v32 = vld [vmem:[%s11330_s1 + $0xb08] sm:$0xff] }
 0x2cb   : > { %5426 = vmatprep.subr.bf16.mxu0 %v9326_v33  ;;  %5508 = vmatprep.subr.bf16.mxu1 %v9328_v34  ;;  %v9440_v33 = vcombine.high %v2649_v23, %v2657_v25  ;;  %v2673_v34 = vld [vmem:[%s11330_s1 + $0xb48] sm:$0xff]  ;;  %v9454_v38 = vcombine.high %v2664_v29, %v2672_v30  ;;  %v9453_v44 = vcombine.low %v2664_v29, %v2672_v30  ;;  %v2776_v25 = vld [vmem:[%s11330_s1 + $0xe80] sm:$0xff] }
 0x2cc   : > { %v9455_v45 = vcombine.low %v2665_v32, %v2673_v34  ;;  %v2785_v29 = vld [vmem:[%s11330_s1 + $0xec8] sm:$0xff] }
 0x2ce   : > { %5427 = vmatpush1.bf16.msra.mxu0 %v9325_v40  ;;  %5509 = vmatpush1.bf16.msra.mxu1 %v9327_v41  ;;  %v2688_v40 = vld [vmem:[%s11330_s1 + $0xbc0] sm:$0xff]  ;;  %v2681_v41 = vld [vmem:[%s11330_s1 + $0xb88] sm:$0xff] }
 0x2cf   : > { %5428 = vmatprep.subr.bf16.mxu0 %v9342_v42  ;;  %5510 = vmatprep.subr.bf16.mxu1 %v9344_v43  ;;  %v9456_v42 = vcombine.high %v2665_v32, %v2673_v34  ;;  %v2689_v43 = vld [vmem:[%s11330_s1 + $0xbc8] sm:$0xff]  ;;  %v9470_v46 = vcombine.high %v2680_v39, %v2688_v40  ;;  %v9469_v52 = vcombine.low %v2680_v39, %v2688_v40  ;;  %v2792_v34 = vld [vmem:[%s11330_s1 + $0xf00] sm:$0xff] }
 0x2d0   : > { %v9471_v53 = vcombine.low %v2681_v41, %v2689_v43  ;;  %v2801_v39 = vld [vmem:[%s11330_s1 + $0xf48] sm:$0xff] }
 0x2d2   : > { %5429 = vmatpush1.bf16.msra.mxu0 %v9341_v48  ;;  %5511 = vmatpush1.bf16.msra.mxu1 %v9343_v49  ;;  %v2704_v48 = vld [vmem:[%s11330_s1 + $0xc40] sm:$0xff]  ;;  %v2697_v49 = vld [vmem:[%s11330_s1 + $0xc08] sm:$0xff] }
 0x2d3   : > { %5439 = vmatprep.subr.bf16.mxu0 %v9358_v50  ;;  %5521 = vmatprep.subr.bf16.mxu1 %v9360_v51  ;;  %v9472_v50 = vcombine.high %v2681_v41, %v2689_v43  ;;  %v2705_v51 = vld [vmem:[%s11330_s1 + $0xc48] sm:$0xff]  ;;  %v9486_v55 = vcombine.high %v2696_v47, %v2704_v48  ;;  %v9485_v62 = vcombine.low %v2696_v47, %v2704_v48  ;;  %v2808_v43 = vld [vmem:[%s11330_s1 + $0xf80] sm:$0xff] }
 0x2d4   : > { %v9487_v63 = vcombine.low %v2697_v49, %v2705_v51  ;;  %v2817_v47 = vld [vmem:[%s11330_s1 + $0xfc8] sm:$0xff] }
 0x2d5   : > { %5431 = vmatmul.mubr.bf16.vlgmr.msra.gmra.mrb[0].mxu0 %v11454_v54  ;;  %5513 = vmatmul.mubr.bf16.vlgmr.msra.gmra.mrb[0].mxu1 %v11454_v54 }
 0x2d6   : > { %5440 = vmatpush1.bf16.msra.mxu0 %v9357_v58  ;;  %5522 = vmatpush1.bf16.msra.mxu1 %v9359_v59  ;;  %v2720_v58 = vld [vmem:[%s11330_s1 + $0xcc0] sm:$0xff]  ;;  %v2713_v59 = vld [vmem:[%s11330_s1 + $0xc88] sm:$0xff] }
 0x2d7   : > { %5441 = vmatprep.subr.bf16.mxu0 %v9374_v60  ;;  %5523 = vmatprep.subr.bf16.mxu1 %v9376_v0  ;;  %v9488_v60 = vcombine.high %v2697_v49, %v2705_v51  ;;  %v9502_v0 = vcombine.high %v2712_v56, %v2720_v58  ;;  %v9501_v6 = vcombine.low %v2712_v56, %v2720_v58  ;;  %v2314_v51 = vld [vmem:[%s11330_s1 + $0x10] sm:$0xff]  ;;  %v2323_v56 = vld [vmem:[%s11330_s1 + $0x58] sm:$0xff] }
 0x2d8   : > { %5471 = vmatprep.mubr.bf16.mxu0 %v11466_v1  ;;  %5553 = vmatprep.mubr.bf16.mxu1 %v11466_v1  ;;  %v9503_v7 = vcombine.low %v2713_v59, %v2721_v61 }
 0x2da   : > { %5442 = vmatpush1.bf16.msra.mxu0 %v9373_v2  ;;  %5524 = vmatpush1.bf16.msra.mxu1 %v9375_v3  ;;  %v2736_v2 = vld [vmem:[%s11330_s1 + $0xd40] sm:$0xff]  ;;  %v2729_v3 = vld [vmem:[%s11330_s1 + $0xd08] sm:$0xff] }
 0x2db   : > { %5443 = vmatprep.subr.bf16.mxu0 %v9390_v4  ;;  %5525 = vmatprep.subr.bf16.mxu1 %v9392_v8  ;;  %v9504_v4 = vcombine.high %v2713_v59, %v2721_v61  ;;  %v9518_v8 = vcombine.high %v2728_v31, %v2736_v2  ;;  %v9517_v14 = vcombine.low %v2728_v31, %v2736_v2  ;;  %v2330_v61 = vld [vmem:[%s11330_s1 + $0x90] sm:$0xff]  ;;  %v2339_v31 = vld [vmem:[%s11330_s1 + $0xd8] sm:$0xff] }
 0x2dc   : > { %v9519_v15 = vcombine.low %v2729_v3, %v2737_v5  ;;  %v11534_v2 = vcombine.low %v11458_v57, %v11458_v57 }
 0x2de   : > { %5444 = vmatpush1.bf16.msra.mxu0 %v9389_v10  ;;  %5526 = vmatpush1.bf16.msra.mxu1 %v9391_v11  ;;  %v2752_v10 = vld [vmem:[%s11330_s1 + $0xdc0] sm:$0xff]  ;;  %v2745_v11 = vld [vmem:[%s11330_s1 + $0xd88] sm:$0xff] }
 0x2df   : > { %5445 = vmatprep.subr.bf16.mxu0 %v9406_v12  ;;  %5527 = vmatprep.subr.bf16.mxu1 %v9408_v16  ;;  %v9520_v12 = vcombine.high %v2729_v3, %v2737_v5  ;;  %v9534_v16 = vcombine.high %v2744_v9, %v2752_v10  ;;  %v9533_v22 = vcombine.low %v2744_v9, %v2752_v10  ;;  %v2355_v10 = vld [vmem:[%s11330_s1 + $0x158] sm:$0xff] }
 0x2e0   : > { %v9535_v23 = vcombine.low %v2745_v11, %v2753_v13 }
 0x2e2   : > { %5446 = vmatpush1.bf16.msra.mxu0 %v9405_v18  ;;  %5528 = vmatpush1.bf16.msra.mxu1 %v9407_v19  ;;  %v2768_v18 = vld [vmem:[%s11330_s1 + $0xe40] sm:$0xff]  ;;  %v2761_v19 = vld [vmem:[%s11330_s1 + $0xe08] sm:$0xff] }
 0x2e3   : > { %5447 = vmatprep.subr.bf16.mxu0 %v9422_v20  ;;  %5529 = vmatprep.subr.bf16.mxu1 %v9424_v24  ;;  %v9536_v20 = vcombine.high %v2745_v11, %v2753_v13  ;;  %v9550_v24 = vcombine.high %v2760_v17, %v2768_v18  ;;  %v9549_v30 = vcombine.low %v2760_v17, %v2768_v18  ;;  %v2362_v13 = vld [vmem:[%s11330_s1 + $0x190] sm:$0xff]  ;;  %v2371_v17 = vld [vmem:[%s11330_s1 + $0x1d8] sm:$0xff] }
 0x2e4   : > { %v9551_v32 = vcombine.low %v2761_v19, %v2769_v21 }
 0x2e6   : > { %5448 = vmatpush1.bf16.msra.mxu0 %v9421_v26  ;;  %5530 = vmatpush1.bf16.msra.mxu1 %v9423_v27  ;;  %v2784_v26 = vld [vmem:[%s11330_s1 + $0xec0] sm:$0xff]  ;;  %v2777_v27 = vld [vmem:[%s11330_s1 + $0xe88] sm:$0xff] }
 0x2e7   : > { %5449 = vmatprep.subr.bf16.mxu0 %v9438_v28  ;;  %5531 = vmatprep.subr.bf16.mxu1 %v9440_v33  ;;  %v9552_v28 = vcombine.high %v2761_v19, %v2769_v21  ;;  %v9566_v33 = vcombine.high %v2776_v25, %v2784_v26  ;;  %v9565_v40 = vcombine.low %v2776_v25, %v2784_v26  ;;  %v2378_v21 = vld [vmem:[%s11330_s1 + $0x210] sm:$0xff]  ;;  %v2387_v25 = vld [vmem:[%s11330_s1 + $0x258] sm:$0xff] }
 0x2e8   : > { %v9567_v41 = vcombine.low %v2777_v27, %v2785_v29 }
 0x2ea   : > { %5450 = vmatpush1.bf16.msra.mxu0 %v9437_v36  ;;  %5532 = vmatpush1.bf16.msra.mxu1 %v9439_v37  ;;  %v2800_v36 = vld [vmem:[%s11330_s1 + $0xf40] sm:$0xff]  ;;  %v2793_v37 = vld [vmem:[%s11330_s1 + $0xf08] sm:$0xff] }
 0x2eb   : > { %5451 = vmatprep.subr.bf16.mxu0 %v9454_v38  ;;  %5533 = vmatprep.subr.bf16.mxu1 %v9456_v42  ;;  %v9568_v38 = vcombine.high %v2777_v27, %v2785_v29  ;;  %v9582_v42 = vcombine.high %v2792_v34, %v2800_v36  ;;  %v9581_v48 = vcombine.low %v2792_v34, %v2800_v36  ;;  %v2394_v29 = vld [vmem:[%s11330_s1 + $0x290] sm:$0xff]  ;;  %v2403_v34 = vld [vmem:[%s11330_s1 + $0x2d8] sm:$0xff] }
 0x2ec   : > { %v9583_v49 = vcombine.low %v2793_v37, %v2801_v39 }
 0x2ee   : > { %5452 = vmatpush1.bf16.msra.mxu0 %v9453_v44  ;;  %5534 = vmatpush1.bf16.msra.mxu1 %v9455_v45  ;;  %v2816_v44 = vld [vmem:[%s11330_s1 + $0xfc0] sm:$0xff]  ;;  %v2809_v45 = vld [vmem:[%s11330_s1 + $0xf88] sm:$0xff] }
 0x2ef   : > { %5453 = vmatprep.subr.bf16.mxu0 %v9470_v46  ;;  %5535 = vmatprep.subr.bf16.mxu1 %v9472_v50  ;;  %v9584_v46 = vcombine.high %v2793_v37, %v2801_v39  ;;  %v9598_v50 = vcombine.high %v2808_v43, %v2816_v44  ;;  %v9597_v58 = vcombine.low %v2808_v43, %v2816_v44  ;;  %v2410_v39 = vld [vmem:[%s11330_s1 + $0x310] sm:$0xff]  ;;  %v2419_v43 = vld [vmem:[%s11330_s1 + $0x358] sm:$0xff] }
 0x2f0   : > { %v9599_v59 = vcombine.low %v2809_v45, %v2817_v47 }
 0x2f2   : > { %5454 = vmatpush1.bf16.msra.mxu0 %v9469_v52  ;;  %5536 = vmatpush1.bf16.msra.mxu1 %v9471_v53  ;;  %v2322_v52 = vld [vmem:[%s11330_s1 + $0x50] sm:$0xff]  ;;  %v2315_v53 = vld [vmem:[%s11330_s1 + $0x18] sm:$0xff] }
 0x2f3   : > { %5455 = vmatprep.subr.bf16.mxu0 %v9486_v55  ;;  %5537 = vmatprep.subr.bf16.mxu1 %v9488_v60  ;;  %v9600_v55 = vcombine.high %v2809_v45, %v2817_v47  ;;  %v9106_v60 = vcombine.high %v2314_v51, %v2322_v52  ;;  %v9105_v3 = vcombine.low %v2314_v51, %v2322_v52  ;;  %v2426_v47 = vld [vmem:[%s11330_s1 + $0x390] sm:$0xff]  ;;  %v2435_v51 = vld [vmem:[%s11330_s1 + $0x3d8] sm:$0xff] }
 0x2f6   : > { %5456 = vmatpush1.bf16.msra.mxu0 %v9485_v62  ;;  %5538 = vmatpush1.bf16.msra.mxu1 %v9487_v63  ;;  %v2338_v62 = vld [vmem:[%s11330_s1 + $0xd0] sm:$0xff]  ;;  %v2331_v63 = vld [vmem:[%s11330_s1 + $0x98] sm:$0xff] }
 0x2f7   : > { %5457 = vmatprep.subr.bf16.mxu0 %v9502_v0  ;;  %5539 = vmatprep.subr.bf16.mxu1 %v9504_v4  ;;  %v9108_v0 = vcombine.high %v2315_v53, %v2323_v56  ;;  %v9107_v4 = vcombine.low %v2315_v53, %v2323_v56  ;;  %v9122_v5 = vcombine.high %v2330_v61, %v2338_v62  ;;  %v2442_v56 = vld [vmem:[%s11330_s1 + $0x410] sm:$0xff] }
 0x2f8   : > { %v9124_v9 = vcombine.high %v2331_v63, %v2339_v31  ;;  %v9121_v57 = vcombine.low %v2330_v61, %v2338_v62  ;;  %v9123_v11 = vcombine.low %v2331_v63, %v2339_v31  ;;  %v2451_v61 = vld [vmem:[%s11330_s1 + $0x458] sm:$0xff]  ;;  %v2458_v31 = vld [vmem:[%s11330_s1 + $0x490] sm:$0xff] }
 0x2fa   : > { %5458 = vmatpush1.bf16.msra.mxu0 %v9501_v6  ;;  %5540 = vmatpush1.bf16.msra.mxu1 %v9503_v7  ;;  %v2346_v6 = vld [vmem:[%s11330_s1 + $0x110] sm:$0xff] }
 0x2fb   : > { %5459 = vmatprep.subr.bf16.mxu0 %v9518_v8  ;;  %5541 = vmatprep.subr.bf16.mxu1 %v9520_v12  ;;  %v2354_v7 = vld [vmem:[%s11330_s1 + $0x150] sm:$0xff]  ;;  %v2347_v8 = vld [vmem:[%s11330_s1 + $0x118] sm:$0xff] }
 0x2fc   : > { %v9138_v12 = vcombine.high %v2346_v6, %v2354_v7  ;;  %v9137_v18 = vcombine.low %v2346_v6, %v2354_v7  ;;  %v9139_v19 = vcombine.low %v2347_v8, %v2355_v10  ;;  %v2467_v6 = vld [vmem:[%s11330_s1 + $0x4d8] sm:$0xff] }
 0x2fe   : > { %5460 = vmatpush1.bf16.msra.mxu0 %v9517_v14  ;;  %5542 = vmatpush1.bf16.msra.mxu1 %v9519_v15  ;;  %v2370_v14 = vld [vmem:[%s11330_s1 + $0x1d0] sm:$0xff]  ;;  %v2363_v15 = vld [vmem:[%s11330_s1 + $0x198] sm:$0xff] }
 0x2ff   : > { %5461 = vmatprep.subr.bf16.mxu0 %v9534_v16  ;;  %5543 = vmatprep.subr.bf16.mxu1 %v9536_v20  ;;  %v9140_v16 = vcombine.high %v2347_v8, %v2355_v10  ;;  %v9154_v20 = vcombine.high %v2362_v13, %v2370_v14  ;;  %v9153_v26 = vcombine.low %v2362_v13, %v2370_v14  ;;  %v2474_v10 = vld [vmem:[%s11330_s1 + $0x510] sm:$0xff]  ;;  %v2483_v13 = vld [vmem:[%s11330_s1 + $0x558] sm:$0xff] }
 0x300   : > { %v9155_v27 = vcombine.low %v2363_v15, %v2371_v17 }
 0x302   : > { %5462 = vmatpush1.bf16.msra.mxu0 %v9533_v22  ;;  %5544 = vmatpush1.bf16.msra.mxu1 %v9535_v23  ;;  %v2386_v22 = vld [vmem:[%s11330_s1 + $0x250] sm:$0xff]  ;;  %v2379_v23 = vld [vmem:[%s11330_s1 + $0x218] sm:$0xff] }
 0x303   : > { %5463 = vmatprep.subr.bf16.mxu0 %v9550_v24  ;;  %5545 = vmatprep.subr.bf16.mxu1 %v9552_v28  ;;  %v9156_v24 = vcombine.high %v2363_v15, %v2371_v17  ;;  %v9170_v28 = vcombine.high %v2378_v21, %v2386_v22  ;;  %v9169_v36 = vcombine.low %v2378_v21, %v2386_v22  ;;  %v2490_v17 = vld [vmem:[%s11330_s1 + $0x590] sm:$0xff]  ;;  %v2499_v21 = vld [vmem:[%s11330_s1 + $0x5d8] sm:$0xff] }
 0x304   : > { %v9171_v37 = vcombine.low %v2379_v23, %v2387_v25 }
 0x306   : > { %5464 = vmatpush1.bf16.msra.mxu0 %v9549_v30  ;;  %5546 = vmatpush1.bf16.msra.mxu1 %v9551_v32  ;;  %v2402_v30 = vld [vmem:[%s11330_s1 + $0x2d0] sm:$0xff]  ;;  %v2395_v32 = vld [vmem:[%s11330_s1 + $0x298] sm:$0xff] }
 0x307   : > { %5465 = vmatprep.subr.bf16.mxu0 %v9566_v33  ;;  %5547 = vmatprep.subr.bf16.mxu1 %v9568_v38  ;;  %v9172_v33 = vcombine.high %v2379_v23, %v2387_v25  ;;  %v9186_v38 = vcombine.high %v2394_v29, %v2402_v30  ;;  %v9185_v44 = vcombine.low %v2394_v29, %v2402_v30  ;;  %v2506_v25 = vld [vmem:[%s11330_s1 + $0x610] sm:$0xff]  ;;  %v2515_v29 = vld [vmem:[%s11330_s1 + $0x658] sm:$0xff] }
 0x308   : > { %v9187_v45 = vcombine.low %v2395_v32, %v2403_v34 }
 0x30a   : > { %5466 = vmatpush1.bf16.msra.mxu0 %v9565_v40  ;;  %5548 = vmatpush1.bf16.msra.mxu1 %v9567_v41  ;;  %v2418_v40 = vld [vmem:[%s11330_s1 + $0x350] sm:$0xff]  ;;  %v2411_v41 = vld [vmem:[%s11330_s1 + $0x318] sm:$0xff] }
 0x30b   : > { %5467 = vmatprep.subr.bf16.mxu0 %v9582_v42  ;;  %5549 = vmatprep.subr.bf16.mxu1 %v9584_v46  ;;  %v9188_v42 = vcombine.high %v2395_v32, %v2403_v34  ;;  %v9202_v46 = vcombine.high %v2410_v39, %v2418_v40  ;;  %v9201_v52 = vcombine.low %v2410_v39, %v2418_v40  ;;  %v2522_v34 = vld [vmem:[%s11330_s1 + $0x690] sm:$0xff]  ;;  %v2531_v39 = vld [vmem:[%s11330_s1 + $0x6d8] sm:$0xff] }
 0x30c   : > { %v9203_v53 = vcombine.low %v2411_v41, %v2419_v43 }
 0x30e   : > { %5468 = vmatpush1.bf16.msra.mxu0 %v9581_v48  ;;  %5550 = vmatpush1.bf16.msra.mxu1 %v9583_v49  ;;  %v2434_v48 = vld [vmem:[%s11330_s1 + $0x3d0] sm:$0xff]  ;;  %v2427_v49 = vld [vmem:[%s11330_s1 + $0x398] sm:$0xff] }
 0x30f   : > { %5469 = vmatprep.subr.bf16.mxu0 %v9598_v50  ;;  %5551 = vmatprep.subr.bf16.mxu1 %v9600_v55  ;;  %v9204_v50 = vcombine.high %v2411_v41, %v2419_v43  ;;  %v9218_v55 = vcombine.high %v2426_v47, %v2434_v48  ;;  %v9217_v62 = vcombine.low %v2426_v47, %v2434_v48  ;;  %v2538_v43 = vld [vmem:[%s11330_s1 + $0x710] sm:$0xff]  ;;  %v2547_v47 = vld [vmem:[%s11330_s1 + $0x758] sm:$0xff] }
 0x310   : > { %v9219_v63 = vcombine.low %v2427_v49, %v2435_v51 }
 0x312   : > { %5470 = vmatpush1.bf16.msra.mxu0 %v9597_v58  ;;  %5552 = vmatpush1.bf16.msra.mxu1 %v9599_v59  ;;  %v2450_v58 = vld [vmem:[%s11330_s1 + $0x450] sm:$0xff]  ;;  %v2443_v59 = vld [vmem:[%s11330_s1 + $0x418] sm:$0xff] }
 0x313   : > { %5562 = vmatprep.subr.bf16.mxu0 %v9106_v60  ;;  %5644 = vmatprep.subr.bf16.mxu1 %v9108_v0  ;;  %v9220_v60 = vcombine.high %v2427_v49, %v2435_v51  ;;  %v9234_v0 = vcombine.high %v2442_v56, %v2450_v58  ;;  %v9233_v7 = vcombine.low %v2442_v56, %v2450_v58  ;;  %v2554_v51 = vld [vmem:[%s11330_s1 + $0x790] sm:$0xff]  ;;  %v2563_v56 = vld [vmem:[%s11330_s1 + $0x7d8] sm:$0xff] }
 0x314   : > { %v9235_v8 = vcombine.low %v2443_v59, %v2451_v61 }
 0x315   : > { %5472 = vmatmul.mubr.bf16.vlgmr.msra.gmra.mrb[0].mxu0 %v11534_v2  ;;  %5554 = vmatmul.mubr.bf16.vlgmr.msra.gmra.mrb[0].mxu1 %v11534_v2 }
 0x316   : > { %5563 = vmatpush1.bf16.msra.mxu0 %v9105_v3  ;;  %5645 = vmatpush1.bf16.msra.mxu1 %v9107_v4  ;;  %v2466_v3 = vld [vmem:[%s11330_s1 + $0x4d0] sm:$0xff]  ;;  %v2459_v4 = vld [vmem:[%s11330_s1 + $0x498] sm:$0xff] }
 0x317   : > { %5564 = vmatprep.subr.bf16.mxu0 %v9122_v5  ;;  %5646 = vmatprep.subr.bf16.mxu1 %v9124_v9  ;;  %v9236_v5 = vcombine.high %v2443_v59, %v2451_v61  ;;  %v9250_v9 = vcombine.high %v2458_v31, %v2466_v3  ;;  %v9249_v14 = vcombine.low %v2458_v31, %v2466_v3  ;;  %v2570_v61 = vld [vmem:[%s11330_s1 + $0x810] sm:$0xff]  ;;  %v2579_v31 = vld [vmem:[%s11330_s1 + $0x858] sm:$0xff] }
 0x318   : > { %5594 = vmatprep.mubr.bf16.mxu0 %v11408_v35  ;;  %5676 = vmatprep.mubr.bf16.mxu1 %v11408_v35  ;;  %v9251_v15 = vcombine.low %v2459_v4, %v2467_v6 }
 0x31a   : > { %5565 = vmatpush1.bf16.msra.mxu0 %v9121_v57  ;;  %5647 = vmatpush1.bf16.msra.mxu1 %v9123_v11  ;;  %v2482_v57 = vld [vmem:[%s11330_s1 + $0x550] sm:$0xff]  ;;  %v2475_v11 = vld [vmem:[%s11330_s1 + $0x518] sm:$0xff] }
 0x31b   : > { %5566 = vmatprep.subr.bf16.mxu0 %v9138_v12  ;;  %5648 = vmatprep.subr.bf16.mxu1 %v9140_v16  ;;  %v9252_v12 = vcombine.high %v2459_v4, %v2467_v6  ;;  %v9266_v16 = vcombine.high %v2474_v10, %v2482_v57  ;;  %v9265_v22 = vcombine.low %v2474_v10, %v2482_v57  ;;  %v2586_v6 = vld [vmem:[%s11330_s1 + $0x890] sm:$0xff]  ;;  %v2595_v10 = vld [vmem:[%s11330_s1 + $0x8d8] sm:$0xff] }
 0x31c   : > { %v9267_v23 = vcombine.low %v2475_v11, %v2483_v13 }
 0x31e   : > { %5567 = vmatpush1.bf16.msra.mxu0 %v9137_v18  ;;  %5649 = vmatpush1.bf16.msra.mxu1 %v9139_v19  ;;  %v2498_v18 = vld [vmem:[%s11330_s1 + $0x5d0] sm:$0xff]  ;;  %v2491_v19 = vld [vmem:[%s11330_s1 + $0x598] sm:$0xff] }
 0x31f   : > { %5568 = vmatprep.subr.bf16.mxu0 %v9154_v20  ;;  %5650 = vmatprep.subr.bf16.mxu1 %v9156_v24  ;;  %v9268_v20 = vcombine.high %v2475_v11, %v2483_v13  ;;  %v9282_v24 = vcombine.high %v2490_v17, %v2498_v18  ;;  %v9281_v30 = vcombine.low %v2490_v17, %v2498_v18  ;;  %v2611_v17 = vld [vmem:[%s11330_s1 + $0x958] sm:$0xff] }
 0x320   : > { %v9283_v32 = vcombine.low %v2491_v19, %v2499_v21 }
 0x322   : > { %5569 = vmatpush1.bf16.msra.mxu0 %v9153_v26  ;;  %5651 = vmatpush1.bf16.msra.mxu1 %v9155_v27  ;;  %v2514_v26 = vld [vmem:[%s11330_s1 + $0x650] sm:$0xff]  ;;  %v2507_v27 = vld [vmem:[%s11330_s1 + $0x618] sm:$0xff] }
 0x323   : > { %5570 = vmatprep.subr.bf16.mxu0 %v9170_v28  ;;  %5652 = vmatprep.subr.bf16.mxu1 %v9172_v33  ;;  %v9284_v28 = vcombine.high %v2491_v19, %v2499_v21  ;;  %v9298_v33 = vcombine.high %v2506_v25, %v2514_v26  ;;  %v9297_v40 = vcombine.low %v2506_v25, %v2514_v26  ;;  %v2627_v25 = vld [vmem:[%s11330_s1 + $0x9d8] sm:$0xff] }
 0x324   : > { %v9299_v41 = vcombine.low %v2507_v27, %v2515_v29 }
 0x326   : > { %5571 = vmatpush1.bf16.msra.mxu0 %v9169_v36  ;;  %5653 = vmatpush1.bf16.msra.mxu1 %v9171_v37  ;;  %v2530_v36 = vld [vmem:[%s11330_s1 + $0x6d0] sm:$0xff]  ;;  %v2523_v37 = vld [vmem:[%s11330_s1 + $0x698] sm:$0xff] }
 0x327   : > { %5572 = vmatprep.subr.bf16.mxu0 %v9186_v38  ;;  %5654 = vmatprep.subr.bf16.mxu1 %v9188_v42  ;;  %v9300_v38 = vcombine.high %v2507_v27, %v2515_v29  ;;  %v9314_v42 = vcombine.high %v2522_v34, %v2530_v36  ;;  %v9313_v48 = vcombine.low %v2522_v34, %v2530_v36  ;;  %v2643_v34 = vld [vmem:[%s11330_s1 + $0xa58] sm:$0xff] }
 0x328   : > { %v9315_v49 = vcombine.low %v2523_v37, %v2531_v39 }
 0x32a   : > { %5573 = vmatpush1.bf16.msra.mxu0 %v9185_v44  ;;  %5655 = vmatpush1.bf16.msra.mxu1 %v9187_v45  ;;  %v2546_v44 = vld [vmem:[%s11330_s1 + $0x750] sm:$0xff]  ;;  %v2539_v45 = vld [vmem:[%s11330_s1 + $0x718] sm:$0xff] }
 0x32b   : > { %5574 = vmatprep.subr.bf16.mxu0 %v9202_v46  ;;  %5656 = vmatprep.subr.bf16.mxu1 %v9204_v50  ;;  %v9316_v46 = vcombine.high %v2523_v37, %v2531_v39  ;;  %v9330_v50 = vcombine.high %v2538_v43, %v2546_v44  ;;  %v9329_v58 = vcombine.low %v2538_v43, %v2546_v44  ;;  %v2659_v43 = vld [vmem:[%s11330_s1 + $0xad8] sm:$0xff] }
 0x32c   : > { %v9331_v59 = vcombine.low %v2539_v45, %v2547_v47 }
 0x32e   : > { %5575 = vmatpush1.bf16.msra.mxu0 %v9201_v52  ;;  %5657 = vmatpush1.bf16.msra.mxu1 %v9203_v53  ;;  %v2562_v52 = vld [vmem:[%s11330_s1 + $0x7d0] sm:$0xff]  ;;  %v2555_v53 = vld [vmem:[%s11330_s1 + $0x798] sm:$0xff] }
 0x32f   : > { %5576 = vmatprep.subr.bf16.mxu0 %v9218_v55  ;;  %5658 = vmatprep.subr.bf16.mxu1 %v9220_v60  ;;  %v9332_v55 = vcombine.high %v2539_v45, %v2547_v47  ;;  %v9346_v60 = vcombine.high %v2554_v51, %v2562_v52  ;;  %v9345_v3 = vcombine.low %v2554_v51, %v2562_v52  ;;  %v2675_v51 = vld [vmem:[%s11330_s1 + $0xb58] sm:$0xff] }
 0x330   : > { %v9347_v4 = vcombine.low %v2555_v53, %v2563_v56 }
 0x332   : > { %5577 = vmatpush1.bf16.msra.mxu0 %v9217_v62  ;;  %5659 = vmatpush1.bf16.msra.mxu1 %v9219_v63  ;;  %v2578_v62 = vld [vmem:[%s11330_s1 + $0x850] sm:$0xff]  ;;  %v2571_v63 = vld [vmem:[%s11330_s1 + $0x818] sm:$0xff] }
 0x333   : > { %5578 = vmatprep.subr.bf16.mxu0 %v9234_v0  ;;  %5660 = vmatprep.subr.bf16.mxu1 %v9236_v5  ;;  %v9348_v0 = vcombine.high %v2555_v53, %v2563_v56  ;;  %v9362_v5 = vcombine.high %v2570_v61, %v2578_v62  ;;  %v9361_v57 = vcombine.low %v2570_v61, %v2578_v62  ;;  %v2691_v61 = vld [vmem:[%s11330_s1 + $0xbd8] sm:$0xff] }
 0x334   : > { %v9363_v11 = vcombine.low %v2571_v63, %v2579_v31 }
 0x336   : > { %5579 = vmatpush1.bf16.msra.mxu0 %v9233_v7  ;;  %5661 = vmatpush1.bf16.msra.mxu1 %v9235_v8  ;;  %v2594_v7 = vld [vmem:[%s11330_s1 + $0x8d0] sm:$0xff]  ;;  %v2587_v8 = vld [vmem:[%s11330_s1 + $0x898] sm:$0xff] }
 0x337   : > { %5580 = vmatprep.subr.bf16.mxu0 %v9250_v9  ;;  %5662 = vmatprep.subr.bf16.mxu1 %v9252_v12  ;;  %v9364_v9 = vcombine.high %v2571_v63, %v2579_v31  ;;  %v9378_v12 = vcombine.high %v2586_v6, %v2594_v7  ;;  %v9380_v13 = vcombine.high %v2587_v8, %v2595_v10 }
 0x338   : > { %v9377_v18 = vcombine.low %v2586_v6, %v2594_v7  ;;  %v9379_v19 = vcombine.low %v2587_v8, %v2595_v10  ;;  %v2707_v6 = vld [vmem:[%s11330_s1 + $0xc58] sm:$0xff] }
 0x33a   : > { %5581 = vmatpush1.bf16.msra.mxu0 %v9249_v14  ;;  %5663 = vmatpush1.bf16.msra.mxu1 %v9251_v15  ;;  %v2602_v14 = vld [vmem:[%s11330_s1 + $0x910] sm:$0xff] }
 0x33b   : > { %5582 = vmatprep.subr.bf16.mxu0 %v9266_v16  ;;  %5664 = vmatprep.subr.bf16.mxu1 %v9268_v20  ;;  %v2610_v15 = vld [vmem:[%s11330_s1 + $0x950] sm:$0xff]  ;;  %v2603_v16 = vld [vmem:[%s11330_s1 + $0x918] sm:$0xff] }
 0x33c   : > { %v9394_v20 = vcombine.high %v2602_v14, %v2610_v15  ;;  %v9396_v21 = vcombine.high %v2603_v16, %v2611_v17  ;;  %v9393_v26 = vcombine.low %v2602_v14, %v2610_v15  ;;  %v9395_v27 = vcombine.low %v2603_v16, %v2611_v17 }
 0x33e   : > { %5583 = vmatpush1.bf16.msra.mxu0 %v9265_v22  ;;  %5665 = vmatpush1.bf16.msra.mxu1 %v9267_v23  ;;  %v2618_v22 = vld [vmem:[%s11330_s1 + $0x990] sm:$0xff] }
 0x33f   : > { %5584 = vmatprep.subr.bf16.mxu0 %v9282_v24  ;;  %5666 = vmatprep.subr.bf16.mxu1 %v9284_v28  ;;  %v2626_v23 = vld [vmem:[%s11330_s1 + $0x9d0] sm:$0xff]  ;;  %v2619_v24 = vld [vmem:[%s11330_s1 + $0x998] sm:$0xff] }
 0x340   : > { %v9410_v28 = vcombine.high %v2618_v22, %v2626_v23  ;;  %v9412_v29 = vcombine.high %v2619_v24, %v2627_v25  ;;  %v9409_v36 = vcombine.low %v2618_v22, %v2626_v23  ;;  %v9411_v37 = vcombine.low %v2619_v24, %v2627_v25 }
 0x342   : > { %5585 = vmatpush1.bf16.msra.mxu0 %v9281_v30  ;;  %5667 = vmatpush1.bf16.msra.mxu1 %v9283_v32  ;;  %v2634_v30 = vld [vmem:[%s11330_s1 + $0xa10] sm:$0xff] }
 0x343   : > { %5586 = vmatprep.subr.bf16.mxu0 %v9298_v33  ;;  %5668 = vmatprep.subr.bf16.mxu1 %v9300_v38  ;;  %v2642_v32 = vld [vmem:[%s11330_s1 + $0xa50] sm:$0xff]  ;;  %v2635_v33 = vld [vmem:[%s11330_s1 + $0xa18] sm:$0xff] }
 0x344   : > { %v9426_v38 = vcombine.high %v2634_v30, %v2642_v32  ;;  %v9428_v39 = vcombine.high %v2635_v33, %v2643_v34  ;;  %v9425_v44 = vcombine.low %v2634_v30, %v2642_v32  ;;  %v9427_v45 = vcombine.low %v2635_v33, %v2643_v34 }
 0x346   : > { %5587 = vmatpush1.bf16.msra.mxu0 %v9297_v40  ;;  %5669 = vmatpush1.bf16.msra.mxu1 %v9299_v41  ;;  %v2650_v40 = vld [vmem:[%s11330_s1 + $0xa90] sm:$0xff] }
 0x347   : > { %5588 = vmatprep.subr.bf16.mxu0 %v9314_v42  ;;  %5670 = vmatprep.subr.bf16.mxu1 %v9316_v46  ;;  %v2658_v41 = vld [vmem:[%s11330_s1 + $0xad0] sm:$0xff]  ;;  %v2651_v42 = vld [vmem:[%s11330_s1 + $0xa98] sm:$0xff] }
 0x348   : > { %v9442_v46 = vcombine.high %v2650_v40, %v2658_v41  ;;  %v9444_v47 = vcombine.high %v2651_v42, %v2659_v43  ;;  %v9441_v52 = vcombine.low %v2650_v40, %v2658_v41  ;;  %v9443_v53 = vcombine.low %v2651_v42, %v2659_v43 }
 0x34a   : > { %5589 = vmatpush1.bf16.msra.mxu0 %v9313_v48  ;;  %5671 = vmatpush1.bf16.msra.mxu1 %v9315_v49  ;;  %v2666_v48 = vld [vmem:[%s11330_s1 + $0xb10] sm:$0xff] }
 0x34b   : > { %5590 = vmatprep.subr.bf16.mxu0 %v9330_v50  ;;  %5672 = vmatprep.subr.bf16.mxu1 %v9332_v55  ;;  %v2674_v49 = vld [vmem:[%s11330_s1 + $0xb50] sm:$0xff]  ;;  %v2667_v50 = vld [vmem:[%s11330_s1 + $0xb18] sm:$0xff] }
 0x34c   : > { %v9458_v55 = vcombine.high %v2666_v48, %v2674_v49  ;;  %v9460_v56 = vcombine.high %v2667_v50, %v2675_v51  ;;  %v9457_v62 = vcombine.low %v2666_v48, %v2674_v49  ;;  %v9459_v63 = vcombine.low %v2667_v50, %v2675_v51 }
 0x34e   : > { %5591 = vmatpush1.bf16.msra.mxu0 %v9329_v58  ;;  %5673 = vmatpush1.bf16.msra.mxu1 %v9331_v59  ;;  %v2682_v58 = vld [vmem:[%s11330_s1 + $0xb90] sm:$0xff] }
 0x34f   : > { %5592 = vmatprep.subr.bf16.mxu0 %v9346_v60  ;;  %5674 = vmatprep.subr.bf16.mxu1 %v9348_v0  ;;  %v2690_v59 = vld [vmem:[%s11330_s1 + $0xbd0] sm:$0xff]  ;;  %v2683_v60 = vld [vmem:[%s11330_s1 + $0xb98] sm:$0xff] }
 0x350   : > { %v9474_v0 = vcombine.high %v2682_v58, %v2690_v59  ;;  %v9476_v31 = vcombine.high %v2683_v60, %v2691_v61  ;;  %v9473_v7 = vcombine.low %v2682_v58, %v2690_v59  ;;  %v9475_v8 = vcombine.low %v2683_v60, %v2691_v61 }
 0x352   : > { %5593 = vmatpush1.bf16.msra.mxu0 %v9345_v3  ;;  %5675 = vmatpush1.bf16.msra.mxu1 %v9347_v4  ;;  %v2698_v3 = vld [vmem:[%s11330_s1 + $0xc10] sm:$0xff] }
 0x353   : > { %5603 = vmatprep.subr.bf16.mxu0 %v9362_v5  ;;  %5685 = vmatprep.subr.bf16.mxu1 %v9364_v9  ;;  %v2706_v4 = vld [vmem:[%s11330_s1 + $0xc50] sm:$0xff]  ;;  %v2699_v5 = vld [vmem:[%s11330_s1 + $0xc18] sm:$0xff] }
 0x354   : > { %v9490_v9 = vcombine.high %v2698_v3, %v2706_v4  ;;  %v9492_v10 = vcombine.high %v2699_v5, %v2707_v6  ;;  %v9489_v14 = vcombine.low %v2698_v3, %v2706_v4  ;;  %v9491_v15 = vcombine.low %v2699_v5, %v2707_v6 }
 0x355   : > { %5595 = vmatmul.mubr.bf16.vlgmr.msra.gmra.mrb[4].mxu0 %v11454_v54  ;;  %5677 = vmatmul.mubr.bf16.vlgmr.msra.gmra.mrb[4].mxu1 %v11454_v54 }
 0x356   : > { %5604 = vmatpush1.bf16.msra.mxu0 %v9361_v57  ;;  %5686 = vmatpush1.bf16.msra.mxu1 %v9363_v11  ;;  %v2714_v57 = vld [vmem:[%s11330_s1 + $0xc90] sm:$0xff] }
 0x357   : > { %5605 = vmatprep.subr.bf16.mxu0 %v9378_v12  ;;  %5687 = vmatprep.subr.bf16.mxu1 %v9380_v13  ;;  %v2722_v11 = vld [vmem:[%s11330_s1 + $0xcd0] sm:$0xff]  ;;  %v2715_v12 = vld [vmem:[%s11330_s1 + $0xc98] sm:$0xff] }
 0x358   : > { %5635 = vmatprep.mubr.bf16.mxu0 %v11466_v1  ;;  %5717 = vmatprep.mubr.bf16.mxu1 %v11466_v1  ;;  %v2723_v13 = vld [vmem:[%s11330_s1 + $0xcd8] sm:$0xff]  ;;  %v9506_v16 = vcombine.high %v2714_v57, %v2722_v11  ;;  %v9505_v22 = vcombine.low %v2714_v57, %v2722_v11 }
 0x359   : > { %v9508_v17 = vcombine.high %v2715_v12, %v2723_v13  ;;  %v9507_v23 = vcombine.low %v2715_v12, %v2723_v13 }
 0x35a   : > { %5606 = vmatpush1.bf16.msra.mxu0 %v9377_v18  ;;  %5688 = vmatpush1.bf16.msra.mxu1 %v9379_v19  ;;  %v2730_v18 = vld [vmem:[%s11330_s1 + $0xd10] sm:$0xff] }
 0x35b   : > { %5607 = vmatprep.subr.bf16.mxu0 %v9394_v20  ;;  %5689 = vmatprep.subr.bf16.mxu1 %v9396_v21  ;;  %v2738_v19 = vld [vmem:[%s11330_s1 + $0xd50] sm:$0xff]  ;;  %v2731_v20 = vld [vmem:[%s11330_s1 + $0xd18] sm:$0xff] }
 0x35c   : > { %v2739_v21 = vld [vmem:[%s11330_s1 + $0xd58] sm:$0xff]  ;;  %v9522_v24 = vcombine.high %v2730_v18, %v2738_v19  ;;  %v9521_v30 = vcombine.low %v2730_v18, %v2738_v19 }
 0x35d   : > { %v9524_v25 = vcombine.high %v2731_v20, %v2739_v21  ;;  %v9523_v32 = vcombine.low %v2731_v20, %v2739_v21 }
 0x35e   : > { %5608 = vmatpush1.bf16.msra.mxu0 %v9393_v26  ;;  %5690 = vmatpush1.bf16.msra.mxu1 %v9395_v27  ;;  %v2746_v26 = vld [vmem:[%s11330_s1 + $0xd90] sm:$0xff] }
 0x35f   : > { %5609 = vmatprep.subr.bf16.mxu0 %v9410_v28  ;;  %5691 = vmatprep.subr.bf16.mxu1 %v9412_v29  ;;  %v2754_v27 = vld [vmem:[%s11330_s1 + $0xdd0] sm:$0xff]  ;;  %v2747_v28 = vld [vmem:[%s11330_s1 + $0xd98] sm:$0xff] }
 0x360   : > { %v2755_v29 = vld [vmem:[%s11330_s1 + $0xdd8] sm:$0xff]  ;;  %v9538_v33 = vcombine.high %v2746_v26, %v2754_v27  ;;  %v9537_v40 = vcombine.low %v2746_v26, %v2754_v27 }
 0x361   : > { %v9540_v34 = vcombine.high %v2747_v28, %v2755_v29  ;;  %v9539_v41 = vcombine.low %v2747_v28, %v2755_v29 }
 0x362   : > { %5610 = vmatpush1.bf16.msra.mxu0 %v9409_v36  ;;  %5692 = vmatpush1.bf16.msra.mxu1 %v9411_v37  ;;  %v2762_v36 = vld [vmem:[%s11330_s1 + $0xe10] sm:$0xff] }
 0x363   : > { %5611 = vmatprep.subr.bf16.mxu0 %v9426_v38  ;;  %5693 = vmatprep.subr.bf16.mxu1 %v9428_v39  ;;  %v2770_v37 = vld [vmem:[%s11330_s1 + $0xe50] sm:$0xff]  ;;  %v2763_v38 = vld [vmem:[%s11330_s1 + $0xe18] sm:$0xff] }
 0x364   : > { %v2771_v39 = vld [vmem:[%s11330_s1 + $0xe58] sm:$0xff]  ;;  %v9554_v42 = vcombine.high %v2762_v36, %v2770_v37  ;;  %v9553_v48 = vcombine.low %v2762_v36, %v2770_v37 }
 0x365   : > { %v9556_v43 = vcombine.high %v2763_v38, %v2771_v39  ;;  %v9555_v49 = vcombine.low %v2763_v38, %v2771_v39 }
 0x366   : > { %5612 = vmatpush1.bf16.msra.mxu0 %v9425_v44  ;;  %5694 = vmatpush1.bf16.msra.mxu1 %v9427_v45  ;;  %v2778_v44 = vld [vmem:[%s11330_s1 + $0xe90] sm:$0xff] }
 0x367   : > { %5613 = vmatprep.subr.bf16.mxu0 %v9442_v46  ;;  %5695 = vmatprep.subr.bf16.mxu1 %v9444_v47  ;;  %v2786_v45 = vld [vmem:[%s11330_s1 + $0xed0] sm:$0xff]  ;;  %v2779_v46 = vld [vmem:[%s11330_s1 + $0xe98] sm:$0xff] }
 0x368   : > { %v2787_v47 = vld [vmem:[%s11330_s1 + $0xed8] sm:$0xff]  ;;  %v9570_v50 = vcombine.high %v2778_v44, %v2786_v45  ;;  %v9569_v58 = vcombine.low %v2778_v44, %v2786_v45 }
 0x369   : > { %v9572_v51 = vcombine.high %v2779_v46, %v2787_v47  ;;  %v9571_v59 = vcombine.low %v2779_v46, %v2787_v47 }
 0x36a   : > { %5614 = vmatpush1.bf16.msra.mxu0 %v9441_v52  ;;  %5696 = vmatpush1.bf16.msra.mxu1 %v9443_v53  ;;  %v2794_v52 = vld [vmem:[%s11330_s1 + $0xf10] sm:$0xff] }
 0x36b   : > { %5615 = vmatprep.subr.bf16.mxu0 %v9458_v55  ;;  %5697 = vmatprep.subr.bf16.mxu1 %v9460_v56  ;;  %v2802_v53 = vld [vmem:[%s11330_s1 + $0xf50] sm:$0xff]  ;;  %v2795_v55 = vld [vmem:[%s11330_s1 + $0xf18] sm:$0xff] }
 0x36c   : > { %v2803_v56 = vld [vmem:[%s11330_s1 + $0xf58] sm:$0xff]  ;;  %v9586_v60 = vcombine.high %v2794_v52, %v2802_v53  ;;  %v9585_v3 = vcombine.low %v2794_v52, %v2802_v53 }
 0x36d   : > { %v9588_v61 = vcombine.high %v2795_v55, %v2803_v56  ;;  %v9587_v4 = vcombine.low %v2795_v55, %v2803_v56 }
 0x36e   : > { %5616 = vmatpush1.bf16.msra.mxu0 %v9457_v62  ;;  %5698 = vmatpush1.bf16.msra.mxu1 %v9459_v63  ;;  %v2810_v62 = vld [vmem:[%s11330_s1 + $0xf90] sm:$0xff] }
 0x36f   : > { %5617 = vmatprep.subr.bf16.mxu0 %v9474_v0  ;;  %5699 = vmatprep.subr.bf16.mxu1 %v9476_v31  ;;  %v2818_v63 = vld [vmem:[%s11330_s1 + $0xfd0] sm:$0xff]  ;;  %v2811_v0 = vld [vmem:[%s11330_s1 + $0xf98] sm:$0xff] }
 0x370   : > { %v2819_v31 = vld [vmem:[%s11330_s1 + $0xfd8] sm:$0xff]  ;;  %v9602_v5 = vcombine.high %v2810_v62, %v2818_v63  ;;  %v9601_v57 = vcombine.low %v2810_v62, %v2818_v63 }
 0x371   : > { %v9604_v6 = vcombine.high %v2811_v0, %v2819_v31  ;;  %v9603_v11 = vcombine.low %v2811_v0, %v2819_v31 }
 0x372   : > { %5618 = vmatpush1.bf16.msra.mxu0 %v9473_v7  ;;  %5700 = vmatpush1.bf16.msra.mxu1 %v9475_v8  ;;  %v2316_v7 = vld [vmem:[%s11330_s1 + $0x20] sm:$0xff] }
 0x373   : > { %5619 = vmatprep.subr.bf16.mxu0 %v9490_v9  ;;  %5701 = vmatprep.subr.bf16.mxu1 %v9492_v10  ;;  %v2324_v8 = vld [vmem:[%s11330_s1 + $0x60] sm:$0xff]  ;;  %v2317_v9 = vld [vmem:[%s11330_s1 + $0x28] sm:$0xff] }
 0x374   : > { %v2325_v10 = vld [vmem:[%s11330_s1 + $0x68] sm:$0xff]  ;;  %v9110_v12 = vcombine.high %v2316_v7, %v2324_v8  ;;  %v9109_v18 = vcombine.low %v2316_v7, %v2324_v8 }
 0x375   : > { %v9112_v13 = vcombine.high %v2317_v9, %v2325_v10  ;;  %v9111_v19 = vcombine.low %v2317_v9, %v2325_v10 }
 0x376   : > { %5620 = vmatpush1.bf16.msra.mxu0 %v9489_v14  ;;  %5702 = vmatpush1.bf16.msra.mxu1 %v9491_v15  ;;  %v2332_v14 = vld [vmem:[%s11330_s1 + $0xa0] sm:$0xff] }
 0x377   : > { %5621 = vmatprep.subr.bf16.mxu0 %v9506_v16  ;;  %5703 = vmatprep.subr.bf16.mxu1 %v9508_v17  ;;  %v2340_v15 = vld [vmem:[%s11330_s1 + $0xe0] sm:$0xff]  ;;  %v2333_v16 = vld [vmem:[%s11330_s1 + $0xa8] sm:$0xff] }
 0x378   : > { %v2341_v17 = vld [vmem:[%s11330_s1 + $0xe8] sm:$0xff]  ;;  %v9126_v20 = vcombine.high %v2332_v14, %v2340_v15  ;;  %v9125_v26 = vcombine.low %v2332_v14, %v2340_v15 }
 0x379   : > { %v9128_v21 = vcombine.high %v2333_v16, %v2341_v17  ;;  %v9127_v27 = vcombine.low %v2333_v16, %v2341_v17 }
 0x37a   : > { %5622 = vmatpush1.bf16.msra.mxu0 %v9505_v22  ;;  %5704 = vmatpush1.bf16.msra.mxu1 %v9507_v23  ;;  %v2348_v22 = vld [vmem:[%s11330_s1 + $0x120] sm:$0xff] }
 0x37b   : > { %5623 = vmatprep.subr.bf16.mxu0 %v9522_v24  ;;  %5705 = vmatprep.subr.bf16.mxu1 %v9524_v25  ;;  %v2356_v23 = vld [vmem:[%s11330_s1 + $0x160] sm:$0xff]  ;;  %v2349_v24 = vld [vmem:[%s11330_s1 + $0x128] sm:$0xff] }
 0x37c   : > { %v2357_v25 = vld [vmem:[%s11330_s1 + $0x168] sm:$0xff]  ;;  %v9142_v28 = vcombine.high %v2348_v22, %v2356_v23  ;;  %v9141_v36 = vcombine.low %v2348_v22, %v2356_v23 }
 0x37d   : > { %v9144_v29 = vcombine.high %v2349_v24, %v2357_v25  ;;  %v9143_v37 = vcombine.low %v2349_v24, %v2357_v25 }
 0x37e   : > { %5624 = vmatpush1.bf16.msra.mxu0 %v9521_v30  ;;  %5706 = vmatpush1.bf16.msra.mxu1 %v9523_v32  ;;  %v2364_v30 = vld [vmem:[%s11330_s1 + $0x1a0] sm:$0xff] }
 0x37f   : > { %5625 = vmatprep.subr.bf16.mxu0 %v9538_v33  ;;  %5707 = vmatprep.subr.bf16.mxu1 %v9540_v34  ;;  %v2372_v32 = vld [vmem:[%s11330_s1 + $0x1e0] sm:$0xff]  ;;  %v2365_v33 = vld [vmem:[%s11330_s1 + $0x1a8] sm:$0xff] }
 0x380   : > { %v2373_v34 = vld [vmem:[%s11330_s1 + $0x1e8] sm:$0xff]  ;;  %v9158_v38 = vcombine.high %v2364_v30, %v2372_v32  ;;  %v9157_v44 = vcombine.low %v2364_v30, %v2372_v32 }
 0x381   : > { %v9160_v39 = vcombine.high %v2365_v33, %v2373_v34  ;;  %v9159_v45 = vcombine.low %v2365_v33, %v2373_v34 }
 0x382   : > { %5626 = vmatpush1.bf16.msra.mxu0 %v9537_v40  ;;  %5708 = vmatpush1.bf16.msra.mxu1 %v9539_v41  ;;  %v2380_v40 = vld [vmem:[%s11330_s1 + $0x220] sm:$0xff] }
 0x383   : > { %5627 = vmatprep.subr.bf16.mxu0 %v9554_v42  ;;  %5709 = vmatprep.subr.bf16.mxu1 %v9556_v43  ;;  %v2388_v41 = vld [vmem:[%s11330_s1 + $0x260] sm:$0xff]  ;;  %v2381_v42 = vld [vmem:[%s11330_s1 + $0x228] sm:$0xff] }
 0x384   : > { %v2389_v43 = vld [vmem:[%s11330_s1 + $0x268] sm:$0xff]  ;;  %v9174_v46 = vcombine.high %v2380_v40, %v2388_v41  ;;  %v9173_v52 = vcombine.low %v2380_v40, %v2388_v41 }
 0x385   : > { %v9176_v47 = vcombine.high %v2381_v42, %v2389_v43  ;;  %v9175_v53 = vcombine.low %v2381_v42, %v2389_v43 }
 0x386   : > { %5628 = vmatpush1.bf16.msra.mxu0 %v9553_v48  ;;  %5710 = vmatpush1.bf16.msra.mxu1 %v9555_v49  ;;  %v2396_v48 = vld [vmem:[%s11330_s1 + $0x2a0] sm:$0xff] }
 0x387   : > { %5629 = vmatprep.subr.bf16.mxu0 %v9570_v50  ;;  %5711 = vmatprep.subr.bf16.mxu1 %v9572_v51  ;;  %v2404_v49 = vld [vmem:[%s11330_s1 + $0x2e0] sm:$0xff]  ;;  %v2397_v50 = vld [vmem:[%s11330_s1 + $0x2a8] sm:$0xff] }
 0x388   : > { %v2405_v51 = vld [vmem:[%s11330_s1 + $0x2e8] sm:$0xff]  ;;  %v9190_v55 = vcombine.high %v2396_v48, %v2404_v49  ;;  %v9189_v62 = vcombine.low %v2396_v48, %v2404_v49 }
 0x389   : > { %v9192_v56 = vcombine.high %v2397_v50, %v2405_v51  ;;  %v9191_v63 = vcombine.low %v2397_v50, %v2405_v51 }
 0x38a   : > { %5630 = vmatpush1.bf16.msra.mxu0 %v9569_v58  ;;  %5712 = vmatpush1.bf16.msra.mxu1 %v9571_v59  ;;  %v2412_v58 = vld [vmem:[%s11330_s1 + $0x320] sm:$0xff] }
 0x38b   : > { %5631 = vmatprep.subr.bf16.mxu0 %v9586_v60  ;;  %5713 = vmatprep.subr.bf16.mxu1 %v9588_v61  ;;  %v2420_v59 = vld [vmem:[%s11330_s1 + $0x360] sm:$0xff]  ;;  %v2413_v60 = vld [vmem:[%s11330_s1 + $0x328] sm:$0xff] }
 0x38c   : > { %v2421_v61 = vld [vmem:[%s11330_s1 + $0x368] sm:$0xff]  ;;  %v9206_v0 = vcombine.high %v2412_v58, %v2420_v59  ;;  %v9205_v7 = vcombine.low %v2412_v58, %v2420_v59 }
 0x38d   : > { %v9208_v31 = vcombine.high %v2413_v60, %v2421_v61  ;;  %v9207_v8 = vcombine.low %v2413_v60, %v2421_v61 }
 0x38e   : > { %5632 = vmatpush1.bf16.msra.mxu0 %v9585_v3  ;;  %5714 = vmatpush1.bf16.msra.mxu1 %v9587_v4  ;;  %v2428_v3 = vld [vmem:[%s11330_s1 + $0x3a0] sm:$0xff] }
 0x38f   : > { %5633 = vmatprep.subr.bf16.mxu0 %v9602_v5  ;;  %5715 = vmatprep.subr.bf16.mxu1 %v9604_v6  ;;  %v2436_v4 = vld [vmem:[%s11330_s1 + $0x3e0] sm:$0xff]  ;;  %v2429_v5 = vld [vmem:[%s11330_s1 + $0x3a8] sm:$0xff] }
 0x390   : > { %v2437_v6 = vld [vmem:[%s11330_s1 + $0x3e8] sm:$0xff]  ;;  %v9222_v9 = vcombine.high %v2428_v3, %v2436_v4  ;;  %v9221_v14 = vcombine.low %v2428_v3, %v2436_v4 }
 0x391   : > { %v9224_v10 = vcombine.high %v2429_v5, %v2437_v6  ;;  %v9223_v15 = vcombine.low %v2429_v5, %v2437_v6 }
 0x392   : > { %5634 = vmatpush1.bf16.msra.mxu0 %v9601_v57  ;;  %5716 = vmatpush1.bf16.msra.mxu1 %v9603_v11  ;;  %v2444_v57 = vld [vmem:[%s11330_s1 + $0x420] sm:$0xff] }
 0x393   : > { %5726 = vmatprep.subr.bf16.mxu0 %v9110_v12  ;;  %5808 = vmatprep.subr.bf16.mxu1 %v9112_v13  ;;  %v2452_v11 = vld [vmem:[%s11330_s1 + $0x460] sm:$0xff]  ;;  %v2445_v12 = vld [vmem:[%s11330_s1 + $0x428] sm:$0xff] }
 0x394   : > { %v2453_v13 = vld [vmem:[%s11330_s1 + $0x468] sm:$0xff]  ;;  %v9238_v16 = vcombine.high %v2444_v57, %v2452_v11  ;;  %v9237_v22 = vcombine.low %v2444_v57, %v2452_v11 }
 0x395   : > { %5636 = vmatmul.mubr.bf16.vlgmr.msra.gmra.mrb[4].mxu0 %v11534_v2  ;;  %5718 = vmatmul.mubr.bf16.vlgmr.msra.gmra.mrb[4].mxu1 %v11534_v2  ;;  %v9240_v17 = vcombine.high %v2445_v12, %v2453_v13  ;;  %v9239_v23 = vcombine.low %v2445_v12, %v2453_v13 }
 0x396   : > { %5727 = vmatpush1.bf16.msra.mxu0 %v9109_v18  ;;  %5809 = vmatpush1.bf16.msra.mxu1 %v9111_v19  ;;  %v2460_v18 = vld [vmem:[%s11330_s1 + $0x4a0] sm:$0xff] }
 0x397   : > { %5728 = vmatprep.subr.bf16.mxu0 %v9126_v20  ;;  %5810 = vmatprep.subr.bf16.mxu1 %v9128_v21  ;;  %v2468_v19 = vld [vmem:[%s11330_s1 + $0x4e0] sm:$0xff]  ;;  %v2461_v20 = vld [vmem:[%s11330_s1 + $0x4a8] sm:$0xff] }
 0x398   : > { %5758 = vmatprep.mubr.bf16.mxu0 %v11408_v35  ;;  %5840 = vmatprep.mubr.bf16.mxu1 %v11408_v35  ;;  %v2469_v21 = vld [vmem:[%s11330_s1 + $0x4e8] sm:$0xff]  ;;  %v9254_v24 = vcombine.high %v2460_v18, %v2468_v19  ;;  %v9253_v30 = vcombine.low %v2460_v18, %v2468_v19 }
 0x399   : > { %v9256_v25 = vcombine.high %v2461_v20, %v2469_v21  ;;  %v9255_v32 = vcombine.low %v2461_v20, %v2469_v21 }
 0x39a   : > { %5729 = vmatpush1.bf16.msra.mxu0 %v9125_v26  ;;  %5811 = vmatpush1.bf16.msra.mxu1 %v9127_v27  ;;  %v2476_v26 = vld [vmem:[%s11330_s1 + $0x520] sm:$0xff] }
 0x39b   : > { %5730 = vmatprep.subr.bf16.mxu0 %v9142_v28  ;;  %5812 = vmatprep.subr.bf16.mxu1 %v9144_v29  ;;  %v2484_v27 = vld [vmem:[%s11330_s1 + $0x560] sm:$0xff]  ;;  %v2477_v28 = vld [vmem:[%s11330_s1 + $0x528] sm:$0xff] }
 0x39c   : > { %v2485_v29 = vld [vmem:[%s11330_s1 + $0x568] sm:$0xff]  ;;  %v9270_v33 = vcombine.high %v2476_v26, %v2484_v27  ;;  %v9269_v40 = vcombine.low %v2476_v26, %v2484_v27 }
 0x39d   : > { %v9272_v34 = vcombine.high %v2477_v28, %v2485_v29  ;;  %v9271_v41 = vcombine.low %v2477_v28, %v2485_v29 }
 0x39e   : > { %5731 = vmatpush1.bf16.msra.mxu0 %v9141_v36  ;;  %5813 = vmatpush1.bf16.msra.mxu1 %v9143_v37  ;;  %v2492_v36 = vld [vmem:[%s11330_s1 + $0x5a0] sm:$0xff] }
 0x39f   : > { %5732 = vmatprep.subr.bf16.mxu0 %v9158_v38  ;;  %5814 = vmatprep.subr.bf16.mxu1 %v9160_v39  ;;  %v2500_v37 = vld [vmem:[%s11330_s1 + $0x5e0] sm:$0xff]  ;;  %v2493_v38 = vld [vmem:[%s11330_s1 + $0x5a8] sm:$0xff] }
 0x3a0   : > { %v2501_v39 = vld [vmem:[%s11330_s1 + $0x5e8] sm:$0xff]  ;;  %v9286_v42 = vcombine.high %v2492_v36, %v2500_v37  ;;  %v9285_v48 = vcombine.low %v2492_v36, %v2500_v37 }
 0x3a1   : > { %v9288_v43 = vcombine.high %v2493_v38, %v2501_v39  ;;  %v9287_v49 = vcombine.low %v2493_v38, %v2501_v39 }
 0x3a2   : > { %5733 = vmatpush1.bf16.msra.mxu0 %v9157_v44  ;;  %5815 = vmatpush1.bf16.msra.mxu1 %v9159_v45  ;;  %v2508_v44 = vld [vmem:[%s11330_s1 + $0x620] sm:$0xff] }
 0x3a3   : > { %5734 = vmatprep.subr.bf16.mxu0 %v9174_v46  ;;  %5816 = vmatprep.subr.bf16.mxu1 %v9176_v47  ;;  %v2516_v45 = vld [vmem:[%s11330_s1 + $0x660] sm:$0xff]  ;;  %v2509_v46 = vld [vmem:[%s11330_s1 + $0x628] sm:$0xff] }
 0x3a4   : > { %v2517_v47 = vld [vmem:[%s11330_s1 + $0x668] sm:$0xff]  ;;  %v9302_v50 = vcombine.high %v2508_v44, %v2516_v45  ;;  %v9301_v58 = vcombine.low %v2508_v44, %v2516_v45 }
 0x3a5   : > { %v9304_v51 = vcombine.high %v2509_v46, %v2517_v47  ;;  %v9303_v59 = vcombine.low %v2509_v46, %v2517_v47 }
 0x3a6   : > { %5735 = vmatpush1.bf16.msra.mxu0 %v9173_v52  ;;  %5817 = vmatpush1.bf16.msra.mxu1 %v9175_v53  ;;  %v2524_v52 = vld [vmem:[%s11330_s1 + $0x6a0] sm:$0xff] }
 0x3a7   : > { %5736 = vmatprep.subr.bf16.mxu0 %v9190_v55  ;;  %5818 = vmatprep.subr.bf16.mxu1 %v9192_v56  ;;  %v2532_v53 = vld [vmem:[%s11330_s1 + $0x6e0] sm:$0xff]  ;;  %v2525_v55 = vld [vmem:[%s11330_s1 + $0x6a8] sm:$0xff] }
 0x3a8   : > { %v2533_v56 = vld [vmem:[%s11330_s1 + $0x6e8] sm:$0xff]  ;;  %v9318_v60 = vcombine.high %v2524_v52, %v2532_v53  ;;  %v9317_v3 = vcombine.low %v2524_v52, %v2532_v53 }
 0x3a9   : > { %v9320_v61 = vcombine.high %v2525_v55, %v2533_v56  ;;  %v9319_v4 = vcombine.low %v2525_v55, %v2533_v56  ;;  %v11757_v56 = vld [vmem:[%s11330_s1 + $0xaa0] sm:$0xff] }
 0x3aa   : > { %5737 = vmatpush1.bf16.msra.mxu0 %v9189_v62  ;;  %5819 = vmatpush1.bf16.msra.mxu1 %v9191_v63  ;;  %v2540_v62 = vld [vmem:[%s11330_s1 + $0x720] sm:$0xff] }
 0x3ab   : > { %5738 = vmatprep.subr.bf16.mxu0 %v9206_v0  ;;  %5820 = vmatprep.subr.bf16.mxu1 %v9208_v31  ;;  %v2548_v63 = vld [vmem:[%s11330_s1 + $0x760] sm:$0xff]  ;;  %v2541_v0 = vld [vmem:[%s11330_s1 + $0x728] sm:$0xff] }
 0x3ac   : > { %v2549_v31 = vld [vmem:[%s11330_s1 + $0x768] sm:$0xff]  ;;  %v9334_v5 = vcombine.high %v2540_v62, %v2548_v63  ;;  %v9333_v57 = vcombine.low %v2540_v62, %v2548_v63  ;;  %v11769_v62 = vld [vmem:[%s11330_s1 + $0xb20] sm:$0xff] }
 0x3ad   : > { %v9336_v6 = vcombine.high %v2541_v0, %v2549_v31  ;;  %v9335_v11 = vcombine.low %v2541_v0, %v2549_v31  ;;  %v11772_v63 = vld [vmem:[%s11330_s1 + $0xb60] sm:$0xff]  ;;  %v11775_v0 = vld [vmem:[%s11330_s1 + $0xb28] sm:$0xff] }
 0x3ae   : > { %5739 = vmatpush1.bf16.msra.mxu0 %v9205_v7  ;;  %5821 = vmatpush1.bf16.msra.mxu1 %v9207_v8  ;;  %v2556_v7 = vld [vmem:[%s11330_s1 + $0x7a0] sm:$0xff]  ;;  %v11778_v31 = vld [vmem:[%s11330_s1 + $0xb68] sm:$0xff] }
 0x3af   : > { %5740 = vmatprep.subr.bf16.mxu0 %v9222_v9  ;;  %5822 = vmatprep.subr.bf16.mxu1 %v9224_v10  ;;  %v2564_v8 = vld [vmem:[%s11330_s1 + $0x7e0] sm:$0xff]  ;;  %v2557_v9 = vld [vmem:[%s11330_s1 + $0x7a8] sm:$0xff] }
 0x3b0   : > { %v2565_v10 = vld [vmem:[%s11330_s1 + $0x7e8] sm:$0xff]  ;;  %v9350_v12 = vcombine.high %v2556_v7, %v2564_v8  ;;  %v9349_v18 = vcombine.low %v2556_v7, %v2564_v8 }
 0x3b1   : > { %v9352_v13 = vcombine.high %v2557_v9, %v2565_v10  ;;  %v9351_v19 = vcombine.low %v2557_v9, %v2565_v10  ;;  %v11790_v7 = vld [vmem:[%s11330_s1 + $0xbe8] sm:$0xff] }
 0x3b2   : > { %5741 = vmatpush1.bf16.msra.mxu0 %v9221_v14  ;;  %5823 = vmatpush1.bf16.msra.mxu1 %v9223_v15  ;;  %v2572_v14 = vld [vmem:[%s11330_s1 + $0x820] sm:$0xff] }
 0x3b3   : > { %5742 = vmatprep.subr.bf16.mxu0 %v9238_v16  ;;  %5824 = vmatprep.subr.bf16.mxu1 %v9240_v17  ;;  %v2580_v15 = vld [vmem:[%s11330_s1 + $0x860] sm:$0xff]  ;;  %v2573_v16 = vld [vmem:[%s11330_s1 + $0x828] sm:$0xff] }
 0x3b4   : > { %v2581_v17 = vld [vmem:[%s11330_s1 + $0x868] sm:$0xff]  ;;  %v9366_v20 = vcombine.high %v2572_v14, %v2580_v15  ;;  %v9365_v26 = vcombine.low %v2572_v14, %v2580_v15  ;;  %v9461_v15 = vcombine.low %v11769_v62, %v11772_v63 }
 0x3b5   : > { %v9368_v21 = vcombine.high %v2573_v16, %v2581_v17  ;;  %v9367_v27 = vcombine.low %v2573_v16, %v2581_v17  ;;  %v9462_v16 = vcombine.high %v11769_v62, %v11772_v63  ;;  %v11814_v17 = vld [vmem:[%s11330_s1 + $0xc68] sm:$0xff] }
 0x3b6   : > { %5743 = vmatpush1.bf16.msra.mxu0 %v9237_v22  ;;  %5825 = vmatpush1.bf16.msra.mxu1 %v9239_v23  ;;  %v2588_v22 = vld [vmem:[%s11330_s1 + $0x8a0] sm:$0xff] }
 0x3b7   : > { %5744 = vmatprep.subr.bf16.mxu0 %v9254_v24  ;;  %5826 = vmatprep.subr.bf16.mxu1 %v9256_v25  ;;  %v2596_v23 = vld [vmem:[%s11330_s1 + $0x8e0] sm:$0xff]  ;;  %v2589_v24 = vld [vmem:[%s11330_s1 + $0x8a8] sm:$0xff] }
 0x3b8   : > { %v2597_v25 = vld [vmem:[%s11330_s1 + $0x8e8] sm:$0xff]  ;;  %v9382_v28 = vcombine.high %v2588_v22, %v2596_v23  ;;  %v9381_v36 = vcombine.low %v2588_v22, %v2596_v23 }
 0x3b9   : > { %v9384_v29 = vcombine.high %v2589_v24, %v2597_v25  ;;  %v9383_v37 = vcombine.low %v2589_v24, %v2597_v25  ;;  %v11831_v24 = vld [vmem:[%s11330_s1 + $0xca8] sm:$0xff] }
 0x3ba   : > { %5745 = vmatpush1.bf16.msra.mxu0 %v9253_v30  ;;  %5827 = vmatpush1.bf16.msra.mxu1 %v9255_v32  ;;  %v2604_v30 = vld [vmem:[%s11330_s1 + $0x920] sm:$0xff]  ;;  %v11834_v25 = vld [vmem:[%s11330_s1 + $0xce8] sm:$0xff] }
 0x3bb   : > { %5746 = vmatprep.subr.bf16.mxu0 %v9270_v33  ;;  %5828 = vmatprep.subr.bf16.mxu1 %v9272_v34  ;;  %v2612_v32 = vld [vmem:[%s11330_s1 + $0x960] sm:$0xff]  ;;  %v2605_v33 = vld [vmem:[%s11330_s1 + $0x928] sm:$0xff] }
 0x3bc   : > { %v2613_v34 = vld [vmem:[%s11330_s1 + $0x968] sm:$0xff]  ;;  %v9398_v38 = vcombine.high %v2604_v30, %v2612_v32  ;;  %v9397_v44 = vcombine.low %v2604_v30, %v2612_v32  ;;  %v11848_v32 = vld [vmem:[%s11330_s1 + $0xd60] sm:$0xff] }
 0x3bd   : > { %v9400_v39 = vcombine.high %v2605_v33, %v2613_v34  ;;  %v9399_v45 = vcombine.low %v2605_v33, %v2613_v34  ;;  %v11851_v33 = vld [vmem:[%s11330_s1 + $0xd28] sm:$0xff] }
 0x3be   : > { %5747 = vmatpush1.bf16.msra.mxu0 %v9269_v40  ;;  %5829 = vmatpush1.bf16.msra.mxu1 %v9271_v41  ;;  %v2620_v40 = vld [vmem:[%s11330_s1 + $0x9a0] sm:$0xff]  ;;  %v11854_v34 = vld [vmem:[%s11330_s1 + $0xd68] sm:$0xff] }
 0x3bf   : > { %5748 = vmatprep.subr.bf16.mxu0 %v9286_v42  ;;  %5830 = vmatprep.subr.bf16.mxu1 %v9288_v43  ;;  %v2628_v41 = vld [vmem:[%s11330_s1 + $0x9e0] sm:$0xff]  ;;  %v2621_v42 = vld [vmem:[%s11330_s1 + $0x9a8] sm:$0xff] }
 0x3c0   : > { %v2629_v43 = vld [vmem:[%s11330_s1 + $0x9e8] sm:$0xff]  ;;  %v9414_v46 = vcombine.high %v2620_v40, %v2628_v41  ;;  %v9413_v52 = vcombine.low %v2620_v40, %v2628_v41 }
 0x3c1   : > { %v9416_v47 = vcombine.high %v2621_v42, %v2629_v43  ;;  %v9415_v53 = vcombine.low %v2621_v42, %v2629_v43 }
 0x3c2   : > { %5749 = vmatpush1.bf16.msra.mxu0 %v9285_v48  ;;  %5831 = vmatpush1.bf16.msra.mxu1 %v9287_v49  ;;  %v2636_v48 = vld [vmem:[%s11330_s1 + $0xa20] sm:$0xff] }
 0x3c3   : > { %5750 = vmatprep.subr.bf16.mxu0 %v9302_v50  ;;  %5832 = vmatprep.subr.bf16.mxu1 %v9304_v51  ;;  %v2644_v49 = vld [vmem:[%s11330_s1 + $0xa60] sm:$0xff]  ;;  %v2637_v50 = vld [vmem:[%s11330_s1 + $0xa28] sm:$0xff] }
 0x3c4   : > { %v2645_v51 = vld [vmem:[%s11330_s1 + $0xa68] sm:$0xff]  ;;  %v9430_v55 = vcombine.high %v2636_v48, %v2644_v49 }
 0x3c5   : > { %v9431_v8 = vcombine.low %v2637_v50, %v2645_v51 }
 0x3c6   : > { %5751 = vmatpush1.bf16.msra.mxu0 %v9301_v58  ;;  %5833 = vmatpush1.bf16.msra.mxu1 %v9303_v59  ;;  %v11760_v58 = vld [vmem:[%s11330_s1 + $0xae0] sm:$0xff]  ;;  %v11763_v59 = vld [vmem:[%s11330_s1 + $0xaa8] sm:$0xff] }
 0x3c7   : > { %5752 = vmatprep.subr.bf16.mxu0 %v9318_v60  ;;  %5834 = vmatprep.subr.bf16.mxu1 %v9320_v61  ;;  %v9432_v60 = vcombine.high %v2637_v50, %v2645_v51  ;;  %v11766_v61 = vld [vmem:[%s11330_s1 + $0xae8] sm:$0xff]  ;;  %v9445_v9 = vcombine.low %v11757_v56, %v11760_v58  ;;  %v9446_v10 = vcombine.high %v11757_v56, %v11760_v58 }
 0x3c8   : > { %v9448_v14 = vcombine.high %v11763_v59, %v11766_v61 }
 0x3ca   : > { %5753 = vmatpush1.bf16.msra.mxu0 %v9317_v3  ;;  %5835 = vmatpush1.bf16.msra.mxu1 %v9319_v4  ;;  %v11781_v3 = vld [vmem:[%s11330_s1 + $0xba0] sm:$0xff]  ;;  %v9429_v4 = vcombine.low %v2636_v48, %v2644_v49 }
 0x3cb   : > { %5754 = vmatprep.subr.bf16.mxu0 %v9334_v5  ;;  %5836 = vmatprep.subr.bf16.mxu1 %v9336_v6  ;;  %v11784_v5 = vld [vmem:[%s11330_s1 + $0xbe0] sm:$0xff]  ;;  %v11787_v6 = vld [vmem:[%s11330_s1 + $0xba8] sm:$0xff] }
 0x3cc   : > { %v9477_v22 = vcombine.low %v11781_v3, %v11784_v5  ;;  %v9478_v23 = vcombine.high %v11781_v3, %v11784_v5 }
 0x3ce   : > { %5755 = vmatpush1.bf16.msra.mxu0 %v9333_v57  ;;  %5837 = vmatpush1.bf16.msra.mxu1 %v9335_v11  ;;  %v11797_v57 = vld [vmem:[%s11330_s1 + $0xc20] sm:$0xff] }
 0x3cf   : > { %5756 = vmatprep.subr.bf16.mxu0 %v9350_v12  ;;  %5838 = vmatprep.subr.bf16.mxu1 %v9352_v13  ;;  %v11800_v11 = vld [vmem:[%s11330_s1 + $0xc60] sm:$0xff]  ;;  %v11803_v12 = vld [vmem:[%s11330_s1 + $0xc28] sm:$0xff]  ;;  %v9447_v13 = vcombine.low %v11763_v59, %v11766_v61 }
 0x3d0   : > { %v9494_v30 = vcombine.high %v11797_v57, %v11800_v11 }
 0x3d2   : > { %5757 = vmatpush1.bf16.msra.mxu0 %v9349_v18  ;;  %5839 = vmatpush1.bf16.msra.mxu1 %v9351_v19  ;;  %v11817_v18 = vld [vmem:[%s11330_s1 + $0xca0] sm:$0xff] }
 0x3d3   : > { %5767 = vmatprep.subr.bf16.mxu0 %v9366_v20  ;;  %5849 = vmatprep.subr.bf16.mxu1 %v9368_v21  ;;  %v11820_v19 = vld [vmem:[%s11330_s1 + $0xce0] sm:$0xff]  ;;  %v9463_v20 = vcombine.low %v11775_v0, %v11778_v31  ;;  %v9464_v21 = vcombine.high %v11775_v0, %v11778_v31 }
 0x3d5   : > { %5759 = vmatmul.mubr.bf16.vlgmr.msra.gmra.mrb[8].mxu0 %v11454_v54  ;;  %5841 = vmatmul.mubr.bf16.vlgmr.msra.gmra.mrb[8].mxu1 %v11454_v54 }
 0x3d6   : > { %5768 = vmatpush1.bf16.msra.mxu0 %v9365_v26  ;;  %5850 = vmatpush1.bf16.msra.mxu1 %v9367_v27  ;;  %v11837_v26 = vld [vmem:[%s11330_s1 + $0xd20] sm:$0xff]  ;;  %v9479_v27 = vcombine.low %v11787_v6, %v11790_v7 }
 0x3d7   : > { %5769 = vmatprep.subr.bf16.mxu0 %v9382_v28  ;;  %5851 = vmatprep.subr.bf16.mxu1 %v9384_v29  ;;  %v9480_v28 = vcombine.high %v11787_v6, %v11790_v7  ;;  %v9493_v29 = vcombine.low %v11797_v57, %v11800_v11 }
 0x3d8   : > { %5799 = vmatprep.mubr.bf16.mxu0 %v11466_v1  ;;  %5881 = vmatprep.mubr.bf16.mxu1 %v11466_v1 }
 0x3da   : > { %5770 = vmatpush1.bf16.msra.mxu0 %v9381_v36  ;;  %5852 = vmatpush1.bf16.msra.mxu1 %v9383_v37  ;;  %v9495_v36 = vcombine.low %v11803_v12, %v11814_v17  ;;  %v9496_v37 = vcombine.high %v11803_v12, %v11814_v17 }
 0x3db   : > { %5771 = vmatprep.subr.bf16.mxu0 %v9398_v38  ;;  %5853 = vmatprep.subr.bf16.mxu1 %v9400_v39 }
 0x3de   : > { %5772 = vmatpush1.bf16.msra.mxu0 %v9397_v44  ;;  %5854 = vmatpush1.bf16.msra.mxu1 %v9399_v45 }
 0x3df   : > { %5773 = vmatprep.subr.bf16.mxu0 %v9414_v46  ;;  %5855 = vmatprep.subr.bf16.mxu1 %v9416_v47 }
 0x3e2   : > { %5774 = vmatpush1.bf16.msra.mxu0 %v9413_v52  ;;  %5856 = vmatpush1.bf16.msra.mxu1 %v9415_v53 }
 0x3e3   : > { %5775 = vmatprep.subr.bf16.mxu0 %v9430_v55  ;;  %5857 = vmatprep.subr.bf16.mxu1 %v9432_v60 }
 0x3e6   : > { %5776 = vmatpush1.bf16.msra.mxu0 %v9429_v4  ;;  %5858 = vmatpush1.bf16.msra.mxu1 %v9431_v8 }
 0x3e7   : > { %5777 = vmatprep.subr.bf16.mxu0 %v9446_v10  ;;  %5859 = vmatprep.subr.bf16.mxu1 %v9448_v14 }
 0x3e8   : > { %v11862_v39 = vpop.f32.mrb[0].mxu0  ;;  %v11873_v46 = vpop.f32.mrb[0].mxu1 }
 0x3e9   : > { %v6054_v44 = vrot.slane %v11862_v39, 4  ;;  %v6167_v45 = vmul.f32 %v11862_v39, %v11862_v39  ;;  %v11875_v47 = vpop.f32.mrb[1].mxu0  ;;  %v6066_v50 = vrot.slane %v11873_v46, 4  ;;  %v6169_v51 = vmul.f32 %v11873_v46, %v11873_v46  ;;  %v11887_v55 = vpop.f32.mrb[1].mxu1 }
 0x3ea   : > { %v6060_v52 = vrot.slane %v11875_v47, 4  ;;  %v6168_v53 = vmul.f32 %v11875_v47, %v11875_v47  ;;  %v5477_v56 = vpop.f32.mrb[2].mxu0  ;;  %5778 = vmatpush1.bf16.msra.mxu0 %v9445_v9  ;;  %v6072_v60 = vrot.slane %v11887_v55, 4  ;;  %v6170_v61 = vmul.f32 %v11887_v55, %v11887_v55  ;;  %v5559_v4 = vpop.f32.mrb[2].mxu1  ;;  %5860 = vmatpush1.bf16.msra.mxu1 %v9447_v13 }
 0x3eb   : > { %v6055_v58 = vadd.f32 %v6054_v44, %v11862_v39  ;;  %v6183_v59 = vrot.slane %v6167_v45, 4  ;;  %v5478_v8 = vpop.f32.mrb[3].mxu0  ;;  %5779 = vmatprep.subr.bf16.mxu0 %v9462_v16  ;;  %v6067_v10 = vadd.f32 %v6066_v50, %v11873_v46  ;;  %v6195_v14 = vrot.slane %v6169_v51, 4  ;;  %v5560_v56 = vpop.f32.mrb[3].mxu1  ;;  %5861 = vmatprep.subr.bf16.mxu1 %v9464_v21 }
 0x3ec   : > { %v6061_v49 = vadd.f32 %v6060_v52, %v11875_v47  ;;  %v6189_v48 = vrot.slane %v6168_v53, 4  ;;  %v6073_v42 = vadd.f32 %v6072_v60, %v11887_v55  ;;  %v6201_v40 = vrot.slane %v6170_v61, 4 }
 0x3ed   : > { %v6056_v9 = vrot.slane %v6055_v58, 2  ;;  %v6184_v44 = vadd.f32 %v6183_v59, %v6167_v45  ;;  %v6068_v41 = vrot.slane %v6067_v10, 2  ;;  %v6196_v43 = vadd.f32 %v6195_v14, %v6169_v51 }
 0x3ee   : > { %v6062_v38 = vrot.slane %v6061_v49, 2  ;;  %v6190_v4 = vadd.f32 %v6189_v48, %v6168_v53  ;;  %5780 = vmatpush1.bf16.msra.mxu0 %v9461_v15  ;;  %v6074_v50 = vrot.slane %v6073_v42, 2  ;;  %v6202_v52 = vadd.f32 %v6201_v40, %v6170_v61  ;;  %5862 = vmatpush1.bf16.msra.mxu1 %v9463_v20 }
 0x3ef   : > { %v6057_v13 = vadd.f32 %v6056_v9, %v6055_v58  ;;  %v6185_v16 = vrot.slane %v6184_v44, 2  ;;  %5781 = vmatprep.subr.bf16.mxu0 %v9478_v23  ;;  %v6069_v21 = vadd.f32 %v6068_v41, %v6067_v10  ;;  %v6197_v45 = vrot.slane %v6196_v43, 2  ;;  %5863 = vmatprep.subr.bf16.mxu1 %v9480_v28  ;;  %v2748_v9 = vld [vmem:[%s11330_s1 + $0xda0] sm:$0xff] }
 0x3f0   : > { %v6063_v51 = vadd.f32 %v6062_v38, %v6061_v49  ;;  %v6191_v48 = vrot.slane %v6190_v4, 2  ;;  %v6075_v63 = vadd.f32 %v6074_v50, %v6073_v42  ;;  %v6203_v15 = vrot.slane %v6202_v52, 2 }
 0x3f1   : > { %v6058_v53 = vrot.slane %v6057_v13, 1  ;;  %v6186_v62 = vadd.f32 %v6185_v16, %v6184_v44  ;;  %v6070_v58 = vrot.slane %v6069_v21, 1  ;;  %v6198_v59 = vadd.f32 %v6197_v45, %v6196_v43  ;;  %v2756_v44 = vld [vmem:[%s11330_s1 + $0xde0] sm:$0xff] }
 0x3f2   : > { %v6064_v40 = vrot.slane %v6063_v51, 1  ;;  %v6192_v60 = vadd.f32 %v6191_v48, %v6190_v4  ;;  %5782 = vmatpush1.bf16.msra.mxu0 %v9477_v22  ;;  %v6076_v20 = vrot.slane %v6075_v63, 1  ;;  %v6204_v23 = vadd.f32 %v6203_v15, %v6202_v52  ;;  %5864 = vmatpush1.bf16.msra.mxu1 %v9479_v27  ;;  %v2749_v4 = vld [vmem:[%s11330_s1 + $0xda8] sm:$0xff] }
 0x3f3   : > { %v6059_v0 = vadd.f32 %v6058_v53, %v6057_v13  ;;  %v6187_v31 = vrot.slane %v6186_v62, 1  ;;  %5783 = vmatprep.subr.bf16.mxu0 %v9494_v30  ;;  %v6071_v28 = vadd.f32 %v6070_v58, %v6069_v21  ;;  %v6199_v38 = vrot.slane %v6198_v59, 1  ;;  %5865 = vmatprep.subr.bf16.mxu1 %v9496_v37  ;;  %v2757_v13 = vld [vmem:[%s11330_s1 + $0xde8] sm:$0xff] }
 0x3f4   : > { %v6065_v41 = vadd.f32 %v6064_v40, %v6063_v51  ;;  %v6193_v42 = vrot.slane %v6192_v60, 1  ;;  %v6077_v22 = vadd.f32 %v6076_v20, %v6075_v63  ;;  %v6205_v43 = vrot.slane %v6204_v23, 1 }
 0x3f5   : > { %v11917_v3 = vmul.f32 0.125, %v6059_v0  ;;  %v6188_v5 = vadd.f32 %v6187_v31, %v6186_v62  ;;  %v11919_v49 = vmul.f32 0.125, %v6071_v28  ;;  %v6200_v6 = vadd.f32 %v6199_v38, %v6198_v59  ;;  %v2772_v0 = vld [vmem:[%s11330_s1 + $0xe60] sm:$0xff] }
 0x3f6   : > { %v11921_v7 = vmul.f32 0.125, %v6065_v41  ;;  %v6194_v27 = vadd.f32 %v6193_v42, %v6192_v60  ;;  %5784 = vmatpush1.bf16.msra.mxu0 %v9493_v29  ;;  %v11928_v61 = vmul.f32 0.125, %v6077_v22  ;;  %v6206_v8 = vadd.f32 %v6205_v43, %v6204_v23  ;;  %5866 = vmatpush1.bf16.msra.mxu1 %v9495_v36  ;;  %v2764_v60 = vld [vmem:[%s11330_s1 + $0xe20] sm:$0xff]  ;;  %v2781_v42 = vld [vmem:[%s11330_s1 + $0xea8] sm:$0xff] }
 0x3f7   : > { %v6279_v30 = vmul.f32 0.125, %v6188_v5  ;;  %v6295_v37 = vmul.f32 %v11917_v3, %v11917_v3  ;;  %v12929_v10 = vcombine.high %v11817_v18, %v11820_v19  ;;  %v6281_v14 = vmul.f32 0.125, %v6200_v6  ;;  %v2780_v28 = vld [vmem:[%s11330_s1 + $0xea0] sm:$0xff]  ;;  %v2789_v5 = vld [vmem:[%s11330_s1 + $0xee8] sm:$0xff] }
 0x3f8   : > { %v6297_v57 = vmul.f32 %v11919_v49, %v11919_v49  ;;  %v6280_v11 = vmul.f32 0.125, %v6194_v27  ;;  %v6296_v29 = vmul.f32 %v11921_v7, %v11921_v7  ;;  %v12930_v56 = vcombine.high %v11831_v24, %v11834_v25  ;;  %v2788_v38 = vld [vmem:[%s11330_s1 + $0xee0] sm:$0xff] }
 0x3f9   : > { %5785 = vmatprep.subr.bf16.mxu0 %v12929_v10  ;;  %v6311_v12 = vsub.f32 %v6279_v30, %v6295_v37  ;;  %v6282_v17 = vmul.f32 0.125, %v6206_v8  ;;  %v6298_v36 = vmul.f32 %v11928_v61, %v11928_v61  ;;  %v12931_v52 = vcombine.low %v11817_v18, %v11820_v19 }
 0x3fa   : > { %5867 = vmatprep.subr.bf16.mxu1 %v12930_v56  ;;  %v6313_v16 = vsub.f32 %v6281_v14, %v6297_v57  ;;  %v6312_v50 = vsub.f32 %v6280_v11, %v6296_v29  ;;  %v9525_v21 = vcombine.low %v11837_v26, %v11848_v32  ;;  %v9527_v45 = vcombine.low %v11851_v33, %v11854_v34  ;;  %v2796_v57 = vld [vmem:[%s11330_s1 + $0xf20] sm:$0xff]  ;;  %v2797_v56 = vld [vmem:[%s11330_s1 + $0xf28] sm:$0xff] }
 0x3fb   : > { %5786 = vmatpush1.bf16.msra.mxu0 %v12931_v52  ;;  %v6334_v51 = vadd.f32 1e-05, %v6311_v12  ;;  %v12932_v48 = vlaneseq  ;;  %v6314_v62 = vsub.f32 %v6282_v17, %v6298_v36  ;;  %v12933_v63 = vcombine.low %v11831_v24, %v11834_v25  ;;  %v2765_v24 = vld [vmem:[%s11330_s1 + $0xe28] sm:$0xff]  ;;  %v2804_v11 = vld [vmem:[%s11330_s1 + $0xf60] sm:$0xff] }
 0x3fc   : > { %v12934_v18 = vcombine.high %v11837_v26, %v11848_v32  ;;  %v9542_v19 = vcombine.high %v2748_v9, %v2756_v44  ;;  %v6336_v15 = vadd.f32 1e-05, %v6313_v16  ;;  %v6335_v58 = vadd.f32 1e-05, %v6312_v50  ;;  %v2773_v25 = vld [vmem:[%s11330_s1 + $0xe68] sm:$0xff]  ;;  %v2812_v16 = vld [vmem:[%s11330_s1 + $0xfa0] sm:$0xff] }
 0x3fd   : > { %v11957_v53 = vshrl.u32 %v12932_v48, 7  ;;  %5868 = vmatpush1.bf16.msra.mxu1 %v12933_v63  ;;  %v12935_v59 = vcombine.high %v11851_v33, %v11854_v34  ;;  %v9544_v40 = vcombine.high %v2749_v4, %v2757_v13  ;;  %10805 = vrsqrt.f32 %v6334_v51  ;;  %v6327_v34 = vld [vmem:[%s11346_s24] ss:$2 sm:$0xff] }
 0x3fe   : > { %5787 = vmatprep.subr.bf16.mxu0 %v12934_v18  ;;  %v6337_v31 = vadd.f32 1e-05, %v6314_v62  ;;  %10807 = vrsqrt.f32 %v6336_v15  ;;  %v9541_v26 = vcombine.low %v2748_v9, %v2756_v44  ;;  %v9543_v32 = vcombine.low %v2749_v4, %v2757_v13  ;;  %v2805_v9 = vld [vmem:[%s11330_s1 + $0xf68] sm:$0xff]  ;;  %v2820_v50 = vld [vmem:[%s11330_s1 + $0xfe0] sm:$0xff] }
 0x3ff   : > { %5869 = vmatprep.subr.bf16.mxu1 %v12935_v59  ;;  %5788 = vmatpush1.bf16.msra.mxu0 %v9525_v21  ;;  %10809 = vrsqrt.f32 %v6335_v58  ;;  %v9558_v33 = vcombine.high %v2764_v60, %v2772_v0  ;;  %v11974_v20 = vsub.s32 0, %v11957_v53  ;;  %v9560_v23 = vcombine.high %v2765_v24, %v2773_v25  ;;  %v2813_v18 = vld [vmem:[%s11330_s1 + $0xfa8] sm:$0xff] }
 0x400   : > { %5789 = vmatprep.subr.bf16.mxu0 %v9542_v19  ;;  %10811 = vrsqrt.f32 %v6337_v31  ;;  %v11979_v41 = vsub.s32 2, %v11957_v53  ;;  %v11984_v22 = vsub.s32 1, %v11957_v53  ;;  %v9557_v43 = vcombine.low %v2764_v60, %v2772_v0  ;;  %v2821_v19 = vld [vmem:[%s11330_s1 + $0xfe8] sm:$0xff] }
 0x401   : > { %5870 = vmatpush1.bf16.msra.mxu1 %v9527_v45  ;;  %v11987_v6 = vsub.s32 3, %v11957_v53  ;;  %v9559_v27 = vcombine.low %v2765_v24, %v2773_v25  ;;  %v9574_v30 = vcombine.high %v2780_v28, %v2788_v38  ;;  %v6371_v37 = vrot.slane %v6327_v34, %v11974_v20 }
 0x402   : > { %5871 = vmatprep.subr.bf16.mxu1 %v9544_v40  ;;  %12936 = vst [vmem:[#allocation20_spill] sm:$0xff] %v11979_v41  ;;  %12937 = vst [vmem:[#allocation21_spill] sm:$0xff] %v11984_v22  ;;  %v11073_v8 = vmov 1966171168   ;;  %v9576_v14 = vcombine.high %v2781_v42, %v2789_v5  ;;  %v6379_v29 = vrot.slane %v6327_v34, %v11979_v41  ;;  %v6375_v44 = vrot.slane %v6327_v34, %v11984_v22 }
 0x403   : > { %5790 = vmatpush1.bf16.msra.mxu0 %v9541_v26  ;;  %12938 = vst [vmem:[#allocation22_spill] sm:$0xff] %v11987_v6  ;;  %v6501_v10 = vunpack.c.l.s4 %v11073_v8  ;;  %v9573_v12 = vcombine.low %v2780_v28, %v2788_v38  ;;  %v6383_v36 = vrot.slane %v6327_v34, %v11987_v6  ;;  %v9575_v4 = vcombine.low %v2781_v42, %v2789_v5  ;;  %v2327_v28 = vld [vmem:[%s11330_s1 + $0x78] sm:$0xff] }
 0x404   : > { %5791 = vmatprep.subr.bf16.mxu0 %v9558_v33  ;;  %v9590_v13 = vcombine.high %v2796_v57, %v2804_v11  ;;  %v9592_v51 = vcombine.high %v2797_v56, %v2805_v9  ;;  %v9589_v63 = vcombine.low %v2796_v57, %v2804_v11  ;;  %v9591_v40 = vcombine.low %v2797_v56, %v2805_v9  ;;  %v2326_v33 = vld [vmem:[%s11330_s1 + $0x70] sm:$0xff]  ;;  %v2335_v8 = vld [vmem:[%s11330_s1 + $0xb8] sm:$0xff] }
 0x405   : > { %5872 = vmatpush1.bf16.msra.mxu1 %v9543_v32  ;;  %v6502_v45 = vunpack.c.0.s8 %v6501_v10  ;;  %v9606_v60 = vcombine.high %v2812_v16, %v2820_v50  ;;  %v9608_v26 = vcombine.high %v2813_v18, %v2821_v19  ;;  %v2318_v32 = vld [vmem:[%s11330_s1 + $0x30] sm:$0xff]  ;;  %v9605_v38 = vcombine.low %v2812_v16, %v2820_v50  ;;  %v2343_v10 = vld [vmem:[%s11330_s1 + $0xf8] sm:$0xff] }
 0x406   : > { %5873 = vmatprep.subr.bf16.mxu1 %v9560_v23  ;;  %v2319_v23 = vld [vmem:[%s11330_s1 + $0x38] sm:$0xff]  ;;  %v9607_v5 = vcombine.low %v2813_v18, %v2821_v19  ;;  %v9132_v56 = vcombine.high %v2335_v8, %v2343_v10  ;;  %v2350_v9 = vld [vmem:[%s11330_s1 + $0x130] sm:$0xff] }
 0x407   : > { %5792 = vmatpush1.bf16.msra.mxu0 %v9557_v43  ;;  %v10806_v17 = vpop.eup %10805  ;;  %v9114_v43 = vcombine.high %v2318_v32, %v2326_v33  ;;  %v9115_v11 = vcombine.low %v2319_v23, %v2327_v28  ;;  %v2366_v50 = vld [vmem:[%s11330_s1 + $0x1b0] sm:$0xff] }
 0x408   : > { %5793 = vmatprep.subr.bf16.mxu0 %v9574_v30  ;;  %v10808_v52 = vpop.eup %10807  ;;  %v11999_v21 = vmul.f32 %v10806_v17, %v6371_v37  ;;  %v2342_v30 = vld [vmem:[%s11330_s1 + $0xf0] sm:$0xff]  ;;  %v2359_v17 = vld [vmem:[%s11330_s1 + $0x178] sm:$0xff] }
 0x409   : > { %5874 = vmatpush1.bf16.msra.mxu1 %v9559_v27  ;;  %v10810_v48 = vpop.eup %10809  ;;  %v6450_v62 = vmul.f32 %v10808_v52, %v6379_v29  ;;  %v2374_v52 = vld [vmem:[%s11330_s1 + $0x1f0] sm:$0xff] }
 0x40a   : > { %5875 = vmatprep.subr.bf16.mxu1 %v9576_v14  ;;  %v10812_v15 = vpop.eup %10811  ;;  %v6464_v58 = vmul.f32 %v11999_v21, %v11917_v3  ;;  %v12005_v59 = vmul.f32 %v10810_v48, %v6375_v44  ;;  %v12014_v3 = vsub.s32 %v6502_v45, %v11957_v53  ;;  %v9113_v14 = vcombine.low %v2318_v32, %v2326_v33  ;;  %v2358_v44 = vld [vmem:[%s11330_s1 + $0x170] sm:$0xff]  ;;  %v2367_v45 = vld [vmem:[%s11330_s1 + $0x1b8] sm:$0xff] }
 0x40b   : > { %5794 = vmatpush1.bf16.msra.mxu0 %v9573_v12  ;;  %v6466_v0 = vmul.f32 %v6450_v62, %v11919_v49  ;;  %v6609_v31 = vrot.slane %v6450_v62, %v11974_v20  ;;  %v12009_v24 = vmul.f32 %v10812_v15, %v6383_v36  ;;  %v2351_v12 = vld [vmem:[%s11330_s1 + $0x138] sm:$0xff]  ;;  %v9145_v48 = vcombine.low %v2350_v9, %v2358_v44  ;;  %v2382_v19 = vld [vmem:[%s11330_s1 + $0x230] sm:$0xff] }
 0x40c   : > { %5795 = vmatprep.subr.bf16.mxu0 %v9590_v13  ;;  %v6465_v25 = vmul.f32 %v12005_v59, %v11921_v7  ;;  %v9146_v13 = vcombine.high %v2350_v9, %v2358_v44  ;;  %v9148_v16 = vcombine.high %v2351_v12, %v2359_v17  ;;  %v9147_v62 = vcombine.low %v2351_v12, %v2359_v17  ;;  %v2390_v15 = vld [vmem:[%s11330_s1 + $0x270] sm:$0xff]  ;;  %v2399_v32 = vld [vmem:[%s11330_s1 + $0x2b8] sm:$0xff] }
 0x40d   : > { %5876 = vmatpush1.bf16.msra.mxu1 %v9575_v4  ;;  %v12019_v34 = vmul.f32 %v6609_v31, %v11873_v46  ;;  %v6467_v49 = vmul.f32 %v12009_v24, %v11928_v61  ;;  %v9116_v46 = vcombine.high %v2319_v23, %v2327_v28  ;;  %v2334_v61 = vld [vmem:[%s11330_s1 + $0xb0] sm:$0xff]  ;;  %v9131_v4 = vcombine.low %v2335_v8, %v2343_v10  ;;  %v2407_v33 = vld [vmem:[%s11330_s1 + $0x2f8] sm:$0xff] }
 0x40e   : > { %5877 = vmatprep.subr.bf16.mxu1 %v9592_v51  ;;  %v6496_v7 = vcombine.low %v6464_v58, %v6465_v25  ;;  %v9130_v29 = vcombine.high %v2334_v61, %v2342_v30  ;;  %v9129_v36 = vcombine.low %v2334_v61, %v2342_v30  ;;  %v2375_v51 = vld [vmem:[%s11330_s1 + $0x1f8] sm:$0xff]  ;;  %v2398_v25 = vld [vmem:[%s11330_s1 + $0x2b0] sm:$0xff]  ;;  %v9195_v61 = vcombine.low %v2399_v32, %v2407_v33 }
 0x40f   : > { %12939 = vst [vmem:[#allocation23_spill] sm:$0xff] %v12019_v34  ;;  %5796 = vmatpush1.bf16.msra.mxu0 %v9589_v63  ;;  %v6497_v42 = vcombine.low %v6466_v0, %v6467_v49  ;;  %v9162_v63 = vcombine.high %v2366_v50, %v2374_v52  ;;  %v9164_v18 = vcombine.high %v2367_v45, %v2375_v51  ;;  %v2383_v58 = vld [vmem:[%s11330_s1 + $0x238] sm:$0xff]  ;;  %v2430_v10 = vld [vmem:[%s11330_s1 + $0x3b0] sm:$0xff] }
 0x410   : > { %5797 = vmatprep.subr.bf16.mxu0 %v9606_v60  ;;  %v12026_v27 = vrot.slane %v6496_v7, %v12014_v3  ;;  %v9161_v60 = vcombine.low %v2366_v50, %v2374_v52  ;;  %v9178_v0 = vcombine.high %v2382_v19, %v2390_v15  ;;  %v9177_v49 = vcombine.low %v2382_v19, %v2390_v15  ;;  %v2446_v17 = vld [vmem:[%s11330_s1 + $0x430] sm:$0xff] }
 0x411   : > { %5878 = vmatpush1.bf16.msra.mxu1 %v9591_v40  ;;  %v12031_v37 = vrot.slane %v6497_v42, %v12014_v3  ;;  %v2391_v40 = vld [vmem:[%s11330_s1 + $0x278] sm:$0xff]  ;;  %v9196_v7 = vcombine.high %v2399_v32, %v2407_v33  ;;  %v2422_v42 = vld [vmem:[%s11330_s1 + $0x370] sm:$0xff] }
 0x412   : > { %5879 = vmatprep.subr.bf16.mxu1 %v9608_v26  ;;  %v9180_v31 = vcombine.high %v2383_v58, %v2391_v40  ;;  %v2406_v26 = vld [vmem:[%s11330_s1 + $0x2f0] sm:$0xff]  ;;  %v9179_v23 = vcombine.low %v2383_v58, %v2391_v40 }
 0x413   : > { %5798 = vmatpush1.bf16.msra.mxu0 %v9605_v38  ;;  %v9194_v28 = vcombine.high %v2398_v25, %v2406_v26  ;;  %v2414_v38 = vld [vmem:[%s11330_s1 + $0x330] sm:$0xff] }
 0x414   : > { %5890 = vmatprep.subr.bf16.mxu0 %v9114_v43  ;;  %v2423_v43 = vld [vmem:[%s11330_s1 + $0x378] sm:$0xff]  ;;  %v9210_v30 = vcombine.high %v2414_v38, %v2422_v42  ;;  %v2478_v40 = vld [vmem:[%s11330_s1 + $0x530] sm:$0xff] }
 0x415   : > { %5880 = vmatpush1.bf16.msra.mxu1 %v9607_v5  ;;  %v2415_v5 = vld [vmem:[%s11330_s1 + $0x338] sm:$0xff]  ;;  %v2494_v33 = vld [vmem:[%s11330_s1 + $0x5b0] sm:$0xff] }
 0x416   : > { %5972 = vmatprep.subr.bf16.mxu1 %v9116_v46  ;;  %5800 = vmatmul.mubr.bf16.vlgmr.msra.gmra.mrb[8].mxu0 %v11534_v2  ;;  %v9193_v46 = vcombine.low %v2398_v25, %v2406_v26  ;;  %v9212_v8 = vcombine.high %v2415_v5, %v2423_v43  ;;  %v9211_v9 = vcombine.low %v2415_v5, %v2423_v43  ;;  %v2510_v43 = vld [vmem:[%s11330_s1 + $0x630] sm:$0xff] }
 0x417   : > { %5891 = vmatpush1.bf16.msra.mxu0 %v9113_v14  ;;  %5922 = vmatprep.mubr.bf16.mxu0 %v11408_v35  ;;  %v2438_v14 = vld [vmem:[%s11330_s1 + $0x3f0] sm:$0xff] }
 0x418   : > { %5882 = vmatmul.mubr.bf16.vlgmr.msra.gmra.mrb[8].mxu1 %v11534_v2  ;;  %5892 = vmatprep.subr.bf16.mxu0 %v9130_v29  ;;  %v2439_v29 = vld [vmem:[%s11330_s1 + $0x3f8] sm:$0xff]  ;;  %v9226_v44 = vcombine.high %v2430_v10, %v2438_v14 }
 0x419   : > { %5973 = vmatpush1.bf16.msra.mxu1 %v9115_v11  ;;  %6004 = vmatprep.mubr.bf16.mxu1 %v11408_v35  ;;  %v9163_v35 = vcombine.low %v2367_v45, %v2375_v51  ;;  %v2431_v11 = vld [vmem:[%s11330_s1 + $0x3b8] sm:$0xff]  ;;  %v2462_v51 = vld [vmem:[%s11330_s1 + $0x4b0] sm:$0xff] }
 0x41a   : > { %5974 = vmatprep.subr.bf16.mxu1 %v9132_v56  ;;  %v9209_v56 = vcombine.low %v2414_v38, %v2422_v42  ;;  %v9228_v12 = vcombine.high %v2431_v11, %v2439_v29  ;;  %v9227_v50 = vcombine.low %v2431_v11, %v2439_v29  ;;  %v2526_v29 = vld [vmem:[%s11330_s1 + $0x6b0] sm:$0xff] }
 0x41b   : > { %5893 = vmatpush1.bf16.msra.mxu0 %v9129_v36  ;;  %v2454_v36 = vld [vmem:[%s11330_s1 + $0x470] sm:$0xff] }
 0x41c   : > { %5894 = vmatprep.subr.bf16.mxu0 %v9146_v13  ;;  %v2455_v13 = vld [vmem:[%s11330_s1 + $0x478] sm:$0xff]  ;;  %v9242_v52 = vcombine.high %v2446_v17, %v2454_v36 }
 0x41d   : > { %5975 = vmatpush1.bf16.msra.mxu1 %v9131_v4  ;;  %v2447_v4 = vld [vmem:[%s11330_s1 + $0x438] sm:$0xff] }
 0x41e   : > { %5976 = vmatprep.subr.bf16.mxu1 %v9148_v16  ;;  %v9225_v16 = vcombine.low %v2430_v10, %v2438_v14  ;;  %v9244_v45 = vcombine.high %v2447_v4, %v2455_v13  ;;  %v9243_v19 = vcombine.low %v2447_v4, %v2455_v13  ;;  %v2542_v13 = vld [vmem:[%s11330_s1 + $0x730] sm:$0xff] }
 0x41f   : > { %5895 = vmatpush1.bf16.msra.mxu0 %v9145_v48  ;;  %v2470_v48 = vld [vmem:[%s11330_s1 + $0x4f0] sm:$0xff] }
 0x420   : > { %5896 = vmatprep.subr.bf16.mxu0 %v9162_v63  ;;  %v2471_v63 = vld [vmem:[%s11330_s1 + $0x4f8] sm:$0xff]  ;;  %v9258_v15 = vcombine.high %v2462_v51, %v2470_v48 }
 0x421   : > { %5977 = vmatpush1.bf16.msra.mxu1 %v9147_v62  ;;  %v2463_v62 = vld [vmem:[%s11330_s1 + $0x4b8] sm:$0xff] }
 0x422   : > { %5978 = vmatprep.subr.bf16.mxu1 %v9164_v18  ;;  %v9241_v18 = vcombine.low %v2446_v17, %v2454_v36  ;;  %v9260_v58 = vcombine.high %v2463_v62, %v2471_v63  ;;  %v9259_v25 = vcombine.low %v2463_v62, %v2471_v63  ;;  %v2558_v63 = vld [vmem:[%s11330_s1 + $0x7b0] sm:$0xff] }
 0x423   : > { %5897 = vmatpush1.bf16.msra.mxu0 %v9161_v60  ;;  %v2486_v60 = vld [vmem:[%s11330_s1 + $0x570] sm:$0xff] }
 0x424   : > { %5898 = vmatprep.subr.bf16.mxu0 %v9178_v0  ;;  %v2487_v0 = vld [vmem:[%s11330_s1 + $0x578] sm:$0xff]  ;;  %v9274_v26 = vcombine.high %v2478_v40, %v2486_v60 }
 0x425   : > { %5979 = vmatpush1.bf16.msra.mxu1 %v9163_v35  ;;  %v2479_v35 = vld [vmem:[%s11330_s1 + $0x538] sm:$0xff] }
 0x426   : > { %5980 = vmatprep.subr.bf16.mxu1 %v9180_v31  ;;  %v9257_v31 = vcombine.low %v2462_v51, %v2470_v48  ;;  %v9276_v32 = vcombine.high %v2479_v35, %v2487_v0  ;;  %v9275_v38 = vcombine.low %v2479_v35, %v2487_v0  ;;  %v2574_v0 = vld [vmem:[%s11330_s1 + $0x830] sm:$0xff] }
 0x427   : > { %5899 = vmatpush1.bf16.msra.mxu0 %v9177_v49  ;;  %v2502_v49 = vld [vmem:[%s11330_s1 + $0x5f0] sm:$0xff] }
 0x428   : > { %5900 = vmatprep.subr.bf16.mxu0 %v9194_v28  ;;  %v2503_v28 = vld [vmem:[%s11330_s1 + $0x5f8] sm:$0xff]  ;;  %v9290_v42 = vcombine.high %v2494_v33, %v2502_v49 }
 0x429   : > { %5981 = vmatpush1.bf16.msra.mxu1 %v9179_v23  ;;  %v2495_v23 = vld [vmem:[%s11330_s1 + $0x5b8] sm:$0xff] }
 0x42a   : > { %5982 = vmatprep.subr.bf16.mxu1 %v9196_v7  ;;  %v9273_v7 = vcombine.low %v2478_v40, %v2486_v60  ;;  %v9292_v5 = vcombine.high %v2495_v23, %v2503_v28  ;;  %v9291_v10 = vcombine.low %v2495_v23, %v2503_v28  ;;  %v2590_v28 = vld [vmem:[%s11330_s1 + $0x8b0] sm:$0xff] }
 0x42b   : > { %5901 = vmatpush1.bf16.msra.mxu0 %v9193_v46  ;;  %v2518_v46 = vld [vmem:[%s11330_s1 + $0x670] sm:$0xff] }
 0x42c   : > { %5902 = vmatprep.subr.bf16.mxu0 %v9210_v30  ;;  %v2519_v30 = vld [vmem:[%s11330_s1 + $0x678] sm:$0xff]  ;;  %v9306_v14 = vcombine.high %v2510_v43, %v2518_v46 }
 0x42d   : > { %5983 = vmatpush1.bf16.msra.mxu1 %v9195_v61  ;;  %v2511_v61 = vld [vmem:[%s11330_s1 + $0x638] sm:$0xff] }
 0x42e   : > { %5984 = vmatprep.subr.bf16.mxu1 %v9212_v8  ;;  %v9289_v8 = vcombine.low %v2494_v33, %v2502_v49  ;;  %v9308_v11 = vcombine.high %v2511_v61, %v2519_v30  ;;  %v9307_v17 = vcombine.low %v2511_v61, %v2519_v30  ;;  %v2606_v30 = vld [vmem:[%s11330_s1 + $0x930] sm:$0xff] }
 0x42f   : > { %5903 = vmatpush1.bf16.msra.mxu0 %v9209_v56  ;;  %v2534_v56 = vld [vmem:[%s11330_s1 + $0x6f0] sm:$0xff] }
 0x430   : > { %5904 = vmatprep.subr.bf16.mxu0 %v9226_v44  ;;  %v2535_v44 = vld [vmem:[%s11330_s1 + $0x6f8] sm:$0xff]  ;;  %v9322_v36 = vcombine.high %v2526_v29, %v2534_v56 }
 0x431   : > { %5985 = vmatpush1.bf16.msra.mxu1 %v9211_v9  ;;  %v2527_v9 = vld [vmem:[%s11330_s1 + $0x6b8] sm:$0xff] }
 0x432   : > { %5986 = vmatprep.subr.bf16.mxu1 %v9228_v12  ;;  %v9305_v12 = vcombine.low %v2510_v43, %v2518_v46  ;;  %v9324_v4 = vcombine.high %v2527_v9, %v2535_v44  ;;  %v9323_v51 = vcombine.low %v2527_v9, %v2535_v44  ;;  %v2622_v44 = vld [vmem:[%s11330_s1 + $0x9b0] sm:$0xff] }
 0x433   : > { %5905 = vmatpush1.bf16.msra.mxu0 %v9225_v16  ;;  %v2550_v16 = vld [vmem:[%s11330_s1 + $0x770] sm:$0xff] }
 0x434   : > { %5906 = vmatprep.subr.bf16.mxu0 %v9242_v52  ;;  %v2551_v52 = vld [vmem:[%s11330_s1 + $0x778] sm:$0xff]  ;;  %v9338_v48 = vcombine.high %v2542_v13, %v2550_v16 }
 0x435   : > { %5987 = vmatpush1.bf16.msra.mxu1 %v9227_v50  ;;  %v2543_v50 = vld [vmem:[%s11330_s1 + $0x738] sm:$0xff] }
 0x436   : > { %5988 = vmatprep.subr.bf16.mxu1 %v9244_v45  ;;  %v9321_v45 = vcombine.low %v2526_v29, %v2534_v56  ;;  %v9340_v62 = vcombine.high %v2543_v50, %v2551_v52  ;;  %v9339_v40 = vcombine.low %v2543_v50, %v2551_v52  ;;  %v2638_v50 = vld [vmem:[%s11330_s1 + $0xa30] sm:$0xff] }
 0x437   : > { %5907 = vmatpush1.bf16.msra.mxu0 %v9241_v18  ;;  %v2566_v18 = vld [vmem:[%s11330_s1 + $0x7f0] sm:$0xff] }
 0x438   : > { %5908 = vmatprep.subr.bf16.mxu0 %v9258_v15  ;;  %v2567_v15 = vld [vmem:[%s11330_s1 + $0x7f8] sm:$0xff]  ;;  %v9354_v60 = vcombine.high %v2558_v63, %v2566_v18  ;;  %v2646_v52 = vld [vmem:[%s11330_s1 + $0xa70] sm:$0xff] }
 0x439   : > { %5989 = vmatpush1.bf16.msra.mxu1 %v9243_v19  ;;  %v2559_v19 = vld [vmem:[%s11330_s1 + $0x7b8] sm:$0xff] }
 0x43a   : > { %5990 = vmatprep.subr.bf16.mxu1 %v9260_v58  ;;  %v9337_v58 = vcombine.low %v2542_v13, %v2550_v16  ;;  %v9356_v35 = vcombine.high %v2559_v19, %v2567_v15  ;;  %v9355_v33 = vcombine.low %v2559_v19, %v2567_v15  ;;  %v12128_v19 = vld [vmem:[%s11330_s1 + $0xab8] sm:$0xff] }
 0x43b   : > { %5909 = vmatpush1.bf16.msra.mxu0 %v9257_v31  ;;  %v2582_v31 = vld [vmem:[%s11330_s1 + $0x870] sm:$0xff] }
 0x43c   : > { %5910 = vmatprep.subr.bf16.mxu0 %v9274_v26  ;;  %v2583_v26 = vld [vmem:[%s11330_s1 + $0x878] sm:$0xff]  ;;  %v9370_v49 = vcombine.high %v2574_v0, %v2582_v31 }
 0x43d   : > { %5991 = vmatpush1.bf16.msra.mxu1 %v9259_v25  ;;  %v2575_v25 = vld [vmem:[%s11330_s1 + $0x838] sm:$0xff] }
 0x43e   : > { %5992 = vmatprep.subr.bf16.mxu1 %v9276_v32  ;;  %v9353_v32 = vcombine.low %v2558_v63, %v2566_v18  ;;  %v9372_v23 = vcombine.high %v2575_v25, %v2583_v26  ;;  %v9371_v43 = vcombine.low %v2575_v25, %v2583_v26  ;;  %v12122_v63 = vld [vmem:[%s11330_s1 + $0xab0] sm:$0xff]  ;;  %v9433_v25 = vcombine.low %v2638_v50, %v2646_v52 }
 0x43f   : > { %5911 = vmatpush1.bf16.msra.mxu0 %v9273_v7  ;;  %v2598_v7 = vld [vmem:[%s11330_s1 + $0x8f0] sm:$0xff] }
 0x440   : > { %5912 = vmatprep.subr.bf16.mxu0 %v9290_v42  ;;  %v2599_v42 = vld [vmem:[%s11330_s1 + $0x8f8] sm:$0xff]  ;;  %v9386_v46 = vcombine.high %v2590_v28, %v2598_v7  ;;  %v12125_v18 = vld [vmem:[%s11330_s1 + $0xaf0] sm:$0xff] }
 0x441   : > { %5993 = vmatpush1.bf16.msra.mxu1 %v9275_v38  ;;  %v2591_v38 = vld [vmem:[%s11330_s1 + $0x8b8] sm:$0xff]  ;;  %v12149_v26 = vld [vmem:[%s11330_s1 + $0xbf0] sm:$0xff] }
 0x442   : > { %5994 = vmatprep.subr.bf16.mxu1 %v9292_v5  ;;  %v9369_v5 = vcombine.low %v2574_v0, %v2582_v31  ;;  %v9388_v61 = vcombine.high %v2591_v38, %v2599_v42  ;;  %v9387_v29 = vcombine.low %v2591_v38, %v2599_v42  ;;  %v12143_v0 = vld [vmem:[%s11330_s1 + $0xb78] sm:$0xff]  ;;  %v12146_v31 = vld [vmem:[%s11330_s1 + $0xbb0] sm:$0xff]  ;;  %v9449_v42 = vcombine.low %v12122_v63, %v12125_v18 }
 0x443   : > { %5913 = vmatpush1.bf16.msra.mxu0 %v9289_v8  ;;  %v2614_v8 = vld [vmem:[%s11330_s1 + $0x970] sm:$0xff]  ;;  %v12166_v38 = vld [vmem:[%s11330_s1 + $0xc38] sm:$0xff] }
 0x444   : > { %5914 = vmatprep.subr.bf16.mxu0 %v9306_v14  ;;  %v2615_v14 = vld [vmem:[%s11330_s1 + $0x978] sm:$0xff]  ;;  %v9402_v56 = vcombine.high %v2606_v30, %v2614_v8 }
 0x445   : > { %5995 = vmatpush1.bf16.msra.mxu1 %v9291_v10  ;;  %v2607_v10 = vld [vmem:[%s11330_s1 + $0x938] sm:$0xff] }
 0x446   : > { %5996 = vmatprep.subr.bf16.mxu1 %v9308_v11  ;;  %v9385_v11 = vcombine.low %v2590_v28, %v2598_v7  ;;  %v9404_v9 = vcombine.high %v2607_v10, %v2615_v14  ;;  %v12160_v28 = vld [vmem:[%s11330_s1 + $0xc30] sm:$0xff] }
 0x447   : > { %5915 = vmatpush1.bf16.msra.mxu0 %v9305_v12  ;;  %v2630_v12 = vld [vmem:[%s11330_s1 + $0x9f0] sm:$0xff] }
 0x448   : > { %5916 = vmatprep.subr.bf16.mxu0 %v9322_v36  ;;  %v2631_v36 = vld [vmem:[%s11330_s1 + $0x9f8] sm:$0xff]  ;;  %v9418_v13 = vcombine.high %v2622_v44, %v2630_v12  ;;  %v12163_v7 = vld [vmem:[%s11330_s1 + $0xc70] sm:$0xff] }
 0x449   : > { %5997 = vmatpush1.bf16.msra.mxu1 %v9307_v17  ;;  %v2623_v17 = vld [vmem:[%s11330_s1 + $0x9b8] sm:$0xff] }
 0x44a   : > { %5998 = vmatprep.subr.bf16.mxu1 %v9324_v4  ;;  %v9403_v4 = vcombine.low %v2607_v10, %v2615_v14  ;;  %v9420_v16 = vcombine.high %v2623_v17, %v2631_v36 }
 0x44b   : > { %5917 = vmatpush1.bf16.msra.mxu0 %v9321_v45  ;;  %v2639_v45 = vld [vmem:[%s11330_s1 + $0xa38] sm:$0xff] }
 0x44c   : > { %5918 = vmatprep.subr.bf16.mxu0 %v9338_v48  ;;  %v9419_v48 = vcombine.low %v2623_v17, %v2631_v36 }
 0x44d   : > { %5999 = vmatpush1.bf16.msra.mxu1 %v9323_v51  ;;  %v2647_v51 = vld [vmem:[%s11330_s1 + $0xa78] sm:$0xff] }
 0x44e   : > { %6000 = vmatprep.subr.bf16.mxu1 %v9340_v62  ;;  %v9434_v62 = vcombine.high %v2638_v50, %v2646_v52  ;;  %v9436_v15 = vcombine.high %v2639_v45, %v2647_v51 }
 0x44f   : > { %5919 = vmatpush1.bf16.msra.mxu0 %v9337_v58  ;;  %v12131_v58 = vld [vmem:[%s11330_s1 + $0xaf8] sm:$0xff] }
 0x450   : > { %5920 = vmatprep.subr.bf16.mxu0 %v9354_v60  ;;  %v12137_v60 = vld [vmem:[%s11330_s1 + $0xb70] sm:$0xff] }
 0x451   : > { %6001 = vmatpush1.bf16.msra.mxu1 %v9339_v40  ;;  %v12134_v40 = vld [vmem:[%s11330_s1 + $0xb30] sm:$0xff] }
 0x452   : > { %6002 = vmatprep.subr.bf16.mxu1 %v9356_v35  ;;  %v12140_v35 = vld [vmem:[%s11330_s1 + $0xb38] sm:$0xff]  ;;  %v9466_v10 = vcombine.high %v12134_v40, %v12137_v60 }
 0x453   : > { %5921 = vmatpush1.bf16.msra.mxu0 %v9353_v32  ;;  %v12152_v32 = vld [vmem:[%s11330_s1 + $0xbb8] sm:$0xff] }
 0x454   : > { %5931 = vmatprep.subr.bf16.mxu0 %v9370_v49  ;;  %v9435_v49 = vcombine.low %v2639_v45, %v2647_v51 }
 0x455   : > { %6003 = vmatpush1.bf16.msra.mxu1 %v9355_v33  ;;  %v12155_v33 = vld [vmem:[%s11330_s1 + $0xbf8] sm:$0xff] }
 0x456   : > { %6013 = vmatprep.subr.bf16.mxu1 %v9372_v23  ;;  %5923 = vmatmul.mubr.bf16.vlgmr.msra.gmra.mrb[12].mxu0 %v11454_v54  ;;  %v9450_v23 = vcombine.high %v12122_v63, %v12125_v18  ;;  %v9484_v36 = vcombine.high %v12152_v32, %v12155_v33 }
 0x457   : > { %5932 = vmatpush1.bf16.msra.mxu0 %v9369_v5  ;;  %5963 = vmatprep.mubr.bf16.mxu0 %v11466_v1  ;;  %v9451_v5 = vcombine.low %v12128_v19, %v12131_v58 }
 0x458   : > { %6005 = vmatmul.mubr.bf16.vlgmr.msra.gmra.mrb[12].mxu1 %v11454_v54  ;;  %5933 = vmatprep.subr.bf16.mxu0 %v9386_v46  ;;  %v9401_v54 = vcombine.low %v2606_v30, %v2614_v8  ;;  %v12180_v30 = vld [vmem:[%s11330_s1 + $0xcb0] sm:$0xff] }
 0x459   : > { %6014 = vmatpush1.bf16.msra.mxu1 %v9371_v43  ;;  %6045 = vmatprep.mubr.bf16.mxu1 %v11466_v1  ;;  %v9417_v1 = vcombine.low %v2622_v44, %v2630_v12  ;;  %v9452_v43 = vcombine.high %v12128_v19, %v12131_v58  ;;  %v12183_v8 = vld [vmem:[%s11330_s1 + $0xcf0] sm:$0xff]  ;;  %v9482_v12 = vcombine.high %v12146_v31, %v12149_v26 }
 0x45a   : > { %6015 = vmatprep.subr.bf16.mxu1 %v9388_v61  ;;  %v12177_v61 = vld [vmem:[%s11330_s1 + $0xc78] sm:$0xff]  ;;  %v12200_v44 = vld [vmem:[%s11330_s1 + $0xd30] sm:$0xff] }
 0x45b   : > { %5934 = vmatpush1.bf16.msra.mxu0 %v9385_v11  ;;  %v9468_v11 = vcombine.high %v12140_v35, %v12143_v0 }
 0x45c   : > { %5935 = vmatprep.subr.bf16.mxu0 %v9402_v56  ;;  %v12194_v56 = vld [vmem:[%s11330_s1 + $0xcb8] sm:$0xff] }
 0x45d   : > { %6016 = vmatpush1.bf16.msra.mxu1 %v9387_v29 }
 0x45e   : > { %6017 = vmatprep.subr.bf16.mxu1 %v9404_v9  ;;  %v12197_v9 = vld [vmem:[%s11330_s1 + $0xcf8] sm:$0xff] }
 0x45f   : > { %5936 = vmatpush1.bf16.msra.mxu0 %v9401_v54 }
 0x460   : > { %5937 = vmatprep.subr.bf16.mxu0 %v9418_v13  ;;  %v12214_v13 = vld [vmem:[%s11330_s1 + $0xd38] sm:$0xff] }
 0x461   : > { %6018 = vmatpush1.bf16.msra.mxu1 %v9403_v4  ;;  %v12211_v4 = vld [vmem:[%s11330_s1 + $0xd70] sm:$0xff] }
 0x462   : > { %6019 = vmatprep.subr.bf16.mxu1 %v9420_v16  ;;  %v12217_v16 = vld [vmem:[%s11330_s1 + $0xd78] sm:$0xff] }
 0x463   : > { %5938 = vmatpush1.bf16.msra.mxu0 %v9417_v1 }
 0x464   : > { %5939 = vmatprep.subr.bf16.mxu0 %v9434_v62 }
 0x465   : > { %6020 = vmatpush1.bf16.msra.mxu1 %v9419_v48 }
 0x466   : > { %6021 = vmatprep.subr.bf16.mxu1 %v9436_v15 }
 0x467   : > { %5940 = vmatpush1.bf16.msra.mxu0 %v9433_v25 }
 0x468   : > { %5941 = vmatprep.subr.bf16.mxu0 %v9450_v23  ;;  %v12225_v51 = vpop.f32.mrb[4].mxu0  ;;  %v12238_v15 = vpop.f32.mrb[4].mxu1 }
 0x469   : > { %6022 = vmatpush1.bf16.msra.mxu1 %v9435_v49  ;;  %v6078_v18 = vrot.slane %v12225_v51, 4  ;;  %v6171_v19 = vmul.f32 %v12225_v51, %v12225_v51  ;;  %v12240_v58 = vpop.f32.mrb[5].mxu0  ;;  %v6090_v23 = vrot.slane %v12238_v15, 4  ;;  %v12252_v1 = vpop.f32.mrb[5].mxu1 }
 0x46a   : > { %6023 = vmatprep.subr.bf16.mxu1 %v9452_v43  ;;  %v6173_v43 = vmul.f32 %v12238_v15, %v12238_v15  ;;  %v6084_v57 = vrot.slane %v12240_v58, 4  ;;  %v6172_v62 = vmul.f32 %v12240_v58, %v12240_v58  ;;  %v5641_v63 = vpop.f32.mrb[6].mxu0  ;;  %v6096_v52 = vrot.slane %v12252_v1, 4  ;;  %v5723_v54 = vpop.f32.mrb[6].mxu1 }
 0x46b   : > { %5942 = vmatpush1.bf16.msra.mxu0 %v9449_v42  ;;  %v6079_v48 = vadd.f32 %v6078_v18, %v12225_v51  ;;  %v6207_v25 = vrot.slane %v6171_v19, 4  ;;  %v6174_v49 = vmul.f32 %v12252_v1, %v12252_v1  ;;  %v5642_v45 = vpop.f32.mrb[7].mxu0  ;;  %v6091_v50 = vadd.f32 %v6090_v23, %v12238_v15  ;;  %v5724_v63 = vpop.f32.mrb[7].mxu1 }
 0x46c   : > { %5943 = vmatprep.subr.bf16.mxu0 %v9466_v10  ;;  %v6219_v17 = vrot.slane %v6173_v43, 4  ;;  %v6085_v29 = vadd.f32 %v6084_v57, %v12240_v58  ;;  %v6213_v14 = vrot.slane %v6172_v62, 4  ;;  %v6097_v46 = vadd.f32 %v6096_v52, %v12252_v1 }
 0x46d   : > { %6024 = vmatpush1.bf16.msra.mxu1 %v9451_v5  ;;  %v6080_v42 = vrot.slane %v6079_v48, 2  ;;  %v6208_v18 = vadd.f32 %v6207_v25, %v6171_v19  ;;  %v6225_v34 = vrot.slane %v6174_v49, 4  ;;  %v6092_v41 = vrot.slane %v6091_v50, 2 }
 0x46e   : > { %6025 = vmatprep.subr.bf16.mxu1 %v9468_v11  ;;  %v6220_v6 = vadd.f32 %v6219_v17, %v6173_v43  ;;  %v6086_v22 = vrot.slane %v6085_v29, 2  ;;  %v6214_v54 = vadd.f32 %v6213_v14, %v6172_v62  ;;  %v12940_v5 = vcombine.low %v12134_v40, %v12137_v60 }
 0x46f   : > { %v6081_v10 = vadd.f32 %v6080_v42, %v6079_v48  ;;  %v6209_v45 = vrot.slane %v6208_v18, 2  ;;  %v6098_v23 = vrot.slane %v6097_v46, 2  ;;  %v6226_v57 = vadd.f32 %v6225_v34, %v6174_v49 }
 0x470   : > { %5944 = vmatpush1.bf16.msra.mxu0 %v12940_v5  ;;  %v12941_v11 = vcombine.low %v12140_v35, %v12143_v0  ;;  %v6093_v19 = vadd.f32 %v6092_v41, %v6091_v50  ;;  %v6221_v52 = vrot.slane %v6220_v6, 2  ;;  %v6087_v25 = vadd.f32 %v6086_v22, %v6085_v29 }
 0x471   : > { %5945 = vmatprep.subr.bf16.mxu0 %v9482_v12  ;;  %v6215_v63 = vrot.slane %v6214_v54, 2  ;;  %v6082_v17 = vrot.slane %v6081_v10, 1  ;;  %v6210_v14 = vadd.f32 %v6209_v45, %v6208_v18  ;;  %v6099_v62 = vadd.f32 %v6098_v23, %v6097_v46 }
 0x472   : > { %6026 = vmatpush1.bf16.msra.mxu1 %v12941_v11  ;;  %v6227_v43 = vrot.slane %v6226_v57, 2  ;;  %v6094_v40 = vrot.slane %v6093_v19, 1  ;;  %v6222_v60 = vadd.f32 %v6221_v52, %v6220_v6  ;;  %v6088_v48 = vrot.slane %v6087_v25, 1 }
 0x473   : > { %6027 = vmatprep.subr.bf16.mxu1 %v9484_v36  ;;  %v6216_v42 = vadd.f32 %v6215_v63, %v6214_v54  ;;  %v12942_v34 = vcombine.low %v12146_v31, %v12149_v26  ;;  %v6083_v35 = vadd.f32 %v6082_v17, %v6081_v10  ;;  %v6211_v0 = vrot.slane %v6210_v14, 1 }
 0x474   : > { %v6100_v12 = vrot.slane %v6099_v62, 1  ;;  %v6228_v41 = vadd.f32 %v6227_v43, %v6226_v57  ;;  %v12943_v22 = vcombine.low %v12152_v32, %v12155_v33  ;;  %v12944_v46 = vcombine.high %v12160_v28, %v12163_v7  ;;  %v2758_v43 = vld [vmem:[%s11330_s1 + $0xdf0] sm:$0xff] }
 0x475   : > { %5946 = vmatpush1.bf16.msra.mxu0 %v12942_v34  ;;  %v6095_v29 = vadd.f32 %v6094_v40, %v6093_v19  ;;  %v6223_v6 = vrot.slane %v6222_v60, 1  ;;  %v6089_v36 = vadd.f32 %v6088_v48, %v6087_v25  ;;  %v6217_v50 = vrot.slane %v6216_v42, 1  ;;  %v2759_v48 = vld [vmem:[%s11330_s1 + $0xdf8] sm:$0xff] }
 0x476   : > { %6028 = vmatpush1.bf16.msra.mxu1 %v12943_v22  ;;  %5947 = vmatprep.subr.bf16.mxu0 %v12944_v46  ;;  %v12945_v31 = vcombine.high %v12166_v38, %v12177_v61  ;;  %v12279_v26 = vmul.f32 0.125, %v6083_v35  ;;  %v6212_v49 = vadd.f32 %v6211_v0, %v6210_v14  ;;  %v6101_v18 = vadd.f32 %v6100_v12, %v6099_v62  ;;  %v2750_v62 = vld [vmem:[%s11330_s1 + $0xdb0] sm:$0xff] }
 0x477   : > { %v6229_v54 = vrot.slane %v6228_v41, 1  ;;  %v12281_v5 = vmul.f32 0.125, %v6095_v29  ;;  %v6224_v32 = vadd.f32 %v6223_v6, %v6222_v60  ;;  %v12283_v33 = vmul.f32 0.125, %v6089_v36  ;;  %v2751_v60 = vld [vmem:[%s11330_s1 + $0xdb8] sm:$0xff] }
 0x478   : > { %6029 = vmatprep.subr.bf16.mxu1 %v12945_v31  ;;  %v6218_v10 = vadd.f32 %v6217_v50, %v6216_v42  ;;  %v12946_v45 = vcombine.low %v12160_v28, %v12163_v7  ;;  %v6283_v23 = vmul.f32 0.125, %v6212_v49  ;;  %v6299_v57 = vmul.f32 %v12279_v26, %v12279_v26  ;;  %v2766_v31 = vld [vmem:[%s11330_s1 + $0xe30] sm:$0xff] }
 0x479   : > { %v12290_v11 = vmul.f32 0.125, %v6101_v18  ;;  %v6230_v19 = vadd.f32 %v6229_v54, %v6228_v41  ;;  %v12947_v52 = vcombine.low %v12166_v38, %v12177_v61  ;;  %v12948_v25 = vcombine.high %v12180_v30, %v12183_v8  ;;  %v2774_v49 = vld [vmem:[%s11330_s1 + $0xe70] sm:$0xff] }
 0x47a   : > { %5948 = vmatpush1.bf16.msra.mxu0 %v12946_v45  ;;  %v6285_v63 = vmul.f32 0.125, %v6224_v32  ;;  %v6301_v28 = vmul.f32 %v12281_v5, %v12281_v5  ;;  %v6284_v7 = vmul.f32 0.125, %v6218_v10  ;;  %v6300_v17 = vmul.f32 %v12283_v33, %v12283_v33  ;;  %v2782_v32 = vld [vmem:[%s11330_s1 + $0xeb0] sm:$0xff] }
 0x47b   : > { %6030 = vmatpush1.bf16.msra.mxu1 %v12947_v52  ;;  %5949 = vmatprep.subr.bf16.mxu0 %v12948_v25  ;;  %v12949_v14 = vcombine.high %v12194_v56, %v12197_v9  ;;  %v6315_v38 = vsub.f32 %v6283_v23, %v6299_v57  ;;  %v6286_v61 = vmul.f32 0.125, %v6230_v19  ;;  %v6302_v40 = vmul.f32 %v12290_v11, %v12290_v11  ;;  %v2790_v10 = vld [vmem:[%s11330_s1 + $0xef0] sm:$0xff]  ;;  %v2783_v23 = vld [vmem:[%s11330_s1 + $0xeb8] sm:$0xff] }
 0x47c   : > { %v6317_v42 = vsub.f32 %v6285_v63, %v6301_v28  ;;  %v6316_v34 = vsub.f32 %v6284_v7, %v6300_v17  ;;  %v12950_v35 = vcombine.low %v12180_v30, %v12183_v8  ;;  %v9529_v0 = vcombine.low %v12200_v44, %v12211_v4  ;;  %v2791_v57 = vld [vmem:[%s11330_s1 + $0xef8] sm:$0xff] }
 0x47d   : > { %6031 = vmatprep.subr.bf16.mxu1 %v12949_v14  ;;  %v6338_v12 = vadd.f32 1e-05, %v6315_v38  ;;  %v6318_v41 = vsub.f32 %v6286_v61, %v6302_v40  ;;  %v12951_v22 = vcombine.low %v12194_v56, %v12197_v9  ;;  %v12952_v46 = vcombine.high %v12200_v44, %v12211_v4  ;;  %v2767_v9 = vld [vmem:[%s11330_s1 + $0xe38] sm:$0xff] }
 0x47e   : > { %5950 = vmatpush1.bf16.msra.mxu0 %v12950_v35  ;;  %v9531_v29 = vcombine.low %v12214_v13, %v12217_v16  ;;  %v9546_v30 = vcombine.high %v2750_v62, %v2758_v43  ;;  %v6340_v8 = vadd.f32 1e-05, %v6317_v42  ;;  %v6339_v6 = vadd.f32 1e-05, %v6316_v34  ;;  %v2775_v44 = vld [vmem:[%s11330_s1 + $0xe78] sm:$0xff] }
 0x47f   : > { %6032 = vmatpush1.bf16.msra.mxu1 %v12951_v22  ;;  %5951 = vmatprep.subr.bf16.mxu0 %v12952_v46  ;;  %v12953_v36 = vcombine.high %v12214_v13, %v12217_v16  ;;  %v9548_v50 = vcombine.high %v2751_v60, %v2759_v48  ;;  %10813 = vrsqrt.f32 %v6338_v12  ;;  %v6341_v56 = vadd.f32 1e-05, %v6318_v41  ;;  %v10837_v7 = vld [vmem:[%s11346_s24] ss:$2 sm:$0xff]  ;;  %v2822_v12 = vld [vmem:[%s11330_s1 + $0xff0] sm:$0xff] }
 0x480   : > { %10815 = vrsqrt.f32 %v6340_v8  ;;  %v9545_v4 = vcombine.low %v2750_v62, %v2758_v43  ;;  %v9547_v18 = vcombine.low %v2751_v60, %v2759_v48  ;;  %v9562_v13 = vcombine.high %v2766_v31, %v2774_v49  ;;  %v2798_v62 = vld [vmem:[%s11330_s1 + $0xf30] sm:$0xff]  ;;  %v2799_v61 = vld [vmem:[%s11330_s1 + $0xf38] sm:$0xff] }
 0x481   : > { %6033 = vmatprep.subr.bf16.mxu1 %v12953_v36  ;;  %10817 = vrsqrt.f32 %v6339_v6  ;;  %v12332_v16 = vsub.s32 4, %v11957_v53  ;;  %v9564_v54 = vcombine.high %v2767_v9, %v2775_v44  ;;  %v12337_v45 = vsub.s32 6, %v11957_v53  ;;  %v2806_v43 = vld [vmem:[%s11330_s1 + $0xf70] sm:$0xff]  ;;  %v2807_v40 = vld [vmem:[%s11330_s1 + $0xf78] sm:$0xff] }
 0x482   : > { %5952 = vmatpush1.bf16.msra.mxu0 %v9529_v0  ;;  %10819 = vrsqrt.f32 %v6341_v56  ;;  %v12342_v19 = vsub.s32 5, %v11957_v53  ;;  %v9561_v52 = vcombine.low %v2766_v31, %v2774_v49  ;;  %v12345_v25 = vsub.s32 7, %v11957_v53  ;;  %v2814_v0 = vld [vmem:[%s11330_s1 + $0xfb0] sm:$0xff]  ;;  %v2815_v36 = vld [vmem:[%s11330_s1 + $0xfb8] sm:$0xff] }
 0x483   : > { %6034 = vmatpush1.bf16.msra.mxu1 %v9531_v29  ;;  %5953 = vmatprep.subr.bf16.mxu0 %v9546_v30  ;;  %v9563_v63 = vcombine.low %v2767_v9, %v2775_v44  ;;  %v9578_v28 = vcombine.high %v2782_v32, %v2790_v10  ;;  %v6387_v17 = vrot.slane %v10837_v7, %v12332_v16 }
 0x484   : > { %6035 = vmatprep.subr.bf16.mxu1 %v9548_v50  ;;  %v9580_v14 = vcombine.high %v2783_v23, %v2791_v57  ;;  %v6395_v38 = vrot.slane %v10837_v7, %v12337_v45  ;;  %v6391_v53 = vrot.slane %v10837_v7, %v12342_v19  ;;  %v9577_v60 = vcombine.low %v2782_v32, %v2790_v10  ;;  %v2823_v50 = vld [vmem:[%s11330_s1 + $0xff8] sm:$0xff] }
 0x485   : > { %v6399_v42 = vrot.slane %v10837_v7, %v12345_v25  ;;  %v9579_v34 = vcombine.low %v2783_v23, %v2791_v57  ;;  %v9594_v35 = vcombine.high %v2798_v62, %v2806_v43  ;;  %v9596_v46 = vcombine.high %v2799_v61, %v2807_v40  ;;  %v10423_v7 = vld [vmem:[%s11336_s3 + $0x4] ss:$8 sps:$4 sm:$0xff]  }
 0x486   : > { %5954 = vmatpush1.bf16.msra.mxu0 %v9545_v4  ;;  %v9593_v8 = vcombine.low %v2798_v62, %v2806_v43  ;;  %v9595_v6 = vcombine.low %v2799_v61, %v2807_v40  ;;  %v9610_v44 = vcombine.high %v2814_v0, %v2822_v12  ;;  %v9612_v10 = vcombine.high %v2815_v36, %v2823_v50  ;;  %v10424_v43 = vld [vmem:[%s11336_s3 + $0x100] ss:$8 sps:$4 sm:$0xff]  }
 0x487   : > { %6036 = vmatpush1.bf16.msra.mxu1 %v9547_v18  ;;  %5955 = vmatprep.subr.bf16.mxu0 %v9562_v13  ;;  %v12954_v61 = vcombine.low %v12026_v27, %v12031_v37  ;;  %v10427_v27 = vld [vmem:[%s11336_s3 + $0x10] ss:$8 sps:$4 sm:$0xff]  }
 0x488   : > { %6037 = vmatprep.subr.bf16.mxu1 %v9564_v54 }
 0x489   : > { %v10814_v48 = vpop.eup %10813  ;;  %v6536_v40 = vrot.slane %v12954_v61, %v12014_v3  ;;  %v10460_v61 = vld [vmem:[%s11336_s3 + $0x160] ss:$8 sps:$4 sm:$0xff]  }
 0x48a   : > { %5956 = vmatpush1.bf16.msra.mxu0 %v9561_v52  ;;  %v10816_v41 = vpop.eup %10815  ;;  %v6452_v22 = vmul.f32 %v10814_v48, %v6387_v17  ;;  %v10426_v17 = vld [vmem:[%s11336_s3 + $0x104] ss:$8 sps:$4 sm:$0xff]   ;;  %v6605_v48 = vrot.slane %v12005_v59, %v11974_v20 }
 0x48b   : > { %6038 = vmatpush1.bf16.msra.mxu1 %v9563_v63  ;;  %5957 = vmatprep.subr.bf16.mxu0 %v9578_v28  ;;  %v10818_v29 = vpop.eup %10817  ;;  %v6454_v30 = vmul.f32 %v10816_v41, %v6395_v38  ;;  %v10432_v38 = vld [vmem:[%s11336_s3 + $0x114] ss:$8 sps:$4 sm:$0xff]  }
 0x48c   : > { %6039 = vmatprep.subr.bf16.mxu1 %v9580_v14  ;;  %v10820_v31 = vpop.eup %10819  ;;  %v6468_v49 = vmul.f32 %v6452_v22, %v12279_v26  ;;  %v6617_v56 = vrot.slane %v6452_v22, %v11974_v20  ;;  %v6453_v9 = vmul.f32 %v10818_v29, %v6391_v53  ;;  %v10436_v22 = vld [vmem:[%s11336_s3 + $0x120] ss:$8 sps:$4 sm:$0xff]  }
 0x48d   : > { %v6470_v4 = vmul.f32 %v6454_v30, %v12281_v5  ;;  %v6625_v18 = vrot.slane %v6454_v30, %v11974_v20  ;;  %v6455_v13 = vmul.f32 %v10820_v31, %v6399_v42  ;;  %v6613_v42 = vrot.slane %v12009_v24, %v11974_v20  ;;  %v12955_v29 = vld [vmem:[#allocation21_spill] sm:$0xff] }
 0x48e   : > { %5958 = vmatpush1.bf16.msra.mxu0 %v9577_v60  ;;  %v12365_v54 = vmul.f32 %v6617_v56, %v12225_v51  ;;  %v6469_v32 = vmul.f32 %v6453_v9, %v12283_v33  ;;  %v6621_v26 = vrot.slane %v6453_v9, %v11974_v20  ;;  %v9609_v33 = vcombine.low %v2814_v0, %v2822_v12  ;;  %v10435_v0 = vld [vmem:[%s11336_s3 + $0x24] ss:$8 sps:$4 sm:$0xff]  }
 0x48f   : > { %6040 = vmatpush1.bf16.msra.mxu1 %v9579_v34  ;;  %5959 = vmatprep.subr.bf16.mxu0 %v9594_v35  ;;  %v12370_v23 = vmul.f32 %v6625_v18, %v12238_v15  ;;  %v6471_v5 = vmul.f32 %v6455_v13, %v12290_v11  ;;  %v6629_v57 = vrot.slane %v6455_v13, %v11974_v20  ;;  %v9614_v34 = vld [vmem:[%s11346_s24 + $0x1] ss:$2 sm:$0xff]  ;;  %v10430_v35 = vld [vmem:[%s11336_s3 + $0x110] ss:$8 sps:$4 sm:$0xff]  }
 0x490   : > { %6041 = vmatprep.subr.bf16.mxu1 %v9596_v46  ;;  %v6498_v52 = vcombine.low %v6468_v49, %v6469_v32  ;;  %v12375_v51 = vmul.f32 %v6621_v26, %v12240_v58  ;;  %v9611_v15 = vcombine.low %v2815_v36, %v2823_v50  ;;  %v10421_v58 = vld [vmem:[%s11336_s3] ss:$8 sps:$4 sm:$0xff]   ;;  %v6601_v60 = vrot.slane %v11999_v21, %v11974_v20  ;;  %v10438_v21 = vld [vmem:[%s11336_s3 + $0x124] ss:$8 sps:$4 sm:$0xff]   ;;  %v10441_v46 = vld [vmem:[%s11336_s3 + $0x34] ss:$8 sps:$4 sm:$0xff]  }
 0x491   : > { %v6499_v63 = vcombine.low %v6470_v4, %v6471_v5  ;;  %v6669_v28 = vmul.f32 %v6629_v57, %v12252_v1  ;;  %v10429_v1 = vld [vmem:[%s11336_s3 + $0x14] ss:$8 sps:$4 sm:$0xff]   ;;  %v6663_v24 = vmul.f32 %v6605_v48, %v11875_v47  ;;  %v6665_v41 = vmul.f32 %v6613_v42, %v11887_v55  ;;  %v10439_v18 = vld [vmem:[%s11336_s3 + $0x30] ss:$8 sps:$4 sm:$0xff]   ;;  %v10474_v42 = vld [vmem:[%s11336_s3 + $0x184] ss:$8 sps:$4 sm:$0xff]  }
 0x492   : > { %5960 = vmatpush1.bf16.msra.mxu0 %v9593_v8  ;;  %v6520_v11 = vrot.slane %v6498_v52, %v12014_v3  ;;  %v6662_v12 = vmul.f32 %v6601_v60, %v11862_v39  ;;  %v12956_v8 = vld [vmem:[#allocation22_spill] sm:$0xff]  ;;  %v10444_v50 = vld [vmem:[%s11336_s3 + $0x134] ss:$8 sps:$4 sm:$0xff]   ;;  %v12958_v13 = vld [vmem:[#allocation23_spill] sm:$0xff] }
 0x493   : > { %6042 = vmatpush1.bf16.msra.mxu1 %v9595_v6  ;;  %5961 = vmatprep.subr.bf16.mxu0 %v9610_v44  ;;  %v6527_v14 = vrot.slane %v6499_v63, %v12014_v3  ;;  %v12957_v39 = vld [vmem:[#allocation20_spill] sm:$0xff]  ;;  %v10471_v60 = vld [vmem:[%s11336_s3 + $0x84] ss:$8 sps:$4 sm:$0xff]  }
 0x494   : > { %6043 = vmatprep.subr.bf16.mxu1 %v9612_v10  ;;  %v10442_v63 = vld [vmem:[%s11336_s3 + $0x130] ss:$8 sps:$4 sm:$0xff]  }
 0x495   : > { %v6529_v62 = vcombine.low %v6520_v11, %v6527_v14  ;;  %v10453_v11 = vld [vmem:[%s11336_s3 + $0x54] ss:$8 sps:$4 sm:$0xff]   ;;  %v10451_v14 = vld [vmem:[%s11336_s3 + $0x50] ss:$8 sps:$4 sm:$0xff]  }
 0x496   : > { %5962 = vmatpush1.bf16.msra.mxu0 %v9609_v33  ;;  %v10466_v48 = vld [vmem:[%s11336_s3 + $0x170] ss:$8 sps:$4 sm:$0xff]  }
 0x497   : > { %6044 = vmatpush1.bf16.msra.mxu1 %v9611_v15  ;;  %8346 = vmatprep.subr.bf16.mxu0 %v10423_v7  ;;  %v6543_v53 = vrot.slane %v6529_v62, %v12014_v3  ;;  %v10450_v7 = vld [vmem:[%s11336_s3 + $0x144] ss:$8 sps:$4 sm:$0xff]   ;;  %v10454_v62 = vld [vmem:[%s11336_s3 + $0x150] ss:$8 sps:$4 sm:$0xff]  }
 0x498   : > { %8387 = vmatprep.subr.bf16.mxu1 %v10426_v17  ;;  %v10456_v17 = vld [vmem:[%s11336_s3 + $0x154] ss:$8 sps:$4 sm:$0xff]  }
 0x499   : > { %5964 = vmatmul.mubr.bf16.vlgmr.msra.gmra.mrb[12].mxu0 %v11534_v2  ;;  %v6544_v37 = vcombine.low %v6536_v40, %v6543_v53  ;;  %v10468_v40 = vld [vmem:[%s11336_s3 + $0x174] ss:$8 sps:$4 sm:$0xff]   ;;  %v10463_v53 = vld [vmem:[%s11336_s3 + $0x70] ss:$8 sps:$4 sm:$0xff]  }
 0x49a   : > { %6046 = vmatmul.mubr.bf16.vlgmr.msra.gmra.mrb[12].mxu1 %v11534_v2  ;;  %8347 = vmatpush1.bf16.msra.mxu0 %v10421_v58  ;;  %v10433_v2 = vld [vmem:[%s11336_s3 + $0x20] ss:$8 sps:$4 sm:$0xff]   ;;  %v10459_v58 = vld [vmem:[%s11336_s3 + $0x64] ss:$8 sps:$4 sm:$0xff]  }
 0x49b   : > { %8388 = vmatpush1.bf16.msra.mxu1 %v10424_v43  ;;  %8348 = vmatprep.subr.bf16.mxu0 %v10429_v1  ;;  %v6596_v59 = vsub.f32 %v9614_v34, %v6544_v37  ;;  %v10462_v43 = vld [vmem:[%s11336_s3 + $0x164] ss:$8 sps:$4 sm:$0xff]   ;;  %v10457_v1 = vld [vmem:[%s11336_s3 + $0x60] ss:$8 sps:$4 sm:$0xff]  }
 0x49c   : > { %8389 = vmatprep.subr.bf16.mxu1 %v10432_v38  ;;  %v10465_v38 = vld [vmem:[%s11336_s3 + $0x74] ss:$8 sps:$4 sm:$0xff]   ;;  %v10469_v34 = vld [vmem:[%s11336_s3 + $0x80] ss:$8 sps:$4 sm:$0xff]  }
 0x49d   : > { %v6687_v30 = vrot.slane %v6596_v59, %v12955_v29  ;;  %v6695_v6 = vrot.slane %v6596_v59, %v12956_v8  ;;  %v6683_v36 = vrot.slane %v6596_v59, %v11974_v20  ;;  %v6691_v31 = vrot.slane %v6596_v59, %v12957_v39  ;;  %v10472_v37 = vld [vmem:[%s11336_s3 + $0x180] ss:$8 sps:$4 sm:$0xff]  }
 0x49e   : > { %8349 = vmatpush1.bf16.msra.mxu0 %v10427_v27  ;;  %v6703_v47 = vrot.slane %v6596_v59, %v12342_v19  ;;  %v6711_v55 = vrot.slane %v6596_v59, %v12345_v25  ;;  %v6699_v49 = vrot.slane %v6596_v59, %v12332_v16  ;;  %v6707_v4 = vrot.slane %v6596_v59, %v12337_v45  ;;  %v10477_v27 = vld [vmem:[%s11336_s3 + $0x94] ss:$8 sps:$4 sm:$0xff]   ;;  %v10478_v59 = vld [vmem:[%s11336_s3 + $0x190] ss:$8 sps:$4 sm:$0xff]  }
 0x49f   : > { %8390 = vmatpush1.bf16.msra.mxu1 %v10430_v35  ;;  %8350 = vmatprep.subr.bf16.mxu0 %v10435_v0  ;;  %v6761_v56 = vadd.f32 %v6687_v30, %v6663_v24  ;;  %v6763_v9 = vadd.f32 %v6695_v6, %v6665_v41  ;;  %v12418_v44 = vadd.f32 %v6683_v36, %v6662_v12  ;;  %v10480_v35 = vld [vmem:[%s11336_s3 + $0x194] ss:$8 sps:$4 sm:$0xff]   ;;  %v10475_v0 = vld [vmem:[%s11336_s3 + $0x90] ss:$8 sps:$4 sm:$0xff]   ;;  %v10486_v12 = vld [vmem:[%s11336_s3 + $0x1a4] ss:$8 sps:$4 sm:$0xff]  }
 0x4a0   : > { %8391 = vmatprep.subr.bf16.mxu1 %v10438_v21  ;;  %v12423_v32 = vadd.f32 %v6691_v31, %v12958_v13  ;;  %v12426_v26 = vadd.f32 %v6703_v47, %v12375_v51  ;;  %v12428_v10 = vadd.f32 %v6711_v55, %v6669_v28  ;;  %v12431_v5 = vadd.f32 %v6699_v49, %v12365_v54  ;;  %v10447_v51 = vld [vmem:[%s11336_s3 + $0x44] ss:$8 sps:$4 sm:$0xff]   ;;  %v10445_v54 = vld [vmem:[%s11336_s3 + $0x40] ss:$8 sps:$4 sm:$0xff]   ;;  %v10489_v41 = vld [vmem:[%s11336_s3 + $0xb4] ss:$8 sps:$4 sm:$0xff]  }
 0x4a1   : > { %v6777_v57 = vmax.f32 %v6761_v56, 0.0  ;;  %v6779_v52 = vmax.f32 %v6763_v9, 0.0  ;;  %v12434_v33 = vadd.f32 %v6707_v4, %v12370_v23  ;;  %v10448_v23 = vld [vmem:[%s11336_s3 + $0x140] ss:$8 sps:$4 sm:$0xff]   ;;  %v10483_v21 = vld [vmem:[%s11336_s3 + $0xa4] ss:$8 sps:$4 sm:$0xff]  }
 0x4a2   : > { %8351 = vmatpush1.bf16.msra.mxu0 %v10433_v2  ;;  %v10481_v24 = vld [vmem:[%s11336_s3 + $0xa0] ss:$8 sps:$4 sm:$0xff]   ;;  %v10495_v30 = vld [vmem:[%s11336_s3 + $0xc4] ss:$8 sps:$4 sm:$0xff]   ;;  %v10490_v6 = vld [vmem:[%s11336_s3 + $0x1b0] ss:$8 sps:$4 sm:$0xff]  }
 0x4a3   : > { %8392 = vmatpush1.bf16.msra.mxu1 %v10436_v22  ;;  %8352 = vmatprep.subr.bf16.mxu0 %v10441_v46  ;;  %v6795_v15 = vpack.c.bf16 %v6777_v57, %v6777_v57  ;;  %v6797_v28 = vpack.c.bf16 %v6779_v52, %v6779_v52  ;;  %v10484_v2 = vld [vmem:[%s11336_s3 + $0x1a0] ss:$8 sps:$4 sm:$0xff]   ;;  %v10492_v22 = vld [vmem:[%s11336_s3 + $0x1b4] ss:$8 sps:$4 sm:$0xff]   ;;  %v10487_v46 = vld [vmem:[%s11336_s3 + $0xb0] ss:$8 sps:$4 sm:$0xff]  }
 0x4a4   : > { %8393 = vmatprep.subr.bf16.mxu1 %v10444_v50  ;;  %v10498_v36 = vld [vmem:[%s11336_s3 + $0x1c4] ss:$8 sps:$4 sm:$0xff]   ;;  %v10493_v50 = vld [vmem:[%s11336_s3 + $0xc0] ss:$8 sps:$4 sm:$0xff]   ;;  %v10501_v31 = vld [vmem:[%s11336_s3 + $0xd4] ss:$8 sps:$4 sm:$0xff]  }
 0x4a5   : > { %8378 = vmatprep.mubr.bf16.mxu0 %v6795_v15  ;;  %8419 = vmatprep.mubr.bf16.mxu1 %v6797_v28  ;;  %v10496_v47 = vld [vmem:[%s11336_s3 + $0x1c0] ss:$8 sps:$4 sm:$0xff]   ;;  %v10504_v55 = vld [vmem:[%s11336_s3 + $0x1d4] ss:$8 sps:$4 sm:$0xff]   ;;  %v10499_v49 = vld [vmem:[%s11336_s3 + $0xd0] ss:$8 sps:$4 sm:$0xff]  }
 0x4a6   : > { %8353 = vmatpush1.bf16.msra.mxu0 %v10439_v18  ;;  %v10507_v56 = vld [vmem:[%s11336_s3 + $0xe4] ss:$8 sps:$4 sm:$0xff]   ;;  %v10502_v9 = vld [vmem:[%s11336_s3 + $0x1d0] ss:$8 sps:$4 sm:$0xff]   ;;  %v10505_v18 = vld [vmem:[%s11336_s3 + $0xe0] ss:$8 sps:$4 sm:$0xff]  }
 0x4a7   : > { %8394 = vmatpush1.bf16.msra.mxu1 %v10442_v63  ;;  %8354 = vmatprep.subr.bf16.mxu0 %v10447_v51  ;;  %v10510_v4 = vld [vmem:[%s11336_s3 + $0x1e4] ss:$8 sps:$4 sm:$0xff]   ;;  %v10513_v13 = vld [vmem:[%s11336_s3 + $0xf4] ss:$8 sps:$4 sm:$0xff]   ;;  %v10508_v57 = vld [vmem:[%s11336_s3 + $0x1e0] ss:$8 sps:$4 sm:$0xff]  }
 0x4a8   : > { %8395 = vmatprep.subr.bf16.mxu1 %v10450_v7  ;;  %v10516_v52 = vld [vmem:[%s11336_s3 + $0x1f4] ss:$8 sps:$4 sm:$0xff]   ;;  %v10511_v63 = vld [vmem:[%s11336_s3 + $0xf0] ss:$8 sps:$4 sm:$0xff]   ;;  %v6776_v51 = vmax.f32 %v12418_v44, 0.0  ;;  %v6781_v7 = vmax.f32 %v12426_v26, 0.0 }
 0x4a9   : > { %v10519_v15 = vld [vmem:[%s11336_s3 + $0x204] ss:$8 sps:$4 sm:$0xff]   ;;  %v10514_v28 = vld [vmem:[%s11336_s3 + $0x1f0] ss:$8 sps:$4 sm:$0xff]   ;;  %v10520_v44 = vld [vmem:[%s11336_s3 + $0x300] ss:$8 sps:$4 sm:$0xff]  }
 0x4aa   : > { %8355 = vmatpush1.bf16.msra.mxu0 %v10445_v54  ;;  %v6778_v54 = vmax.f32 %v12423_v32, 0.0  ;;  %v10528_v32 = vld [vmem:[%s11336_s3 + $0x314] ss:$8 sps:$4 sm:$0xff]  }
 0x4ab   : > { %8356 = vmatprep.subr.bf16.mxu0 %v10453_v11  ;;  %8396 = vmatpush1.bf16.msra.mxu1 %v10448_v23  ;;  %v10522_v11 = vld [vmem:[%s11336_s3 + $0x304] ss:$8 sps:$4 sm:$0xff]   ;;  %v10517_v23 = vld [vmem:[%s11336_s3 + $0x200] ss:$8 sps:$4 sm:$0xff]  }
 0x4ac   : > { %8397 = vmatprep.subr.bf16.mxu1 %v10456_v17  ;;  %v6783_v17 = vmax.f32 %v12428_v10, 0.0  ;;  %v6796_v26 = vpack.c.bf16 %v6778_v54, %v6778_v54  ;;  %v10523_v10 = vld [vmem:[%s11336_s3 + $0x210] ss:$8 sps:$4 sm:$0xff]  }
 0x4ae   : > { %8357 = vmatpush1.bf16.msra.mxu0 %v10451_v14  ;;  %v6794_v14 = vpack.c.bf16 %v6776_v51, %v6776_v51  ;;  %v10561_v51 = vld [vmem:[%s11336_s3 + $0x274] ss:$8 sps:$4 sm:$0xff]  }
 0x4af   : > { %8358 = vmatprep.subr.bf16.mxu0 %v10459_v58  ;;  %8398 = vmatpush1.bf16.msra.mxu1 %v10454_v62  ;;  %v10525_v58 = vld [vmem:[%s11336_s3 + $0x214] ss:$8 sps:$4 sm:$0xff]   ;;  %v6799_v62 = vpack.c.bf16 %v6781_v7, %v6781_v7 }
 0x4b0   : > { %8399 = vmatprep.subr.bf16.mxu1 %v10462_v43  ;;  %v6801_v43 = vpack.c.bf16 %v6783_v17, %v6783_v17 }
 0x4b2   : > { %8359 = vmatpush1.bf16.msra.mxu0 %v10457_v1  ;;  %v10531_v1 = vld [vmem:[%s11336_s3 + $0x224] ss:$8 sps:$4 sm:$0xff]  }
 0x4b3   : > { %8360 = vmatprep.subr.bf16.mxu0 %v10465_v38  ;;  %8400 = vmatpush1.bf16.msra.mxu1 %v10460_v61  ;;  %v10526_v38 = vld [vmem:[%s11336_s3 + $0x310] ss:$8 sps:$4 sm:$0xff]   ;;  %v10534_v61 = vld [vmem:[%s11336_s3 + $0x324] ss:$8 sps:$4 sm:$0xff]  }
 0x4b4   : > { %8401 = vmatprep.subr.bf16.mxu1 %v10468_v40  ;;  %v10529_v40 = vld [vmem:[%s11336_s3 + $0x220] ss:$8 sps:$4 sm:$0xff]  }
 0x4b6   : > { %8361 = vmatpush1.bf16.msra.mxu0 %v10463_v53  ;;  %v10537_v53 = vld [vmem:[%s11336_s3 + $0x234] ss:$8 sps:$4 sm:$0xff]  }
 0x4b7   : > { %8362 = vmatprep.subr.bf16.mxu0 %v10471_v60  ;;  %8402 = vmatpush1.bf16.msra.mxu1 %v10466_v48  ;;  %v10532_v60 = vld [vmem:[%s11336_s3 + $0x320] ss:$8 sps:$4 sm:$0xff]   ;;  %v10540_v48 = vld [vmem:[%s11336_s3 + $0x334] ss:$8 sps:$4 sm:$0xff]  }
 0x4b8   : > { %8403 = vmatprep.subr.bf16.mxu1 %v10474_v42  ;;  %v10535_v42 = vld [vmem:[%s11336_s3 + $0x230] ss:$8 sps:$4 sm:$0xff]  }
 0x4ba   : > { %8363 = vmatpush1.bf16.msra.mxu0 %v10469_v34  ;;  %v10543_v34 = vld [vmem:[%s11336_s3 + $0x244] ss:$8 sps:$4 sm:$0xff]  }
 0x4bb   : > { %8364 = vmatprep.subr.bf16.mxu0 %v10477_v27  ;;  %8404 = vmatpush1.bf16.msra.mxu1 %v10472_v37  ;;  %v10538_v27 = vld [vmem:[%s11336_s3 + $0x330] ss:$8 sps:$4 sm:$0xff]   ;;  %v10546_v37 = vld [vmem:[%s11336_s3 + $0x344] ss:$8 sps:$4 sm:$0xff]  }
 0x4bc   : > { %8405 = vmatprep.subr.bf16.mxu1 %v10480_v35  ;;  %v10541_v35 = vld [vmem:[%s11336_s3 + $0x240] ss:$8 sps:$4 sm:$0xff]  }
 0x4be   : > { %8365 = vmatpush1.bf16.msra.mxu0 %v10475_v0  ;;  %v10549_v0 = vld [vmem:[%s11336_s3 + $0x254] ss:$8 sps:$4 sm:$0xff]  }
 0x4bf   : > { %8366 = vmatprep.subr.bf16.mxu0 %v10483_v21  ;;  %8406 = vmatpush1.bf16.msra.mxu1 %v10478_v59  ;;  %v10544_v21 = vld [vmem:[%s11336_s3 + $0x340] ss:$8 sps:$4 sm:$0xff]   ;;  %v10552_v59 = vld [vmem:[%s11336_s3 + $0x354] ss:$8 sps:$4 sm:$0xff]  }
 0x4c0   : > { %8407 = vmatprep.subr.bf16.mxu1 %v10486_v12  ;;  %v10547_v12 = vld [vmem:[%s11336_s3 + $0x250] ss:$8 sps:$4 sm:$0xff]  }
 0x4c2   : > { %8367 = vmatpush1.bf16.msra.mxu0 %v10481_v24  ;;  %v10555_v24 = vld [vmem:[%s11336_s3 + $0x264] ss:$8 sps:$4 sm:$0xff]  }
 0x4c3   : > { %8368 = vmatprep.subr.bf16.mxu0 %v10489_v41  ;;  %8408 = vmatpush1.bf16.msra.mxu1 %v10484_v2  ;;  %v10550_v2 = vld [vmem:[%s11336_s3 + $0x350] ss:$8 sps:$4 sm:$0xff]  }
 0x4c4   : > { %8409 = vmatprep.subr.bf16.mxu1 %v10492_v22 }
 0x4c6   : > { %8369 = vmatpush1.bf16.msra.mxu0 %v10487_v46 }
 0x4c7   : > { %8370 = vmatprep.subr.bf16.mxu0 %v10495_v30  ;;  %8410 = vmatpush1.bf16.msra.mxu1 %v10490_v6 }
 0x4c8   : > { %8411 = vmatprep.subr.bf16.mxu1 %v10498_v36  ;;  %v10558_v36 = vld [vmem:[%s11336_s3 + $0x364] ss:$8 sps:$4 sm:$0xff]  }
 0x4ca   : > { %8371 = vmatpush1.bf16.msra.mxu0 %v10493_v50 }
 0x4cb   : > { %8372 = vmatprep.subr.bf16.mxu0 %v10501_v31  ;;  %8412 = vmatpush1.bf16.msra.mxu1 %v10496_v47 }
 0x4cc   : > { %8413 = vmatprep.subr.bf16.mxu1 %v10504_v55 }
 0x4ce   : > { %8373 = vmatpush1.bf16.msra.mxu0 %v10499_v49 }
 0x4cf   : > { %8374 = vmatprep.subr.bf16.mxu0 %v10507_v56  ;;  %8414 = vmatpush1.bf16.msra.mxu1 %v10502_v9  ;;  %v10553_v9 = vld [vmem:[%s11336_s3 + $0x260] ss:$8 sps:$4 sm:$0xff]  }
 0x4d0   : > { %8415 = vmatprep.subr.bf16.mxu1 %v10510_v4 }
 0x4d2   : > { %8375 = vmatpush1.bf16.msra.mxu0 %v10505_v18 }
 0x4d3   : > { %8376 = vmatprep.subr.bf16.mxu0 %v10513_v13  ;;  %8416 = vmatpush1.bf16.msra.mxu1 %v10508_v57 }
 0x4d4   : > { %8417 = vmatprep.subr.bf16.mxu1 %v10516_v52 }
 0x4d6   : > { %8377 = vmatpush1.bf16.msra.mxu0 %v10511_v63 }
 0x4d7   : > { %8428 = vmatprep.subr.bf16.mxu0 %v10519_v15  ;;  %8418 = vmatpush1.bf16.msra.mxu1 %v10514_v28 }
 0x4d8   : > { %8469 = vmatprep.subr.bf16.mxu1 %v10522_v11 }
 0x4d9   : > { %8379 = vmatmul.mubr.bf16.vlgmr.msra.gmra.mrb[16].mxu0 %v6794_v14 }
 0x4da   : > { %8429 = vmatpush1.bf16.msra.mxu0 %v10517_v23  ;;  %8460 = vmatprep.mubr.bf16.mxu0 %v6799_v62  ;;  %v10556_v23 = vld [vmem:[%s11336_s3 + $0x360] ss:$8 sps:$4 sm:$0xff]   ;;  %v10564_v62 = vld [vmem:[%s11336_s3 + $0x374] ss:$8 sps:$4 sm:$0xff]  }
 0x4db   : > { %8420 = vmatmul.mubr.bf16.vlgmr.msra.gmra.mrb[16].mxu1 %v6796_v26  ;;  %8430 = vmatprep.subr.bf16.mxu0 %v10525_v58 }
 0x4dc   : > { %8470 = vmatpush1.bf16.msra.mxu1 %v10520_v44  ;;  %8501 = vmatprep.mubr.bf16.mxu1 %v6801_v43 }
 0x4dd   : > { %8471 = vmatprep.subr.bf16.mxu1 %v10528_v32 }
 0x4de   : > { %8431 = vmatpush1.bf16.msra.mxu0 %v10523_v10 }
 0x4df   : > { %8432 = vmatprep.subr.bf16.mxu0 %v10531_v1  ;;  %v10559_v1 = vld [vmem:[%s11336_s3 + $0x270] ss:$8 sps:$4 sm:$0xff]  }
 0x4e0   : > { %8472 = vmatpush1.bf16.msra.mxu1 %v10526_v38 }
 0x4e1   : > { %8473 = vmatprep.subr.bf16.mxu1 %v10534_v61 }
 0x4e2   : > { %8433 = vmatpush1.bf16.msra.mxu0 %v10529_v40 }
 0x4e3   : > { %8434 = vmatprep.subr.bf16.mxu0 %v10537_v53 }
 0x4e4   : > { %8474 = vmatpush1.bf16.msra.mxu1 %v10532_v60  ;;  %v10567_v60 = vld [vmem:[%s11336_s3 + $0x284] ss:$8 sps:$4 sm:$0xff]  }
 0x4e5   : > { %8475 = vmatprep.subr.bf16.mxu1 %v10540_v48 }
 0x4e6   : > { %8435 = vmatpush1.bf16.msra.mxu0 %v10535_v42 }
 0x4e7   : > { %8436 = vmatprep.subr.bf16.mxu0 %v10543_v34 }
 0x4e8   : > { %8476 = vmatpush1.bf16.msra.mxu1 %v10538_v27 }
 0x4e9   : > { %8477 = vmatprep.subr.bf16.mxu1 %v10546_v37  ;;  %v12513_v41 = vpop.f32.mrb[8].mxu0  ;;  %v10562_v37 = vld [vmem:[%s11336_s3 + $0x370] ss:$8 sps:$4 sm:$0xff]  }
 0x4ea   : > { %8437 = vmatpush1.bf16.msra.mxu0 %v10541_v35  ;;  %v6102_v22 = vrot.slane %v12513_v41, 4  ;;  %v6175_v46 = vmul.f32 %v12513_v41, %v12513_v41  ;;  %v12521_v6 = vpop.f32.mrb[9].mxu0 }
 0x4eb   : > { %8438 = vmatprep.subr.bf16.mxu0 %v10549_v0  ;;  %v12519_v30 = vpop.f32.mrb[8].mxu1  ;;  %v6108_v47 = vrot.slane %v12521_v6, 4  ;;  %v6176_v55 = vmul.f32 %v12521_v6, %v12521_v6  ;;  %v5805_v56 = vpop.f32.mrb[10].mxu0 }
 0x4ec   : > { %8478 = vmatpush1.bf16.msra.mxu1 %v10544_v21  ;;  %v6114_v50 = vrot.slane %v12519_v30, 4  ;;  %v6177_v31 = vmul.f32 %v12519_v30, %v12519_v30  ;;  %v12530_v49 = vpop.f32.mrb[9].mxu1  ;;  %v6103_v4 = vadd.f32 %v6102_v22, %v12513_v41  ;;  %v6231_v18 = vrot.slane %v6175_v46, 4  ;;  %v5806_v63 = vpop.f32.mrb[11].mxu0  ;;  %v10573_v56 = vld [vmem:[%s11336_s3 + $0x294] ss:$8 sps:$4 sm:$0xff]  }
 0x4ed   : > { %8479 = vmatprep.subr.bf16.mxu1 %v10552_v59  ;;  %v6120_v13 = vrot.slane %v12530_v49, 4  ;;  %v6178_v57 = vmul.f32 %v12530_v49, %v12530_v49  ;;  %v5887_v52 = vpop.f32.mrb[10].mxu1  ;;  %v6109_v7 = vadd.f32 %v6108_v47, %v12521_v6  ;;  %v6237_v54 = vrot.slane %v6176_v55, 4 }
 0x4ee   : > { %8439 = vmatpush1.bf16.msra.mxu0 %v10547_v12  ;;  %v6115_v15 = vadd.f32 %v6114_v50, %v12519_v30  ;;  %v6243_v28 = vrot.slane %v6177_v31, 4  ;;  %v5888_v11 = vpop.f32.mrb[11].mxu1  ;;  %v6104_v17 = vrot.slane %v6103_v4, 2  ;;  %v6232_v14 = vadd.f32 %v6231_v18, %v6175_v46  ;;  %v10570_v12 = vld [vmem:[%s11336_s3 + $0x384] ss:$8 sps:$4 sm:$0xff]  }
 0x4ef   : > { %8440 = vmatprep.subr.bf16.mxu0 %v10555_v24  ;;  %v6121_v58 = vadd.f32 %v6120_v13, %v12530_v49  ;;  %v6249_v44 = vrot.slane %v6178_v57, 4  ;;  %v6110_v43 = vrot.slane %v6109_v7, 2  ;;  %v6238_v10 = vadd.f32 %v6237_v54, %v6176_v55 }
 0x4f0   : > { %8480 = vmatpush1.bf16.msra.mxu1 %v10550_v2  ;;  %v6116_v26 = vrot.slane %v6115_v15, 2  ;;  %v6244_v32 = vadd.f32 %v6243_v28, %v6177_v31  ;;  %v6105_v38 = vadd.f32 %v6104_v17, %v6103_v4  ;;  %v6233_v61 = vrot.slane %v6232_v14, 2  ;;  %v10576_v28 = vld [vmem:[%s11336_s3 + $0x394] ss:$8 sps:$4 sm:$0xff]   ;;  %v10571_v17 = vld [vmem:[%s11336_s3 + $0x290] ss:$8 sps:$4 sm:$0xff]  }
 0x4f1   : > { %8481 = vmatprep.subr.bf16.mxu1 %v10558_v36  ;;  %v6122_v40 = vrot.slane %v6121_v58, 2  ;;  %v6250_v53 = vadd.f32 %v6249_v44, %v6178_v57  ;;  %v6111_v34 = vadd.f32 %v6110_v43, %v6109_v7  ;;  %v6239_v27 = vrot.slane %v6238_v10, 2  ;;  %v10565_v36 = vld [vmem:[%s11336_s3 + $0x280] ss:$8 sps:$4 sm:$0xff]  }
 0x4f2   : > { %8441 = vmatpush1.bf16.msra.mxu0 %v10553_v9  ;;  %v6117_v48 = vadd.f32 %v6116_v26, %v6115_v15  ;;  %v6245_v42 = vrot.slane %v6244_v32, 2  ;;  %v6106_v35 = vrot.slane %v6105_v38, 1  ;;  %v6234_v0 = vadd.f32 %v6233_v61, %v6232_v14  ;;  %v10568_v57 = vld [vmem:[%s11336_s3 + $0x380] ss:$8 sps:$4 sm:$0xff]   ;;  %v10579_v26 = vld [vmem:[%s11336_s3 + $0x2a4] ss:$8 sps:$4 sm:$0xff]  }
 0x4f3   : > { %8442 = vmatprep.subr.bf16.mxu0 %v10561_v51  ;;  %v6123_v21 = vadd.f32 %v6122_v40, %v6121_v58  ;;  %v6251_v59 = vrot.slane %v6250_v53, 2  ;;  %v6112_v22 = vrot.slane %v6111_v34, 1  ;;  %v6240_v46 = vadd.f32 %v6239_v27, %v6238_v10 }
 0x4f4   : > { %8482 = vmatpush1.bf16.msra.mxu1 %v10556_v23  ;;  %v6118_v24 = vrot.slane %v6117_v48, 1  ;;  %v6246_v2 = vadd.f32 %v6245_v42, %v6244_v32  ;;  %v6107_v50 = vadd.f32 %v6106_v35, %v6105_v38  ;;  %v6235_v31 = vrot.slane %v6234_v0, 1  ;;  %v10574_v38 = vld [vmem:[%s11336_s3 + $0x390] ss:$8 sps:$4 sm:$0xff]   ;;  %v10585_v35 = vld [vmem:[%s11336_s3 + $0x2b4] ss:$8 sps:$4 sm:$0xff]  }
 0x4f5   : > { %8483 = vmatprep.subr.bf16.mxu1 %v10564_v62  ;;  %v6124_v47 = vrot.slane %v6123_v21, 1  ;;  %v6252_v55 = vadd.f32 %v6251_v59, %v6250_v53  ;;  %v6113_v18 = vadd.f32 %v6112_v22, %v6111_v34  ;;  %v6241_v13 = vrot.slane %v6240_v46, 1  ;;  %v10577_v34 = vld [vmem:[%s11336_s3 + $0x2a0] ss:$8 sps:$4 sm:$0xff]   ;;  %v10591_v22 = vld [vmem:[%s11336_s3 + $0x2c4] ss:$8 sps:$4 sm:$0xff]  }
 0x4f6   : > { %8443 = vmatpush1.bf16.msra.mxu0 %v10559_v1  ;;  %v6119_v9 = vadd.f32 %v6118_v24, %v6117_v48  ;;  %v6247_v4 = vrot.slane %v6246_v2, 1  ;;  %v12550_v52 = vmul.f32 0.125, %v6107_v50  ;;  %v6236_v63 = vadd.f32 %v6235_v31, %v6234_v0  ;;  %v10580_v59 = vld [vmem:[%s11336_s3 + $0x3a0] ss:$8 sps:$4 sm:$0xff]   ;;  %v10588_v24 = vld [vmem:[%s11336_s3 + $0x3b4] ss:$8 sps:$4 sm:$0xff]  }
 0x4f7   : > { %8444 = vmatprep.subr.bf16.mxu0 %v10567_v60  ;;  %v6125_v51 = vadd.f32 %v6124_v47, %v6123_v21  ;;  %v6253_v15 = vrot.slane %v6252_v55, 1  ;;  %v12555_v11 = vmul.f32 0.125, %v6113_v18  ;;  %v6242_v23 = vadd.f32 %v6241_v13, %v6240_v46  ;;  %v10582_v60 = vld [vmem:[%s11336_s3 + $0x3a4] ss:$8 sps:$4 sm:$0xff]   ;;  %v10586_v46 = vld [vmem:[%s11336_s3 + $0x3b0] ss:$8 sps:$4 sm:$0xff]  }
 0x4f8   : > { %8484 = vmatpush1.bf16.msra.mxu1 %v10562_v37  ;;  %v12553_v7 = vmul.f32 0.125, %v6119_v9  ;;  %v6248_v54 = vadd.f32 %v6247_v4, %v6246_v2  ;;  %v6287_v14 = vmul.f32 0.125, %v6236_v63  ;;  %v6303_v58 = vmul.f32 %v12550_v52, %v12550_v52  ;;  %v10583_v2 = vld [vmem:[%s11336_s3 + $0x2b0] ss:$8 sps:$4 sm:$0xff]   ;;  %v10594_v50 = vld [vmem:[%s11336_s3 + $0x3c4] ss:$8 sps:$4 sm:$0xff]  }
 0x4f9   : > { %8485 = vmatprep.subr.bf16.mxu1 %v10570_v12  ;;  %v12560_v44 = vmul.f32 0.125, %v6125_v51  ;;  %v6254_v62 = vadd.f32 %v6253_v15, %v6252_v55  ;;  %v6288_v10 = vmul.f32 0.125, %v6242_v23  ;;  %v6304_v1 = vmul.f32 %v12555_v11, %v12555_v11  ;;  %v10589_v31 = vld [vmem:[%s11336_s3 + $0x2c0] ss:$8 sps:$4 sm:$0xff]   ;;  %v10597_v47 = vld [vmem:[%s11336_s3 + $0x2d4] ss:$8 sps:$4 sm:$0xff]  }
 0x4fa   : > { %8445 = vmatpush1.bf16.msra.mxu0 %v10565_v36  ;;  %v6289_v32 = vmul.f32 0.125, %v6248_v54  ;;  %v6305_v43 = vmul.f32 %v12553_v7, %v12553_v7  ;;  %v6319_v61 = vsub.f32 %v6287_v14, %v6303_v58  ;;  %v12579_v36 = vld [vmem:[%s11346_s24 + $0x10] ss:$2 sm:$0xff] }
 0x4fb   : > { %8446 = vmatprep.subr.bf16.mxu0 %v10573_v56  ;;  %v6290_v40 = vmul.f32 0.125, %v6254_v62  ;;  %v6306_v53 = vmul.f32 %v12560_v44, %v12560_v44  ;;  %v6320_v42 = vsub.f32 %v6288_v10, %v6304_v1  ;;  %v6403_v55 = vrot.slane %v12579_v36, %v11974_v20  ;;  %v10592_v56 = vld [vmem:[%s11336_s3 + $0x3c0] ss:$8 sps:$4 sm:$0xff]   ;;  %v10600_v4 = vld [vmem:[%s11336_s3 + $0x3d4] ss:$8 sps:$4 sm:$0xff]  }
 0x4fc   : > { %8486 = vmatpush1.bf16.msra.mxu1 %v10568_v57  ;;  %v6321_v48 = vsub.f32 %v6289_v32, %v6305_v43  ;;  %v6342_v27 = vadd.f32 1e-05, %v6319_v61  ;;  %v6411_v9 = vrot.slane %v12579_v36, %v12957_v39  ;;  %v6407_v18 = vrot.slane %v12579_v36, %v12955_v29  ;;  %v10595_v13 = vld [vmem:[%s11336_s3 + $0x2d0] ss:$8 sps:$4 sm:$0xff]   ;;  %v10603_v51 = vld [vmem:[%s11336_s3 + $0x2e4] ss:$8 sps:$4 sm:$0xff]  }
 0x4fd   : > { %8487 = vmatprep.subr.bf16.mxu1 %v10576_v28  ;;  %v6322_v37 = vsub.f32 %v6290_v40, %v6306_v53  ;;  %v6343_v21 = vadd.f32 1e-05, %v6320_v42  ;;  %v6415_v63 = vrot.slane %v12579_v36, %v12956_v8  ;;  %v10598_v54 = vld [vmem:[%s11336_s3 + $0x3d0] ss:$8 sps:$4 sm:$0xff]   ;;  %v10606_v14 = vld [vmem:[%s11336_s3 + $0x3e4] ss:$8 sps:$4 sm:$0xff]  }
 0x4fe   : > { %8447 = vmatpush1.bf16.msra.mxu0 %v10571_v17  ;;  %v6344_v0 = vadd.f32 1e-05, %v6321_v48  ;;  %10821 = vrsqrt.f32 %v6342_v27  ;;  %v10601_v32 = vld [vmem:[%s11336_s3 + $0x2e0] ss:$8 sps:$4 sm:$0xff]   ;;  %v10609_v1 = vld [vmem:[%s11336_s3 + $0x2f4] ss:$8 sps:$4 sm:$0xff]  }
 0x4ff   : > { %8448 = vmatprep.subr.bf16.mxu0 %v10579_v26  ;;  %v6345_v12 = vadd.f32 1e-05, %v6322_v37  ;;  %v10604_v61 = vld [vmem:[%s11336_s3 + $0x3e0] ss:$8 sps:$4 sm:$0xff]   ;;  %v10612_v40 = vld [vmem:[%s11336_s3 + $0x3f4] ss:$8 sps:$4 sm:$0xff]  }
 0x500   : > { %8488 = vmatpush1.bf16.msra.mxu1 %v10574_v38  ;;  %10823 = vrsqrt.f32 %v6344_v0  ;;  %v6780_v48 = vmax.f32 %v12431_v5, 0.0  ;;  %v10615_v42 = vld [vmem:[%s11336_s3 + $0x404] ss:$8 sps:$4 sm:$0xff]   ;;  %v6782_v27 = vmax.f32 %v12434_v33, 0.0  ;;  %v10624_v33 = vld [vmem:[%s11336_s3 + $0x514] ss:$8 sps:$4 sm:$0xff]  }
 0x501   : > { %8489 = vmatprep.subr.bf16.mxu1 %v10582_v60  ;;  %10825 = vrsqrt.f32 %v6343_v21  ;;  %v10618_v37 = vld [vmem:[%s11336_s3 + $0x504] ss:$8 sps:$4 sm:$0xff]   ;;  %v10621_v21 = vld [vmem:[%s11336_s3 + $0x414] ss:$8 sps:$4 sm:$0xff]  }
 0x502   : > { %8449 = vmatpush1.bf16.msra.mxu0 %v10577_v34  ;;  %10827 = vrsqrt.f32 %v6345_v12  ;;  %v10610_v34 = vld [vmem:[%s11336_s3 + $0x3f0] ss:$8 sps:$4 sm:$0xff]   ;;  %v6798_v0 = vpack.c.bf16 %v6780_v48, %v6780_v48  ;;  %v6800_v12 = vpack.c.bf16 %v6782_v27, %v6782_v27  ;;  %v10678_v27 = vld [vmem:[%s11336_s3 + $0x5a4] ss:$8 sps:$4 sm:$0xff]  }
 0x503   : > { %8450 = vmatprep.subr.bf16.mxu0 %v10585_v35  ;;  %v10613_v35 = vld [vmem:[%s11336_s3 + $0x400] ss:$8 sps:$4 sm:$0xff]   ;;  %v10667_v48 = vld [vmem:[%s11336_s3 + $0x490] ss:$8 sps:$4 sm:$0xff]  }
 0x504   : > { %8490 = vmatpush1.bf16.msra.mxu1 %v10580_v59  ;;  %v10616_v59 = vld [vmem:[%s11336_s3 + $0x500] ss:$8 sps:$4 sm:$0xff]  }
 0x505   : > { %8491 = vmatprep.subr.bf16.mxu1 %v10588_v24  ;;  %v10619_v24 = vld [vmem:[%s11336_s3 + $0x410] ss:$8 sps:$4 sm:$0xff]  }
 0x506   : > { %8451 = vmatpush1.bf16.msra.mxu0 %v10583_v2  ;;  %v10627_v2 = vld [vmem:[%s11336_s3 + $0x424] ss:$8 sps:$4 sm:$0xff]  }
 0x507   : > { %8452 = vmatprep.subr.bf16.mxu0 %v10591_v22  ;;  %v10622_v22 = vld [vmem:[%s11336_s3 + $0x510] ss:$8 sps:$4 sm:$0xff]  }
 0x508   : > { %8492 = vmatpush1.bf16.msra.mxu1 %v10586_v46  ;;  %v10822_v57 = vpop.eup %10821  ;;  %v10630_v46 = vld [vmem:[%s11336_s3 + $0x524] ss:$8 sps:$4 sm:$0xff]  }
 0x509   : > { %8493 = vmatprep.subr.bf16.mxu1 %v10594_v50  ;;  %v12596_v28 = vmul.f32 %v10822_v57, %v6403_v55  ;;  %v10625_v50 = vld [vmem:[%s11336_s3 + $0x420] ss:$8 sps:$4 sm:$0xff]   ;;  %v10636_v55 = vld [vmem:[%s11336_s3 + $0x534] ss:$8 sps:$4 sm:$0xff]  }
 0x50a   : > { %8453 = vmatpush1.bf16.msra.mxu0 %v10589_v31  ;;  %v10824_v15 = vpop.eup %10823  ;;  %v10633_v31 = vld [vmem:[%s11336_s3 + $0x434] ss:$8 sps:$4 sm:$0xff]  }
 0x50b   : > { %8454 = vmatprep.subr.bf16.mxu0 %v10597_v47  ;;  %v10826_v23 = vpop.eup %10825  ;;  %v12599_v17 = vmul.f32 %v10824_v15, %v6411_v9  ;;  %v6472_v62 = vmul.f32 %v12596_v28, %v12550_v52  ;;  %v10628_v47 = vld [vmem:[%s11336_s3 + $0x520] ss:$8 sps:$4 sm:$0xff]   ;;  %v10639_v9 = vld [vmem:[%s11336_s3 + $0x444] ss:$8 sps:$4 sm:$0xff]   ;;  %v10645_v57 = vld [vmem:[%s11336_s3 + $0x454] ss:$8 sps:$4 sm:$0xff]  }
 0x50c   : > { %8494 = vmatpush1.bf16.msra.mxu1 %v10592_v56  ;;  %v10828_v58 = vpop.eup %10827  ;;  %v12604_v26 = vmul.f32 %v10826_v23, %v6407_v18  ;;  %v10631_v56 = vld [vmem:[%s11336_s3 + $0x430] ss:$8 sps:$4 sm:$0xff]   ;;  %v10642_v18 = vld [vmem:[%s11336_s3 + $0x544] ss:$8 sps:$4 sm:$0xff]  }
 0x50d   : > { %8495 = vmatprep.subr.bf16.mxu1 %v10600_v4  ;;  %v6474_v43 = vmul.f32 %v12599_v17, %v12553_v7  ;;  %v12609_v10 = vmul.f32 %v10828_v58, %v6415_v63  ;;  %v10607_v7 = vld [vmem:[%s11336_s3 + $0x2f0] ss:$8 sps:$4 sm:$0xff]   ;;  %v10640_v63 = vld [vmem:[%s11336_s3 + $0x540] ss:$8 sps:$4 sm:$0xff]  }
 0x50e   : > { %8455 = vmatpush1.bf16.msra.mxu0 %v10595_v13  ;;  %v6473_v38 = vmul.f32 %v12604_v26, %v12555_v11  ;;  %v10634_v4 = vld [vmem:[%s11336_s3 + $0x530] ss:$8 sps:$4 sm:$0xff]   ;;  %v10637_v13 = vld [vmem:[%s11336_s3 + $0x440] ss:$8 sps:$4 sm:$0xff]  }
 0x50f   : > { %8456 = vmatprep.subr.bf16.mxu0 %v10603_v51  ;;  %v6475_v52 = vmul.f32 %v12609_v10, %v12560_v44  ;;  %v10648_v51 = vld [vmem:[%s11336_s3 + $0x554] ss:$8 sps:$4 sm:$0xff]   ;;  %v10643_v15 = vld [vmem:[%s11336_s3 + $0x450] ss:$8 sps:$4 sm:$0xff]   ;;  %v10649_v58 = vld [vmem:[%s11336_s3 + $0x460] ss:$8 sps:$4 sm:$0xff]  }
 0x510   : > { %8496 = vmatpush1.bf16.msra.mxu1 %v10598_v54  ;;  %v6545_v53 = vcombine.low %v6472_v62, %v6473_v38  ;;  %v10651_v54 = vld [vmem:[%s11336_s3 + $0x464] ss:$8 sps:$4 sm:$0xff]   ;;  %v10646_v23 = vld [vmem:[%s11336_s3 + $0x550] ss:$8 sps:$4 sm:$0xff]   ;;  %v10657_v62 = vld [vmem:[%s11336_s3 + $0x474] ss:$8 sps:$4 sm:$0xff]  }
 0x511   : > { %8497 = vmatprep.subr.bf16.mxu1 %v10606_v14  ;;  %v6546_v60 = vcombine.low %v6474_v43, %v6475_v52  ;;  %v10654_v14 = vld [vmem:[%s11336_s3 + $0x564] ss:$8 sps:$4 sm:$0xff]   ;;  %v10660_v43 = vld [vmem:[%s11336_s3 + $0x574] ss:$8 sps:$4 sm:$0xff]  }
 0x512   : > { %8457 = vmatpush1.bf16.msra.mxu0 %v10601_v32  ;;  %v12622_v11 = vrot.slane %v6545_v53, %v12014_v3  ;;  %v10652_v32 = vld [vmem:[%s11336_s3 + $0x560] ss:$8 sps:$4 sm:$0xff]   ;;  %v10663_v38 = vld [vmem:[%s11336_s3 + $0x484] ss:$8 sps:$4 sm:$0xff]   ;;  %v10669_v53 = vld [vmem:[%s11336_s3 + $0x494] ss:$8 sps:$4 sm:$0xff]  }
 0x513   : > { %8458 = vmatprep.subr.bf16.mxu0 %v10609_v1  ;;  %v12626_v44 = vrot.slane %v6546_v60, %v12014_v3  ;;  %v10655_v1 = vld [vmem:[%s11336_s3 + $0x470] ss:$8 sps:$4 sm:$0xff]   ;;  %v10666_v52 = vld [vmem:[%s11336_s3 + $0x584] ss:$8 sps:$4 sm:$0xff]   ;;  %v10672_v60 = vld [vmem:[%s11336_s3 + $0x594] ss:$8 sps:$4 sm:$0xff]  }
 0x514   : > { %8498 = vmatpush1.bf16.msra.mxu1 %v10604_v61  ;;  %v10658_v61 = vld [vmem:[%s11336_s3 + $0x570] ss:$8 sps:$4 sm:$0xff]  }
 0x515   : > { %8499 = vmatprep.subr.bf16.mxu1 %v10612_v40  ;;  %v6577_v5 = vcombine.low %v12622_v11, %v12626_v44  ;;  %v10661_v40 = vld [vmem:[%s11336_s3 + $0x480] ss:$8 sps:$4 sm:$0xff]  }
 0x516   : > { %8459 = vmatpush1.bf16.msra.mxu0 %v10607_v7  ;;  %v10664_v7 = vld [vmem:[%s11336_s3 + $0x580] ss:$8 sps:$4 sm:$0xff]  }
 0x517   : > { %8510 = vmatprep.subr.bf16.mxu0 %v10615_v42  ;;  %v10675_v42 = vld [vmem:[%s11336_s3 + $0x4a4] ss:$8 sps:$4 sm:$0xff]  }
 0x518   : > { %8500 = vmatpush1.bf16.msra.mxu1 %v10610_v34  ;;  %v10670_v34 = vld [vmem:[%s11336_s3 + $0x590] ss:$8 sps:$4 sm:$0xff]  }
 0x519   : > { %8461 = vmatmul.mubr.bf16.vlgmr.msra.gmra.mrb[20].mxu0 %v6798_v0  ;;  %8551 = vmatprep.subr.bf16.mxu1 %v10618_v37  ;;  %v10673_v37 = vld [vmem:[%s11336_s3 + $0x4a0] ss:$8 sps:$4 sm:$0xff]  }
 0x51a   : > { %8511 = vmatpush1.bf16.msra.mxu0 %v10613_v35  ;;  %v10681_v35 = vld [vmem:[%s11336_s3 + $0x4b4] ss:$8 sps:$4 sm:$0xff]   ;;  %v10676_v0 = vld [vmem:[%s11336_s3 + $0x5a0] ss:$8 sps:$4 sm:$0xff]  }
 0x51b   : > { %8502 = vmatmul.mubr.bf16.vlgmr.msra.gmra.mrb[20].mxu1 %v6800_v12  ;;  %8512 = vmatprep.subr.bf16.mxu0 %v10621_v21  ;;  %v10684_v21 = vld [vmem:[%s11336_s3 + $0x5b4] ss:$8 sps:$4 sm:$0xff]   ;;  %v10687_v12 = vld [vmem:[%s11336_s3 + $0x4c4] ss:$8 sps:$4 sm:$0xff]  }
 0x51c   : > { %8552 = vmatpush1.bf16.msra.mxu1 %v10616_v59  ;;  %v10679_v59 = vld [vmem:[%s11336_s3 + $0x4b0] ss:$8 sps:$4 sm:$0xff]  }
 0x51d   : > { %8553 = vmatprep.subr.bf16.mxu1 %v10624_v33  ;;  %v10682_v33 = vld [vmem:[%s11336_s3 + $0x5b0] ss:$8 sps:$4 sm:$0xff]  }
 0x51e   : > { %8513 = vmatpush1.bf16.msra.mxu0 %v10619_v24  ;;  %v10690_v24 = vld [vmem:[%s11336_s3 + $0x5c4] ss:$8 sps:$4 sm:$0xff]  }
 0x51f   : > { %8514 = vmatprep.subr.bf16.mxu0 %v10627_v2  ;;  %v10685_v2 = vld [vmem:[%s11336_s3 + $0x4c0] ss:$8 sps:$4 sm:$0xff]  }
 0x520   : > { %8554 = vmatpush1.bf16.msra.mxu1 %v10622_v22  ;;  %v10693_v22 = vld [vmem:[%s11336_s3 + $0x4d4] ss:$8 sps:$4 sm:$0xff]  }
 0x521   : > { %8555 = vmatprep.subr.bf16.mxu1 %v10630_v46  ;;  %v10688_v46 = vld [vmem:[%s11336_s3 + $0x5c0] ss:$8 sps:$4 sm:$0xff]  }
 0x522   : > { %8515 = vmatpush1.bf16.msra.mxu0 %v10625_v50  ;;  %v10696_v50 = vld [vmem:[%s11336_s3 + $0x5d4] ss:$8 sps:$4 sm:$0xff]  }
 0x523   : > { %8516 = vmatprep.subr.bf16.mxu0 %v10633_v31  ;;  %v10691_v31 = vld [vmem:[%s11336_s3 + $0x4d0] ss:$8 sps:$4 sm:$0xff]  }
 0x524   : > { %8556 = vmatpush1.bf16.msra.mxu1 %v10628_v47  ;;  %v10699_v47 = vld [vmem:[%s11336_s3 + $0x4e4] ss:$8 sps:$4 sm:$0xff]  }
 0x525   : > { %8557 = vmatprep.subr.bf16.mxu1 %v10636_v55  ;;  %v10694_v55 = vld [vmem:[%s11336_s3 + $0x5d0] ss:$8 sps:$4 sm:$0xff]  }
 0x526   : > { %8517 = vmatpush1.bf16.msra.mxu0 %v10631_v56  ;;  %v10702_v56 = vld [vmem:[%s11336_s3 + $0x5e4] ss:$8 sps:$4 sm:$0xff]  }
 0x527   : > { %8518 = vmatprep.subr.bf16.mxu0 %v10639_v9  ;;  %v10697_v9 = vld [vmem:[%s11336_s3 + $0x4e0] ss:$8 sps:$4 sm:$0xff]  }
 0x528   : > { %8558 = vmatpush1.bf16.msra.mxu1 %v10634_v4  ;;  %v10705_v4 = vld [vmem:[%s11336_s3 + $0x4f4] ss:$8 sps:$4 sm:$0xff]  }
 0x529   : > { %8559 = vmatprep.subr.bf16.mxu1 %v10642_v18  ;;  %v10700_v18 = vld [vmem:[%s11336_s3 + $0x5e0] ss:$8 sps:$4 sm:$0xff]  }
 0x52a   : > { %8519 = vmatpush1.bf16.msra.mxu0 %v10637_v13  ;;  %v10708_v13 = vld [vmem:[%s11336_s3 + $0x5f4] ss:$8 sps:$4 sm:$0xff]  }
 0x52b   : > { %8520 = vmatprep.subr.bf16.mxu0 %v10645_v57  ;;  %v10703_v57 = vld [vmem:[%s11336_s3 + $0x4f0] ss:$8 sps:$4 sm:$0xff]  }
 0x52c   : > { %8560 = vmatpush1.bf16.msra.mxu1 %v10640_v63  ;;  %v10711_v63 = vld [vmem:[%s11336_s3 + $0x604] ss:$8 sps:$4 sm:$0xff]  }
 0x52d   : > { %8561 = vmatprep.subr.bf16.mxu1 %v10648_v51  ;;  %v10706_v51 = vld [vmem:[%s11336_s3 + $0x5f0] ss:$8 sps:$4 sm:$0xff]  }
 0x52e   : > { %8521 = vmatpush1.bf16.msra.mxu0 %v10643_v15  ;;  %v10714_v15 = vld [vmem:[%s11336_s3 + $0x704] ss:$8 sps:$4 sm:$0xff]  }
 0x52f   : > { %8522 = vmatprep.subr.bf16.mxu0 %v10651_v54 }
 0x530   : > { %8562 = vmatpush1.bf16.msra.mxu1 %v10646_v23 }
 0x531   : > { %8563 = vmatprep.subr.bf16.mxu1 %v10654_v14 }
 0x532   : > { %8523 = vmatpush1.bf16.msra.mxu0 %v10649_v58 }
 0x533   : > { %8524 = vmatprep.subr.bf16.mxu0 %v10657_v62 }
 0x534   : > { %8564 = vmatpush1.bf16.msra.mxu1 %v10652_v32 }
 0x535   : > { %8565 = vmatprep.subr.bf16.mxu1 %v10660_v43 }
 0x536   : > { %8525 = vmatpush1.bf16.msra.mxu0 %v10655_v1 }
 0x537   : > { %8526 = vmatprep.subr.bf16.mxu0 %v10663_v38 }
 0x538   : > { %8566 = vmatpush1.bf16.msra.mxu1 %v10658_v61 }
 0x539   : > { %8567 = vmatprep.subr.bf16.mxu1 %v10666_v52 }
 0x53a   : > { %8527 = vmatpush1.bf16.msra.mxu0 %v10661_v40 }
 0x53b   : > { %8528 = vmatprep.subr.bf16.mxu0 %v10669_v53 }
 0x53c   : > { %8568 = vmatpush1.bf16.msra.mxu1 %v10664_v7 }
 0x53d   : > { %8569 = vmatprep.subr.bf16.mxu1 %v10672_v60 }
 0x53e   : > { %8529 = vmatpush1.bf16.msra.mxu0 %v10667_v48 }
 0x53f   : > { %8530 = vmatprep.subr.bf16.mxu0 %v10675_v42 }
 0x540   : > { %8570 = vmatpush1.bf16.msra.mxu1 %v10670_v34 }
 0x541   : > { %8571 = vmatprep.subr.bf16.mxu1 %v10678_v27 }
 0x542   : > { %8531 = vmatpush1.bf16.msra.mxu0 %v10673_v37 }
 0x543   : > { %8532 = vmatprep.subr.bf16.mxu0 %v10681_v35 }
 0x544   : > { %8572 = vmatpush1.bf16.msra.mxu1 %v10676_v0 }
 0x545   : > { %8573 = vmatprep.subr.bf16.mxu1 %v10684_v21 }
 0x546   : > { %8533 = vmatpush1.bf16.msra.mxu0 %v10679_v59 }
 0x547   : > { %8534 = vmatprep.subr.bf16.mxu0 %v10687_v12 }
 0x548   : > { %8574 = vmatpush1.bf16.msra.mxu1 %v10682_v33 }
 0x549   : > { %8575 = vmatprep.subr.bf16.mxu1 %v10690_v24 }
 0x54a   : > { %8535 = vmatpush1.bf16.msra.mxu0 %v10685_v2 }
 0x54b   : > { %8536 = vmatprep.subr.bf16.mxu0 %v10693_v22 }
 0x54c   : > { %8576 = vmatpush1.bf16.msra.mxu1 %v10688_v46 }
 0x54d   : > { %8577 = vmatprep.subr.bf16.mxu1 %v10696_v50 }
 0x54e   : > { %8537 = vmatpush1.bf16.msra.mxu0 %v10691_v31 }
 0x54f   : > { %8538 = vmatprep.subr.bf16.mxu0 %v10699_v47 }
 0x550   : > { %8578 = vmatpush1.bf16.msra.mxu1 %v10694_v55 }
 0x551   : > { %8579 = vmatprep.subr.bf16.mxu1 %v10702_v56 }
 0x552   : > { %8539 = vmatpush1.bf16.msra.mxu0 %v10697_v9 }
 0x553   : > { %8540 = vmatprep.subr.bf16.mxu0 %v10705_v4 }
 0x554   : > { %8580 = vmatpush1.bf16.msra.mxu1 %v10700_v18 }
 0x555   : > { %8581 = vmatprep.subr.bf16.mxu1 %v10708_v13 }
 0x556   : > { %8541 = vmatpush1.bf16.msra.mxu0 %v10703_v57 }
 0x557   : > { %8592 = vmatprep.subr.bf16.mxu0 %v10711_v63 }
 0x558   : > { %8582 = vmatpush1.bf16.msra.mxu1 %v10706_v51 }
 0x559   : > { %8633 = vmatprep.subr.bf16.mxu1 %v10714_v15 }
 0x56c   : > { %v12696_v54 = vpop.f32.mrb[12].mxu0 }
 0x56d   : > { %v6126_v23 = vrot.slane %v12696_v54, 4  ;;  %v6179_v14 = vmul.f32 %v12696_v54, %v12696_v54  ;;  %v12701_v58 = vpop.f32.mrb[12].mxu1  ;;  %v12703_v62 = vpop.f32.mrb[13].mxu0 }
 0x56e   : > { %v6138_v32 = vrot.slane %v12701_v58, 4  ;;  %v6181_v43 = vmul.f32 %v12701_v58, %v12701_v58  ;;  %v6132_v1 = vrot.slane %v12703_v62, 4  ;;  %v6180_v38 = vmul.f32 %v12703_v62, %v12703_v62  ;;  %v12711_v61 = vpop.f32.mrb[13].mxu1  ;;  %v5969_v52 = vpop.f32.mrb[14].mxu0 }
 0x56f   : > { %v6127_v40 = vadd.f32 %v6126_v23, %v12696_v54  ;;  %v6255_v53 = vrot.slane %v6179_v14, 4  ;;  %v6144_v7 = vrot.slane %v12711_v61, 4  ;;  %v6182_v60 = vmul.f32 %v12711_v61, %v12711_v61  ;;  %v6051_v48 = vpop.f32.mrb[14].mxu1  ;;  %v5970_v42 = vpop.f32.mrb[15].mxu0 }
 0x570   : > { %v6139_v34 = vadd.f32 %v6138_v32, %v12701_v58  ;;  %v6267_v27 = vrot.slane %v6181_v43, 4  ;;  %v6133_v37 = vadd.f32 %v6132_v1, %v12703_v62  ;;  %v6261_v35 = vrot.slane %v6180_v38, 4  ;;  %v6052_v0 = vpop.f32.mrb[15].mxu1 }
 0x571   : > { %v6128_v21 = vrot.slane %v6127_v40, 2  ;;  %v6256_v59 = vadd.f32 %v6255_v53, %v6179_v14  ;;  %v6145_v12 = vadd.f32 %v6144_v7, %v12711_v61  ;;  %v6273_v33 = vrot.slane %v6182_v60, 4 }
 0x572   : > { %v6140_v24 = vrot.slane %v6139_v34, 2  ;;  %v6268_v2 = vadd.f32 %v6267_v27, %v6181_v43  ;;  %v6134_v22 = vrot.slane %v6133_v37, 2  ;;  %v6262_v46 = vadd.f32 %v6261_v35, %v6180_v38 }
 0x573   : > { %v6129_v50 = vadd.f32 %v6128_v21, %v6127_v40  ;;  %v6257_v31 = vrot.slane %v6256_v59, 2  ;;  %v6146_v47 = vrot.slane %v6145_v12, 2  ;;  %v6274_v55 = vadd.f32 %v6273_v33, %v6182_v60 }
 0x574   : > { %v6141_v56 = vadd.f32 %v6140_v24, %v6139_v34  ;;  %v6269_v9 = vrot.slane %v6268_v2, 2  ;;  %v6135_v4 = vadd.f32 %v6134_v22, %v6133_v37  ;;  %v6263_v18 = vrot.slane %v6262_v46, 2 }
 0x575   : > { %v6130_v13 = vrot.slane %v6129_v50, 1  ;;  %v6258_v57 = vadd.f32 %v6257_v31, %v6256_v59  ;;  %v6147_v63 = vadd.f32 %v6146_v47, %v6145_v12  ;;  %v6275_v51 = vrot.slane %v6274_v55, 2 }
 0x576   : > { %v6142_v15 = vrot.slane %v6141_v56, 1  ;;  %v6270_v23 = vadd.f32 %v6269_v9, %v6268_v2  ;;  %v6136_v14 = vrot.slane %v6135_v4, 1  ;;  %v6264_v32 = vadd.f32 %v6263_v18, %v6262_v46 }
 0x577   : > { %v6131_v1 = vadd.f32 %v6130_v13, %v6129_v50  ;;  %v6259_v43 = vrot.slane %v6258_v57, 1  ;;  %v6148_v52 = vrot.slane %v6147_v63, 1  ;;  %v6276_v38 = vadd.f32 %v6275_v51, %v6274_v55 }
 0x578   : > { %v6143_v40 = vadd.f32 %v6142_v15, %v6141_v56  ;;  %v6271_v53 = vrot.slane %v6270_v23, 1  ;;  %v6137_v7 = vadd.f32 %v6136_v14, %v6135_v4  ;;  %v6265_v60 = vrot.slane %v6264_v32, 1 }
 0x579   : > { %v6163_v48 = vmul.f32 0.125, %v6131_v1  ;;  %v6260_v42 = vadd.f32 %v6259_v43, %v6258_v57  ;;  %v6149_v34 = vadd.f32 %v6148_v52, %v6147_v63  ;;  %v6277_v27 = vrot.slane %v6276_v38, 1 }
 0x57a   : > { %v6165_v37 = vmul.f32 0.125, %v6143_v40  ;;  %v6272_v35 = vadd.f32 %v6271_v53, %v6270_v23  ;;  %v6164_v0 = vmul.f32 0.125, %v6137_v7  ;;  %v6266_v21 = vadd.f32 %v6265_v60, %v6264_v32 }
 0x57b   : > { %v6291_v59 = vmul.f32 0.125, %v6260_v42  ;;  %v6307_v12 = vmul.f32 %v6163_v48, %v6163_v48  ;;  %v6166_v33 = vmul.f32 0.125, %v6149_v34  ;;  %v6278_v24 = vadd.f32 %v6277_v27, %v6276_v38 }
 0x57c   : > { %v6293_v2 = vmul.f32 0.125, %v6272_v35  ;;  %v6309_v22 = vmul.f32 %v6165_v37, %v6165_v37  ;;  %v6292_v46 = vmul.f32 0.125, %v6266_v21  ;;  %v6308_v50 = vmul.f32 %v6164_v0, %v6164_v0 }
 0x57d   : > { %v6323_v31 = vsub.f32 %v6291_v59, %v6307_v12  ;;  %v6294_v47 = vmul.f32 0.125, %v6278_v24  ;;  %v6310_v55 = vmul.f32 %v6166_v33, %v6166_v33  ;;  %v6419_v51 = vrot.slane %v12579_v36, %v12332_v16 }
 0x57e   : > { %v6325_v56 = vsub.f32 %v6293_v2, %v6309_v22  ;;  %v6324_v9 = vsub.f32 %v6292_v46, %v6308_v50  ;;  %v6427_v15 = vrot.slane %v12579_v36, %v12337_v45  ;;  %v6423_v23 = vrot.slane %v12579_v36, %v12342_v19 }
 0x57f   : > { %v6346_v4 = vadd.f32 1e-05, %v6323_v31  ;;  %v6326_v18 = vsub.f32 %v6294_v47, %v6310_v55  ;;  %v6431_v32 = vrot.slane %v12579_v36, %v12345_v25  ;;  %v6641_v46 = vrot.slane %v12599_v17, %v11974_v20  ;;  %v9615_v31 = vld [vmem:[%s11346_s24 + $0x11] ss:$2 sm:$0xff] }
 0x580   : > { %v6348_v13 = vadd.f32 1e-05, %v6325_v56  ;;  %v6347_v57 = vadd.f32 1e-05, %v6324_v9 }
 0x581   : > { %10829 = vrsqrt.f32 %v6346_v4  ;;  %v6349_v63 = vadd.f32 1e-05, %v6326_v18  ;;  %v6672_v55 = vmul.f32 %v6641_v46, %v12519_v30 }
 0x582   : > { %10831 = vrsqrt.f32 %v6348_v13 }
 0x583   : > { %10833 = vrsqrt.f32 %v6347_v57 }
 0x584   : > { %10835 = vrsqrt.f32 %v6349_v63 }
 0x58b   : > { %v10830_v14 = vpop.eup %10829 }
 0x58c   : > { %v10832_v1 = vpop.eup %10831  ;;  %v6460_v43 = vmul.f32 %v10830_v14, %v6419_v51  ;;  %v10709_v14 = vld [vmem:[%s11336_s3 + $0x600] ss:$8 sps:$4 sm:$0xff]  }
 0x58d   : > { %v10834_v52 = vpop.eup %10833  ;;  %v6462_v38 = vmul.f32 %v10832_v1, %v6427_v15 }
 0x58e   : > { %v10836_v40 = vpop.eup %10835  ;;  %v6476_v53 = vmul.f32 %v6460_v43, %v6163_v48  ;;  %v6649_v7 = vrot.slane %v6460_v43, %v11974_v20  ;;  %v6461_v60 = vmul.f32 %v10834_v52, %v6423_v23  ;;  %v10717_v52 = vld [vmem:[%s11336_s3 + $0x614] ss:$8 sps:$4 sm:$0xff]  }
 0x58f   : > { %v6478_v42 = vmul.f32 %v6462_v38, %v6165_v37  ;;  %v6657_v34 = vrot.slane %v6462_v38, %v11974_v20  ;;  %v6463_v27 = vmul.f32 %v10836_v40, %v6431_v32  ;;  %v6633_v37 = vrot.slane %v12596_v28, %v11974_v20  ;;  %v10712_v32 = vld [vmem:[%s11336_s3 + $0x700] ss:$8 sps:$4 sm:$0xff]   ;;  %v10720_v38 = vld [vmem:[%s11336_s3 + $0x714] ss:$8 sps:$4 sm:$0xff]  }
 0x590   : > { %v6674_v35 = vmul.f32 %v6649_v7, %v12696_v54  ;;  %v6477_v21 = vmul.f32 %v6461_v60, %v6164_v0  ;;  %v6585_v54 = vrot.slane %v6577_v5, %v12014_v3  ;;  %v6637_v0 = vrot.slane %v12604_v26, %v11974_v20  ;;  %v10715_v7 = vld [vmem:[%s11336_s3 + $0x610] ss:$8 sps:$4 sm:$0xff]  }
 0x591   : > { %v6676_v59 = vmul.f32 %v6657_v34, %v12701_v58  ;;  %v6479_v36 = vmul.f32 %v6463_v27, %v6166_v33  ;;  %v6645_v33 = vrot.slane %v12609_v10, %v11974_v20  ;;  %v6653_v50 = vrot.slane %v6461_v60, %v11974_v20  ;;  %v10718_v60 = vld [vmem:[%s11336_s3 + $0x710] ss:$8 sps:$4 sm:$0xff]   ;;  %v10726_v34 = vld [vmem:[%s11336_s3 + $0x724] ss:$8 sps:$4 sm:$0xff]  }
 0x592   : > { %v6547_v12 = vcombine.low %v6476_v53, %v6477_v21  ;;  %v6661_v28 = vrot.slane %v6463_v27, %v11974_v20  ;;  %v6670_v17 = vmul.f32 %v6633_v37, %v12513_v41  ;;  %v6671_v44 = vmul.f32 %v6637_v0, %v12521_v6  ;;  %v10721_v21 = vld [vmem:[%s11336_s3 + $0x620] ss:$8 sps:$4 sm:$0xff]   ;;  %v10727_v0 = vld [vmem:[%s11336_s3 + $0x630] ss:$8 sps:$4 sm:$0xff]  }
 0x593   : > { %v6548_v24 = vcombine.low %v6478_v42, %v6479_v36  ;;  %v6675_v26 = vmul.f32 %v6653_v50, %v12703_v62  ;;  %v10723_v42 = vld [vmem:[%s11336_s3 + $0x624] ss:$8 sps:$4 sm:$0xff]  }
 0x594   : > { %v6569_v2 = vrot.slane %v6547_v12, %v12014_v3  ;;  %v6677_v5 = vmul.f32 %v6661_v28, %v12711_v61  ;;  %v10735_v50 = vld [vmem:[%s11336_s3 + $0x644] ss:$8 sps:$4 sm:$0xff]   ;;  %v10733_v28 = vld [vmem:[%s11336_s3 + $0x640] ss:$8 sps:$4 sm:$0xff]  }
 0x595   : > { %v6576_v48 = vrot.slane %v6548_v24, %v12014_v3  ;;  %v10729_v24 = vld [vmem:[%s11336_s3 + $0x634] ss:$8 sps:$4 sm:$0xff]  }
 0x597   : > { %v6578_v22 = vcombine.low %v6569_v2, %v6576_v48  ;;  %v10732_v2 = vld [vmem:[%s11336_s3 + $0x734] ss:$8 sps:$4 sm:$0xff]  }
 0x599   : > { %v6592_v58 = vrot.slane %v6578_v22, %v12014_v3  ;;  %v6673_v3 = vmul.f32 %v6645_v33, %v12530_v49  ;;  %v10730_v33 = vld [vmem:[%s11336_s3 + $0x730] ss:$8 sps:$4 sm:$0xff]  }
 0x59b   : > { %v6593_v47 = vcombine.low %v6585_v54, %v6592_v58 }
 0x59d   : > { %v6597_v11 = vsub.f32 %v9615_v31, %v6593_v47  ;;  %v10738_v31 = vld [vmem:[%s11336_s3 + $0x744] ss:$8 sps:$4 sm:$0xff]   ;;  %v10736_v47 = vld [vmem:[%s11336_s3 + $0x740] ss:$8 sps:$4 sm:$0xff]  }
 0x59f   : > { %v6719_v10 = vrot.slane %v6597_v11, %v12955_v29  ;;  %v6727_v56 = vrot.slane %v6597_v11, %v12956_v8  ;;  %v6715_v9 = vrot.slane %v6597_v11, %v11974_v20  ;;  %v6723_v4 = vrot.slane %v6597_v11, %v12957_v39 }
 0x5a0   : > { %v6735_v41 = vrot.slane %v6597_v11, %v12342_v19  ;;  %v6743_v30 = vrot.slane %v6597_v11, %v12345_v25  ;;  %v6731_v6 = vrot.slane %v6597_v11, %v12332_v16  ;;  %v6739_v49 = vrot.slane %v6597_v11, %v12337_v45  ;;  %v10739_v11 = vld [vmem:[%s11336_s3 + $0x650] ss:$8 sps:$4 sm:$0xff]  }
 0x5a1   : > { %v6769_v18 = vadd.f32 %v6719_v10, %v6671_v44  ;;  %v6771_v62 = vadd.f32 %v6727_v56, %v6673_v3  ;;  %v6768_v61 = vadd.f32 %v6715_v9, %v6670_v17  ;;  %v6770_v29 = vadd.f32 %v6723_v4, %v6672_v55  ;;  %v10741_v17 = vld [vmem:[%s11336_s3 + $0x654] ss:$8 sps:$4 sm:$0xff]   ;;  %v10742_v44 = vld [vmem:[%s11336_s3 + $0x750] ss:$8 sps:$4 sm:$0xff]   ;;  %v10747_v3 = vld [vmem:[%s11336_s3 + $0x664] ss:$8 sps:$4 sm:$0xff]  }
 0x5a2   : > { %v6773_v13 = vadd.f32 %v6735_v41, %v6675_v26  ;;  %v6775_v8 = vadd.f32 %v6743_v30, %v6677_v5  ;;  %v12764_v57 = vadd.f32 %v6731_v6, %v6674_v35  ;;  %v12766_v39 = vadd.f32 %v6739_v49, %v6676_v59  ;;  %v10724_v59 = vld [vmem:[%s11336_s3 + $0x720] ss:$8 sps:$4 sm:$0xff]   ;;  %v10744_v55 = vld [vmem:[%s11336_s3 + $0x754] ss:$8 sps:$4 sm:$0xff]   ;;  %v10750_v26 = vld [vmem:[%s11336_s3 + $0x764] ss:$8 sps:$4 sm:$0xff]  }
 0x5a3   : > { %v6785_v19 = vmax.f32 %v6769_v18, 0.0  ;;  %v6787_v25 = vmax.f32 %v6771_v62, 0.0  ;;  %v6784_v63 = vmax.f32 %v6768_v61, 0.0  ;;  %v6786_v16 = vmax.f32 %v6770_v29, 0.0  ;;  %v10745_v5 = vld [vmem:[%s11336_s3 + $0x660] ss:$8 sps:$4 sm:$0xff]  }
 0x5a4   : > { %v6789_v51 = vmax.f32 %v6773_v13, 0.0  ;;  %v6791_v45 = vmax.f32 %v6775_v8, 0.0  ;;  %v10748_v10 = vld [vmem:[%s11336_s3 + $0x760] ss:$8 sps:$4 sm:$0xff]   ;;  %v10753_v56 = vld [vmem:[%s11336_s3 + $0x674] ss:$8 sps:$4 sm:$0xff]  }
 0x5a5   : > { %v6803_v15 = vpack.c.bf16 %v6785_v19, %v6785_v19  ;;  %v6805_v23 = vpack.c.bf16 %v6787_v25, %v6787_v25  ;;  %v6802_v1 = vpack.c.bf16 %v6784_v63, %v6784_v63  ;;  %v6804_v43 = vpack.c.bf16 %v6786_v16, %v6786_v16  ;;  %v10756_v9 = vld [vmem:[%s11336_s3 + $0x774] ss:$8 sps:$4 sm:$0xff]   ;;  %v10751_v4 = vld [vmem:[%s11336_s3 + $0x670] ss:$8 sps:$4 sm:$0xff]   ;;  %v10759_v30 = vld [vmem:[%s11336_s3 + $0x684] ss:$8 sps:$4 sm:$0xff]  }
 0x5a6   : > { %v6807_v40 = vpack.c.bf16 %v6789_v51, %v6789_v51  ;;  %v6809_v53 = vpack.c.bf16 %v6791_v45, %v6791_v45  ;;  %v10754_v41 = vld [vmem:[%s11336_s3 + $0x770] ss:$8 sps:$4 sm:$0xff]   ;;  %v10762_v6 = vld [vmem:[%s11336_s3 + $0x784] ss:$8 sps:$4 sm:$0xff]   ;;  %v10757_v49 = vld [vmem:[%s11336_s3 + $0x680] ss:$8 sps:$4 sm:$0xff]  }
 0x5a7   : > { %8542 = vmatprep.mubr.bf16.mxu0 %v6803_v15  ;;  %8583 = vmatprep.mubr.bf16.mxu1 %v6805_v23  ;;  %v10760_v18 = vld [vmem:[%s11336_s3 + $0x780] ss:$8 sps:$4 sm:$0xff]   ;;  %v10765_v62 = vld [vmem:[%s11336_s3 + $0x694] ss:$8 sps:$4 sm:$0xff]   ;;  %v10763_v29 = vld [vmem:[%s11336_s3 + $0x690] ss:$8 sps:$4 sm:$0xff]  }
 0x5a8   : > { %8543 = vmatmul.mubr.bf16.vlgmr.msra.gmra.mrb[24].mxu0 %v6802_v1  ;;  %8584 = vmatmul.mubr.bf16.vlgmr.msra.gmra.mrb[24].mxu1 %v6804_v43  ;;  %v10768_v61 = vld [vmem:[%s11336_s3 + $0x794] ss:$8 sps:$4 sm:$0xff]   ;;  %v10766_v13 = vld [vmem:[%s11336_s3 + $0x790] ss:$8 sps:$4 sm:$0xff]   ;;  %v10771_v8 = vld [vmem:[%s11336_s3 + $0x6a4] ss:$8 sps:$4 sm:$0xff]  }
 0x5a9   : > { %8593 = vmatpush1.bf16.msra.mxu0 %v10709_v14  ;;  %8634 = vmatpush1.bf16.msra.mxu1 %v10712_v32  ;;  %v10774_v19 = vld [vmem:[%s11336_s3 + $0x7a4] ss:$8 sps:$4 sm:$0xff]   ;;  %v10769_v25 = vld [vmem:[%s11336_s3 + $0x6a0] ss:$8 sps:$4 sm:$0xff]   ;;  %v10777_v16 = vld [vmem:[%s11336_s3 + $0x6b4] ss:$8 sps:$4 sm:$0xff]  }
 0x5aa   : > { %8624 = vmatprep.mubr.bf16.mxu0 %v6807_v40  ;;  %8665 = vmatprep.mubr.bf16.mxu1 %v6809_v53  ;;  %v10772_v63 = vld [vmem:[%s11336_s3 + $0x7a0] ss:$8 sps:$4 sm:$0xff]   ;;  %v10780_v51 = vld [vmem:[%s11336_s3 + $0x7b4] ss:$8 sps:$4 sm:$0xff]   ;;  %v10775_v45 = vld [vmem:[%s11336_s3 + $0x6b0] ss:$8 sps:$4 sm:$0xff]  }
 0x5ab   : > { %8594 = vmatprep.subr.bf16.mxu0 %v10717_v52  ;;  %8635 = vmatprep.subr.bf16.mxu1 %v10720_v38  ;;  %v10778_v15 = vld [vmem:[%s11336_s3 + $0x7b0] ss:$8 sps:$4 sm:$0xff]   ;;  %v10783_v23 = vld [vmem:[%s11336_s3 + $0x6c4] ss:$8 sps:$4 sm:$0xff]   ;;  %v10781_v32 = vld [vmem:[%s11336_s3 + $0x6c0] ss:$8 sps:$4 sm:$0xff]  }
 0x5ac   : > { %v8380_v27 = vpop.f32.mrb[16].mxu0  ;;  %v10786_v14 = vld [vmem:[%s11336_s3 + $0x7c4] ss:$8 sps:$4 sm:$0xff]   ;;  %v10784_v1 = vld [vmem:[%s11336_s3 + $0x7c0] ss:$8 sps:$4 sm:$0xff]  }
 0x5ad   : > { %8595 = vmatpush1.bf16.msra.mxu0 %v10715_v7  ;;  %8636 = vmatpush1.bf16.msra.mxu1 %v10718_v60  ;;  %v8382_v35 = vpop.f32.mrb[17].mxu0  ;;  %v10789_v43 = vld [vmem:[%s11336_s3 + $0x6d4] ss:$8 sps:$4 sm:$0xff]   ;;  %v10787_v38 = vld [vmem:[%s11336_s3 + $0x6d0] ss:$8 sps:$4 sm:$0xff]  }
 0x5ae   : > { %v8421_v36 = vpop.f32.mrb[16].mxu1  ;;  %8596 = vmatprep.subr.bf16.mxu0 %v10723_v42  ;;  %8637 = vmatprep.subr.bf16.mxu1 %v10726_v34  ;;  %v8384_v12 = vpop.f32.mrb[18].mxu0  ;;  %v10792_v52 = vld [vmem:[%s11336_s3 + $0x7d4] ss:$8 sps:$4 sm:$0xff]   ;;  %v10790_v40 = vld [vmem:[%s11336_s3 + $0x7d0] ss:$8 sps:$4 sm:$0xff]  }
 0x5af   : > { %v12780_v48 = vadd.f32 %v8421_v36, %v8380_v27  ;;  %v8423_v22 = vpop.f32.mrb[17].mxu1  ;;  %v8385_v37 = vpop.f32.mrb[19].mxu0  ;;  %v10795_v53 = vld [vmem:[%s11336_s3 + $0x6e4] ss:$8 sps:$4 sm:$0xff]   ;;  %v10793_v60 = vld [vmem:[%s11336_s3 + $0x6e0] ss:$8 sps:$4 sm:$0xff]  }
 0x5b0   : > { %v12782_v46 = vadd.f32 %v8423_v22, %v8382_v35  ;;  %v8425_v54 = vpop.f32.mrb[18].mxu1  ;;  %v10798_v7 = vld [vmem:[%s11336_s3 + $0x7e4] ss:$8 sps:$4 sm:$0xff]   ;;  %v10796_v42 = vld [vmem:[%s11336_s3 + $0x7e0] ss:$8 sps:$4 sm:$0xff]   ;;  %v6790_v36 = vmax.f32 %v12766_v39, 0.0 }
 0x5b1   : > { %8597 = vmatpush1.bf16.msra.mxu0 %v10721_v21  ;;  %8638 = vmatpush1.bf16.msra.mxu1 %v10724_v59  ;;  %v8426_v58 = vpop.f32.mrb[19].mxu1  ;;  %v10801_v34 = vld [vmem:[%s11336_s3 + $0x6f4] ss:$8 sps:$4 sm:$0xff]   ;;  %v10799_v35 = vld [vmem:[%s11336_s3 + $0x6f0] ss:$8 sps:$4 sm:$0xff]   ;;  %v6788_v59 = vmax.f32 %v12764_v57, 0.0 }
 0x5b2   : > { %8598 = vmatprep.subr.bf16.mxu0 %v10729_v24  ;;  %8639 = vmatprep.subr.bf16.mxu1 %v10732_v2  ;;  %v10804_v27 = vld [vmem:[%s11336_s3 + $0x7f4] ss:$8 sps:$4 sm:$0xff]   ;;  %v10802_v21 = vld [vmem:[%s11336_s3 + $0x7f0] ss:$8 sps:$4 sm:$0xff]   ;;  %v6808_v24 = vpack.c.bf16 %v6790_v36, %v6790_v36 }
 0x5b3   : > { %v6806_v12 = vpack.c.bf16 %v6788_v59, %v6788_v59 }
 0x5b5   : > { %8599 = vmatpush1.bf16.msra.mxu0 %v10727_v0  ;;  %8640 = vmatpush1.bf16.msra.mxu1 %v10730_v33 }
 0x5b6   : > { %8600 = vmatprep.subr.bf16.mxu0 %v10735_v50  ;;  %8641 = vmatprep.subr.bf16.mxu1 %v10738_v31 }
 0x5b9   : > { %8601 = vmatpush1.bf16.msra.mxu0 %v10733_v28  ;;  %8642 = vmatpush1.bf16.msra.mxu1 %v10736_v47 }
 0x5ba   : > { %8602 = vmatprep.subr.bf16.mxu0 %v10741_v17  ;;  %8643 = vmatprep.subr.bf16.mxu1 %v10744_v55 }
 0x5bd   : > { %8603 = vmatpush1.bf16.msra.mxu0 %v10739_v11  ;;  %8644 = vmatpush1.bf16.msra.mxu1 %v10742_v44 }
 0x5be   : > { %8604 = vmatprep.subr.bf16.mxu0 %v10747_v3  ;;  %8645 = vmatprep.subr.bf16.mxu1 %v10750_v26 }
 0x5c1   : > { %8605 = vmatpush1.bf16.msra.mxu0 %v10745_v5  ;;  %8646 = vmatpush1.bf16.msra.mxu1 %v10748_v10 }
 0x5c2   : > { %8606 = vmatprep.subr.bf16.mxu0 %v10753_v56  ;;  %8647 = vmatprep.subr.bf16.mxu1 %v10756_v9 }
 0x5c5   : > { %8607 = vmatpush1.bf16.msra.mxu0 %v10751_v4  ;;  %8648 = vmatpush1.bf16.msra.mxu1 %v10754_v41 }
 0x5c6   : > { %8608 = vmatprep.subr.bf16.mxu0 %v10759_v30  ;;  %8649 = vmatprep.subr.bf16.mxu1 %v10762_v6 }
 0x5c9   : > { %8609 = vmatpush1.bf16.msra.mxu0 %v10757_v49  ;;  %8650 = vmatpush1.bf16.msra.mxu1 %v10760_v18  ;;  %v6792_v49 = vld [vmem:[#allocation3] sm:$0xff] }
 0x5ca   : > { %8610 = vmatprep.subr.bf16.mxu0 %v10765_v62  ;;  %8651 = vmatprep.subr.bf16.mxu1 %v10768_v61 }
 0x5cd   : > { %8611 = vmatpush1.bf16.msra.mxu0 %v10763_v29  ;;  %8652 = vmatpush1.bf16.msra.mxu1 %v10766_v13  ;;  %v6793_v13 = vld [vmem:[#allocation3 + $0x8] sm:$0xff] }
 0x5ce   : > { %8612 = vmatprep.subr.bf16.mxu0 %v10771_v8  ;;  %8653 = vmatprep.subr.bf16.mxu1 %v10774_v19 }
 0x5d1   : > { %8613 = vmatpush1.bf16.msra.mxu0 %v10769_v25  ;;  %8654 = vmatpush1.bf16.msra.mxu1 %v10772_v63 }
 0x5d2   : > { %8614 = vmatprep.subr.bf16.mxu0 %v10777_v16  ;;  %8655 = vmatprep.subr.bf16.mxu1 %v10780_v51 }
 0x5d5   : > { %8615 = vmatpush1.bf16.msra.mxu0 %v10775_v45  ;;  %8656 = vmatpush1.bf16.msra.mxu1 %v10778_v15  ;;  %v8684_v45 = vld [vmem:[#allocation11] sm:$0x3] (!%p9872_p9) }
 0x5d6   : > { %8616 = vmatprep.subr.bf16.mxu0 %v10783_v23  ;;  %8657 = vmatprep.subr.bf16.mxu1 %v10786_v14  ;;  %v8689_v23 = vrot.slane (!%p9872_p9), %v8684_v45, %v11974_v20  ;;  %v12959_v14 = vld [vmem:[#allocation21_spill] sm:$0xff] (!%p9872_p9) }
 0x5d9   : > { %8617 = vmatpush1.bf16.msra.mxu0 %v10781_v32  ;;  %8658 = vmatpush1.bf16.msra.mxu1 %v10784_v1  ;;  %v8693_v32 = vrot.slane (!%p9872_p9), %v8684_v45, %v12959_v14 }
 0x5da   : > { %8618 = vmatprep.subr.bf16.mxu0 %v10789_v43  ;;  %8659 = vmatprep.subr.bf16.mxu1 %v10792_v52 }
 0x5dd   : > { %8619 = vmatpush1.bf16.msra.mxu0 %v10787_v38  ;;  %8660 = vmatpush1.bf16.msra.mxu1 %v10790_v40 }
 0x5de   : > { %8620 = vmatprep.subr.bf16.mxu0 %v10795_v53  ;;  %8661 = vmatprep.subr.bf16.mxu1 %v10798_v7 }
 0x5e1   : > { %8621 = vmatpush1.bf16.msra.mxu0 %v10793_v60  ;;  %8662 = vmatpush1.bf16.msra.mxu1 %v10796_v42 }
 0x5e2   : > { %8622 = vmatprep.subr.bf16.mxu0 %v10801_v34  ;;  %8663 = vmatprep.subr.bf16.mxu1 %v10804_v27 }
 0x5e5   : > { %8623 = vmatpush1.bf16.msra.mxu0 %v10799_v35  ;;  %8664 = vmatpush1.bf16.msra.mxu1 %v10802_v21 }
 0x5e8   : > { %8625 = vmatmul.mubr.bf16.vlgmr.msra.gmra.mrb[28].mxu0 %v6806_v12  ;;  %8666 = vmatmul.mubr.bf16.vlgmr.msra.gmra.mrb[28].mxu1 %v6808_v24 }
 0x5ec   : > { %v8462_v2 = vpop.f32.mrb[20].mxu0 }
 0x5ed   : > { %v8463_v22 = vadd.f32 %v8462_v2, %v12780_v48  ;;  %v8464_v37 = vpop.f32.mrb[21].mxu0 }
 0x5ee   : > { %v8503_v54 = vpop.f32.mrb[20].mxu1  ;;  %v8465_v58 = vadd.f32 %v8464_v37, %v12782_v46  ;;  %v8466_v0 = vpop.f32.mrb[22].mxu0 }
 0x5ef   : > { %v8504_v33 = vadd.f32 %v8503_v54, %v8463_v22  ;;  %v8505_v50 = vpop.f32.mrb[21].mxu1  ;;  %v8467_v31 = vpop.f32.mrb[23].mxu0 }
 0x5f0   : > { %v8506_v57 = vadd.f32 %v8505_v50, %v8465_v58  ;;  %v8507_v28 = vpop.f32.mrb[22].mxu1 }
 0x5f1   : > { %v8508_v39 = vpop.f32.mrb[23].mxu1 }
 0x67b   : > { %v8544_v47 = vpop.f32.mrb[24].mxu0  ;;  %v8585_v17 = vpop.f32.mrb[24].mxu1 }
 0x67c   : > { %v8545_v55 = vadd.f32 %v8544_v47, %v8504_v33  ;;  %v8546_v11 = vpop.f32.mrb[25].mxu0  ;;  %v8587_v44 = vpop.f32.mrb[25].mxu1 }
 0x67d   : > { %v8547_v3 = vadd.f32 %v8546_v11, %v8506_v57  ;;  %v8548_v26 = vpop.f32.mrb[26].mxu0  ;;  %v8589_v5 = vpop.f32.mrb[26].mxu1 }
 0x67e   : > { %v8586_v48 = vadd.f32 %v8585_v17, %v8545_v55  ;;  %v8549_v10 = vpop.f32.mrb[27].mxu0  ;;  %v8590_v56 = vpop.f32.mrb[27].mxu1 }
 0x67f   : > { %v8588_v9 = vadd.f32 %v8587_v44, %v8547_v3 }
 0x6bb   : > { %v8626_v46 = vpop.f32.mrb[28].mxu0  ;;  %v8667_v4 = vpop.f32.mrb[28].mxu1 }
 0x6bc   : > { %v8627_v41 = vadd.f32 %v8626_v46, %v8586_v48  ;;  %v8628_v30 = vpop.f32.mrb[29].mxu0  ;;  %v8669_v6 = vpop.f32.mrb[29].mxu1 }
 0x6bd   : > { %v8629_v18 = vadd.f32 %v8628_v30, %v8588_v9  ;;  %v8630_v62 = vpop.f32.mrb[30].mxu0  ;;  %v8671_v61 = vpop.f32.mrb[30].mxu1  ;;  %8681 = sbr.rel (%p9872_p9) target bundleno = 1742 (0x6ce), region = 76 }
 0x6be   : > { %v8668_v29 = vadd.f32 %v8667_v4, %v8627_v41  ;;  %v8631_v8 = vpop.f32.mrb[31].mxu0  ;;  %v8672_v19 = vpop.f32.mrb[31].mxu1 }
 0x6bf   : > { %v8670_v25 = vadd.f32 %v8669_v6, %v8629_v18 }
 0x6c0   : > { %v8674_v63 = vadd.f32 %v8668_v29, %v6792_v49 }
 0x6c1   : > { %v8675_v16 = vadd.f32 %v8670_v25, %v6793_v13 }
 0x6c2   : > { %8676 = vst [vmem:[#allocation3] sm:$0xff] %v8674_v63 }
 0x6c3   : > { %8677 = vst [vmem:[#allocation3 + $0x8] sm:$0xff] %v8675_v16 }
 0x6c9   : > { %v8682_v51 = vld [vmem:[#allocation3] sm:$0xff] }
 0x6ca   : > { %v8683_v15 = vld [vmem:[#allocation3 + $0x8] sm:$0xff]  ;;  %v8696_v1 = vadd.f32 %v8689_v23, %v8682_v51 }
 0x6cb   : > { %v8697_v43 = vadd.f32 %v8693_v32, %v8683_v15 }
 0x6cc   : > { %8698 = vst [vmem:[#allocation12] sm:$0xff] %v8696_v1 }
 0x6cd   : > { %8699 = vst [vmem:[#allocation12 + $0x8] sm:$0xff] %v8697_v43 }
 0x6ce PF: > { %p9986_p0 = scmp.eq.s32.totalorder %s11134_s28, 1  ;;  %s11074_s1 = smov [#allocation12]  }
 0x6cf   : > { %s8707_s2 = sshll.u32 %s11074_s1, 4  ;;  %s8708_s2 = int_to_ptr.vmem [resolvable:$true] %s8707_s2 }
 0x6d0   : > { %s10982_s3 = scalar_lea.vmem %s8708_s2, 256  ;;  %p10989_p13 = scmp.lt.s32.totalorder %s8708_s2, %s8708_s2 }
 0x6d1   : > { %p10983_p7 = scmp.ne.s32.totalorder %s8708_s2, %s10982_s3  ;;  %p10990_p5 = scmp.lt.s32.totalorder %s10982_s3, %s10982_s3 }
 0x6d3   : > { %p10984_p11 = pnand %p10983_p7, %p9986_p0  ;;  %p10991_p10 = por %p10990_p5, %p10989_p13 }
 0x6d5   : > { %p10985_p6 = pneg %p10984_p11 }
 0x6d7   : > { %p10992_p1 = pnand %p10991_p10, %p10985_p6 }
 0x6d9   : > { %10995 = shalt.err (!%p10992_p1)
}
 0x6da   : > { %s12960_s23 = sld [smem:[#allocation27_spill]] }
 0x6e0   : > { %s10996_s20 = scalar_lea.hbm %s12960_s23, 256 }
 0x6e1   : > { %p10997_p8 = scmp.ne.s32.totalorder %s12960_s23, %s10996_s20  ;;  %p11002_p12 = scmp.lt.u32.totalorder %s10996_s20, %s12960_s23 }
 0x6e3   : > { %p10998_p3 = pnand %p10997_p8, %p9986_p0 }
 0x6e5   : > { %p10999_p4 = pneg %p10998_p3 }
 0x6e7   : > { %p11004_p2 = pnand %p11002_p12, %p10999_p4 }
 0x6e9   : > { %11007 = shalt.err (!%p11004_p2)
}
 0x6ea   : > { %9959 = dma.vmem_to_hbm [thread:$0]  (%p9986_p0), %s8708_s2, 256, %s12960_s23, [#allocation6]  }
 0x6eb   : > { %11041 = dma.done.wait (%p9986_p0), [#allocation6], 256  }
 0x6ec   : > { %11043 = vsyncadd (%p9986_p0), [#allocation6], 4294967040 }
 0x6ed PF: > { %s12961_s27 = sld [smem:[#allocation18_spill]]  ;;  %s12962_s9 = sld [smem:[#allocation19_spill]] }
 0x6ee   : > { %s12963_s24 = smov %s11050_s25  ;;  %s12964_s25 = smov %s11054_s26 }
 0x6f3   : > { %p17_p9 = scmp.ge.s32.totalorder %s12961_s27, 4   ;;  %s12965_s26 = smov %s12962_s9 }
 0x6f5   :  { %19 = sbr.rel (!%p17_p9) target bundleno = 9 (0x9), region = 121 }
 0x6fc   :  { %8720 = vsyncpa [#allocation5], 1 }
 0x6fd   :  { %8722 = vsyncpa [#allocation5 + $0x1], 1 }
 0x6fe   :  { %8723 = vsyncpa [#allocation8], 1 }
 0x6ff   :  { %8724 = vsyncpa [#allocation6], 1 }
 0x700   :  { %8726 = vsyncpa [#allocation6 + $0x1], 1 }

</bundles_post_ra>
